<compile_context>
chip_gen: v5e
topology: v5e:2x2
jax: 0.10.0
libtpu: 0.0.40
codegen_flags: <defaults>
</compile_context>

<pallas_src>
import numpy as np
import jax
import jax.numpy as jnp
from jax.experimental import pallas as pl
from jax.experimental.pallas import tpu as pltpu

BN_EPS = 1e-5
_VMEM = pl.BlockSpec(memory_space=pltpu.MemorySpace.VMEM)


# =============================================================================
# Raw parameters (mirror the PyTorch module's parameter shapes; synthetic init)
# =============================================================================
def init_params(key, num_channels=4, ffc=8, bottleneck=16, batch=2, hw=16):
    feat = 4 * ffc * (hw // 8) * (hw // 8) * batch

    def p(k, shape, scale=0.1):
        return (scale * jax.random.normal(k, shape)).astype(jnp.float32)

    ks = jax.random.split(key, 20)
    return {
        # encoder convs: (Cout, Cin, kh, kw) + bias
        "c1_w": p(ks[0], (ffc, num_channels, 3, 3)),       "c1_b": p(ks[1], (ffc,)),
        "c2_w": p(ks[2], (2 * ffc, ffc, 5, 5)),            "c2_b": p(ks[3], (2 * ffc,)),
        "c3_w": p(ks[4], (4 * ffc, 2 * ffc, 3, 3)),        "c3_b": p(ks[5], (4 * ffc,)),
        # fcs stored as (in_features[NCHW-flat order], out) + bias
        "fc1_w": p(ks[6], (feat, 2 * bottleneck)),         "fc1_b": p(ks[7], (2 * bottleneck,)),
        "fc2_w": p(ks[8], (2 * bottleneck, bottleneck)),   "fc2_b": p(ks[9], (bottleneck,)),
        "dfc2_w": p(ks[10], (bottleneck, 2 * bottleneck)), "dfc2_b": p(ks[11], (2 * bottleneck,)),
        "dfc1_w": p(ks[12], (2 * bottleneck, feat)),       "dfc1_b": p(ks[13], (feat,)),
        # decoder tconvs: (Cin, Cout, kh, kw) + bias
        "t3_w": p(ks[14], (4 * ffc, 2 * ffc, 3, 3)),       "t3_b": p(ks[15], (2 * ffc,)),
        "t2_w": p(ks[16], (2 * ffc, ffc, 5, 5)),           "t2_b": p(ks[17], (ffc,)),
        "t1_w": p(ks[18], (ffc, num_channels, 3, 3)),      "t1_b": p(ks[19], (num_channels,)),
        # batch norms (PyTorch default init: gamma=1, beta=0); shared as in module
        "bn_c1_g": jnp.ones((ffc,), jnp.float32),           "bn_c1_b": jnp.zeros((ffc,), jnp.float32),
        "bn_c2_g": jnp.ones((2 * ffc,), jnp.float32),       "bn_c2_b": jnp.zeros((2 * ffc,), jnp.float32),
        "bn_c3_g": jnp.ones((4 * ffc,), jnp.float32),       "bn_c3_b": jnp.zeros((4 * ffc,), jnp.float32),
        "bn_in_g": jnp.ones((num_channels,), jnp.float32),  "bn_in_b": jnp.zeros((num_channels,), jnp.float32),
    }


# =============================================================================
# One-time host-side precomputation: fold stride / padding / dilation / kernel
# flip / weight taps into small matrices so each (t)conv layer becomes
#     out(B*Ho, Wo*Cout) = sum_i HS_i @ X(B*Hin, Win*Cin) @ N_i
# =============================================================================
def _conv_left(kh, s, p, B, hin, ho):
    hs = np.zeros((kh, B * ho, B * hin), np.float32)
    for i in range(kh):
        for b in range(B):
            for o in range(ho):
                hi_ = s * o + i - p
                if 0 <= hi_ < hin:
                    hs[i, b * ho + o, b * hin + hi_] = 1.0
    return hs


def _conv_right(w, s, p, win, wo):
    # w: (Cout, Cin, kh, kw) torch Conv2d layout
    cout, cin, kh, kw = w.shape
    n = np.zeros((kh, win * cin, wo * cout), np.float32)
    for i in range(kh):
        for o in range(wo):
            for j in range(kw):
                wi_ = s * o + j - p
                if 0 <= wi_ < win:
                    n[i, wi_ * cin:(wi_ + 1) * cin, o * cout:(o + 1) * cout] += w[:, :, i, j].T
    return n


def _tconv_left(kh, s, p, B, hin, ho):
    lo = kh - 1 - p
    hs = np.zeros((kh, B * ho, B * hin), np.float32)
    for i in range(kh):
        for b in range(B):
            for o in range(ho):
                t = o + i - lo
                if t >= 0 and t % s == 0 and t // s < hin:
                    hs[i, b * ho + o, b * hin + t // s] = 1.0
    return hs


def _tconv_right(wt, s, p, win, wo):
    # wt: (Cin, Cout, kh, kw) torch ConvTranspose2d layout; flipped kernel folded in
    cin, cout, kh, kw = wt.shape
    lo = kh - 1 - p
    n = np.zeros((kh, win * cin, wo * cout), np.float32)
    for i in range(kh):
        for wi_ in range(win):
            for o in range(wo):
                j = s * wi_ - o + lo
                if 0 <= j < kw:
                    n[i, wi_ * cin:(wi_ + 1) * cin, o * cout:(o + 1) * cout] += \
                        wt[:, :, kh - 1 - i, kw - 1 - j]
    return n


def prepare_fused(params, *, batch=2, num_channels=4, hw=16, ffc=8, bottleneck=16):
    B = batch
    npar = {k: np.asarray(v, np.float32) for k, v in params.items()}

    # (weight, bias, bn prefix, kind, stride, pad, Hin, Hout)   [square images]
    layer_defs = [
        ("c1_w", "c1_b", "bn_c1", "conv",  2, 1, hw,      hw // 2),
        ("c2_w", "c2_b", "bn_c2", "conv",  2, 2, hw // 2, hw // 4),
        ("c3_w", "c3_b", "bn_c3", "conv",  2, 1, hw // 4, hw // 8),
        ("t3_w", "t3_b", "bn_c2", "tconv", 2, 1, hw // 8, hw // 4),
        ("t2_w", "t2_b", "bn_c1", "tconv", 2, 2, hw // 4, hw // 2),
        ("t1_w", "t1_b", "bn_in", "tconv", 2, 1, hw // 2, hw),
    ]

    layer_inputs, khs, flops = [], [], 0
    for wname, bname, bnname, kind, s, p, hin, hout in layer_defs:
        w = npar[wname]
        if kind == "conv":
            cout, cin, kh, _ = w.shape
            hs = _conv_left(kh, s, p, B, hin, hout)
            nmat = _conv_right(w, s, p, hin, hout)
        else:
            cin, cout, kh, _ = w.shape
            hs = _tconv_left(kh, s, p, B, hin, hout)
            nmat = _tconv_right(w, s, p, hin, hout)
        cols = hout * cout
        bgb = np.stack([np.tile(npar[bname], hout),
                        np.tile(npar[bnname + "_g"], hout),
                        np.tile(npar[bnname + "_b"], hout)]).reshape(3, 1, cols)
        # channel mean-broadcast matrix for BN in (w, c) column space
        amat = np.kron(np.ones((hout, hout), np.float32) / np.float32(hout),
                       np.eye(cout, dtype=np.float32))
        khs.append(kh)
        flops += kh * 2 * ((B * hout) * (B * hin) * (hin * cin)
                           + (B * hout) * (hin * cin) * cols) + 4 * cols * cols
        layer_inputs += [hs, nmat, bgb.astype(np.float32), amat]

    # --- FC chain; NCHW flatten permutation folded into fc1 / dfc1 weights ---
    H3 = hw // 8
    C3 = 4 * ffc
    R = B * H3                 # rows of the 2-D activation layout at the bottleneck
    CW = H3 * C3               # cols of the 2-D activation layout at the bottleneck
    feat = B * C3 * H3 * H3
    perm = np.zeros((feat,), np.int64)
    idx = 0
    for b in range(B):
        for h in range(H3):
            for w_ in range(H3):
                for c in range(C3):
                    perm[idx] = ((b * C3 + c) * H3 + h) * H3 + w_   # NCHW flat index
                    idx += 1
    w1p3 = npar["fc1_w"][perm, :].reshape(R, CW, 2 * bottleneck)
    w4p3 = np.transpose(npar["dfc1_w"][:, perm].reshape(2 * bottleneck, R, CW),
                        (1, 0, 2)).copy()
    b4p3 = npar["dfc1_b"][perm].reshape(R, 1, CW)
    eye3 = np.eye(R, dtype=np.float32).reshape(R, R, 1)   # per-row one-hot columns

    fc_inputs = [
        w1p3, npar["fc1_b"].reshape(1, -1),
        npar["fc2_w"], npar["fc2_b"].reshape(1, -1),
        npar["dfc2_w"], npar["dfc2_b"].reshape(1, -1),
        w4p3, b4p3, eye3,
    ]
    flops += 2 * (2 * feat * 2 * bottleneck + 4 * bottleneck * bottleneck)

    prepared = tuple(jnp.asarray(a, jnp.float32) for a in (layer_inputs + fc_inputs))
    meta = dict(khs=tuple(khs), B=B, hw=hw, C=num_channels, R=R, CW=CW,
                bottleneck=bottleneck, flops=int(flops))
    return prepared, meta


# =============================================================================
# The single fused Pallas kernel
# =============================================================================
def _make_fused_kernel(khs, R):
    n_layers = len(khs)
    n_enc = n_layers // 2   # 3 encoder convs, then FC chain, then 3 tconvs

    def kernel(*refs):
        layer_refs = refs[1:1 + 4 * n_layers]
        (w1_ref, b1_ref, w2_ref, b2_ref, w3_ref, b3_ref,
         w4_ref, b4_ref, eye_ref) = refs[1 + 4 * n_layers:1 + 4 * n_layers + 9]
        out_ref, z_ref = refs[-2], refs[-1]

        def conv_bn_relu(x, l):
            hs_ref, n_ref, bgb_ref, a_ref = layer_refs[4 * l:4 * l + 4]
            # unrolled tap loop: sum_i HS_i @ X @ N_i  (stride/pad/dilation folded in)
            acc = jnp.dot(jnp.dot(hs_ref[0], x, preferred_element_type=jnp.float32),
                          n_ref[0], preferred_element_type=jnp.float32)
            for i in range(1, khs[l]):
                acc = acc + jnp.dot(
                    jnp.dot(hs_ref[i], x, preferred_element_type=jnp.float32),
                    n_ref[i], preferred_element_type=jnp.float32)
            y = acc + bgb_ref[0]                               # conv bias
            amat = a_ref[...]
            # training-mode BatchNorm2d, two-pass variance, in (w,c) column space
            mean_c = jnp.dot(jnp.mean(y, axis=0, keepdims=True), amat,
                             preferred_element_type=jnp.float32)
            cen = y - mean_c
            var_c = jnp.dot(jnp.mean(cen * cen, axis=0, keepdims=True), amat,
                            preferred_element_type=jnp.float32)
            inv = jax.lax.rsqrt(var_c + BN_EPS)
            ybn = cen * (inv * bgb_ref[1]) + bgb_ref[2]        # * gamma + beta
            return jnp.maximum(ybn, 0.0)                       # ReLU

        x = refs[0][...]                                       # (B*H, W*C) activation

        # ---- encoder convs ----
        for l in range(n_enc):
            x = conv_bn_relu(x, l)

        # ---- FC bottleneck (whole-batch flatten folded into permuted weights) ----
        h = b1_ref[...]
        for r in range(R):
            xr = jnp.sum(eye_ref[r] * x, axis=0, keepdims=True)          # row r of x
            h = h + jnp.dot(xr, w1_ref[r], preferred_element_type=jnp.float32)
        h = jnp.maximum(h, 0.0)                                          # relu(fc1)
        h = jnp.maximum(jnp.dot(h, w2_ref[...],
                                preferred_element_type=jnp.float32) + b2_ref[...],
                        0.0)                                             # relu(fc2)
        z = 1.0 / (1.0 + jnp.exp(-h))                                    # sigmoid
        z_ref[...] = z
        h = jnp.maximum(jnp.dot(z, w3_ref[...],
                                preferred_element_type=jnp.float32) + b3_ref[...],
                        0.0)                                             # relu(dfc2)
        xdec = jnp.zeros_like(x)
        for r in range(R):
            row = jnp.maximum(jnp.dot(h, w4_ref[r],
                                      preferred_element_type=jnp.float32) + b4_ref[r],
                              0.0)                                       # relu(dfc1)
            xdec = xdec + eye_ref[r] * row                               # un-flatten
        x = xdec

        # ---- decoder tconvs ----
        for l in range(n_enc, n_layers):
            x = conv_bn_relu(x, l)

        out_ref[...] = x

    return kernel


def make_forward(prepared, meta):
    khs, R = meta["khs"], meta["R"]
    B, hw, C, bn = meta["B"], meta["hw"], meta["C"], meta["bottleneck"]
    kernel = _make_fused_kernel(khs, R)
    n_in = 1 + len(prepared)

    bytes_accessed = 4 * (2 * B * hw * hw * C + bn
                          + sum(int(np.prod(a.shape)) for a in prepared))
    cost = pl.CostEstimate(flops=meta["flops"],
                           transcendentals=len(khs) * 64 + bn,
                           bytes_accessed=int(bytes_accessed))

    fused = pl.pallas_call(
        kernel,
        out_shape=(jax.ShapeDtypeStruct((B * hw, hw * C), jnp.float32),
                   jax.ShapeDtypeStruct((1, bn), jnp.float32)),
        in_specs=[_VMEM] * n_in,
        out_specs=(_VMEM, _VMEM),
        cost_estimate=cost,
    )

    @jax.jit
    def forward(x_nchw, prep):
        # boundary layout plumbing only (input / output must touch HBM anyway)
        x2 = jnp.transpose(x_nchw, (0, 2, 3, 1)).reshape(B * hw, hw * C)
        out2d, z = fused(x2, *prep)
        out = jnp.transpose(out2d.reshape(B, hw, hw, C), (0, 3, 1, 2))
        return out, z.reshape(-1)

    return lambda x: forward(x, prepared)


# =============================================================================
# Pure-JAX reference of the PyTorch forward (used only to validate the kernel)
# =============================================================================
def reference_forward(params, x_nchw):
    def conv_bn_relu(x, w, b, g, bt, s, p):
        cout, cin, kh, kw = w.shape
        Bn, H, W, _ = x.shape
        xp = jnp.pad(x, ((0, 0), (p, p), (p, p), (0, 0)))
        Ho = (H + 2 * p - kh) // s + 1
        Wo = (W + 2 * p - kw) // s + 1
        cols = []
        for i in range(kh):
            for j in range(kw):
                cols.append(xp[:, i:i + s * Ho:s, j:j + s * Wo:s, :])
        patches = jnp.concatenate(cols, axis=-1).reshape(Bn * Ho * Wo, kh * kw * cin)
        wmat = jnp.transpose(w, (2, 3, 1, 0)).reshape(kh * kw * cin, cout)
        y = patches @ wmat + b
        mean = jnp.mean(y, axis=0, keepdims=True)
        var = jnp.mean((y - mean) ** 2, axis=0, keepdims=True)
        y = (y - mean) * jax.lax.rsqrt(var + BN_EPS) * g + bt
        return jnp.maximum(y, 0.0).reshape(Bn, Ho, Wo, cout)

    def tconv_bn_relu(x, w, b, g, bt, s, p, op):
        cin, cout, kh, kw = w.shape
        lo = kh - 1 - p
        hi = lo + op
        xd = jax.lax.pad(x, jnp.float32(0.0),
                         ((0, 0, 0), (lo, hi, s - 1), (lo, hi, s - 1), (0, 0, 0)))
        w_eq = jnp.transpose(jnp.flip(w, (2, 3)), (1, 0, 2, 3))
        return conv_bn_relu(xd, w_eq, b, g, bt, 1, 0)

    P = params
    x = jnp.transpose(x_nchw, (0, 2, 3, 1))
    x = conv_bn_relu(x, P["c1_w"], P["c1_b"], P["bn_c1_g"], P["bn_c1_b"], 2, 1)
    x = conv_bn_relu(x, P["c2_w"], P["c2_b"], P["bn_c2_g"], P["bn_c2_b"], 2, 2)
    x = conv_bn_relu(x, P["c3_w"], P["c3_b"], P["bn_c3_g"], P["bn_c3_b"], 2, 1)
    Bn, H3, W3, C3 = x.shape
    flat = jnp.transpose(x, (0, 3, 1, 2)).reshape(1, -1)        # whole-batch NCHW flat
    h = jnp.maximum(flat @ P["fc1_w"] + P["fc1_b"], 0.0)
    h = jnp.maximum(h @ P["fc2_w"] + P["fc2_b"], 0.0)
    z = jax.nn.sigmoid(h)
    h = jnp.maximum(z @ P["dfc2_w"] + P["dfc2_b"], 0.0)
    dec = jnp.maximum(h @ P["dfc1_w"] + P["dfc1_b"], 0.0)
    x = jnp.transpose(dec.reshape(Bn, C3, H3, W3), (0, 2, 3, 1))
    x = tconv_bn_relu(x, P["t3_w"], P["t3_b"], P["bn_c2_g"], P["bn_c2_b"], 2, 1, 1)
    x = tconv_bn_relu(x, P["t2_w"], P["t2_b"], P["bn_c1_g"], P["bn_c1_b"], 2, 2, 1)
    x = tconv_bn_relu(x, P["t1_w"], P["t1_b"], P["bn_in_g"], P["bn_in_b"], 2, 1, 1)
    return jnp.transpose(x, (0, 3, 1, 2)), z.reshape(-1)


if __name__ == "__main__":
    key = jax.random.PRNGKey(0)
    pkey, xkey = jax.random.split(key)

    BATCH, CH, HW, FFC, BOT = 2, 4, 16, 8, 16
    params = init_params(pkey, num_channels=CH, ffc=FFC, bottleneck=BOT,
                         batch=BATCH, hw=HW)
    prepared, meta = prepare_fused(params, batch=BATCH, num_channels=CH,
                                   hw=HW, ffc=FFC, bottleneck=BOT)
    forward = make_forward(prepared, meta)

    x = jax.random.normal(xkey, (BATCH, CH, HW, HW), dtype=jnp.float32)

    out, z_vec = forward(x)
    out = jax.block_until_ready(out)
    z_vec = jax.block_until_ready(z_vec)

    assert out.shape == (BATCH, CH, HW, HW), out.shape
    assert z_vec.shape == (BOT,), z_vec.shape
    assert out.dtype == jnp.float32 and z_vec.dtype == jnp.float32
    assert bool(jnp.all(jnp.isfinite(out)))
    assert bool(jnp.all(jnp.isfinite(z_vec)))
    assert bool(jnp.all(out >= 0.0))                        # final layer is ReLU'd
    assert bool(jnp.all((z_vec >= 0.0) & (z_vec <= 1.0)))   # sigmoid output

    # Validate the fused kernel against a pure-JAX reference of the module.
    ref_out, ref_z = jax.jit(reference_forward)(params, x)
    max_d_out = float(jnp.max(jnp.abs(out - ref_out)))
    max_d_z = float(jnp.max(jnp.abs(z_vec - ref_z)))
    assert max_d_out < 2e-2, max_d_out
    assert max_d_z < 2e-2, max_d_z

    print("KERNEL_OK")
</pallas_src>

<mosaic_0001>
module attributes {stable_mosaic.version = 11 : i64} {
  func.func @kernel(%arg0: memref<32x64xf32, #tpu.memory_space<vmem>>, %arg1: memref<3x16x32xf32, #tpu.memory_space<vmem>>, %arg2: memref<3x64x64xf32, #tpu.memory_space<vmem>>, %arg3: memref<3x1x64xf32, #tpu.memory_space<vmem>>, %arg4: memref<64x64xf32, #tpu.memory_space<vmem>>, %arg5: memref<5x8x16xf32, #tpu.memory_space<vmem>>, %arg6: memref<5x64x64xf32, #tpu.memory_space<vmem>>, %arg7: memref<3x1x64xf32, #tpu.memory_space<vmem>>, %arg8: memref<64x64xf32, #tpu.memory_space<vmem>>, %arg9: memref<3x4x8xf32, #tpu.memory_space<vmem>>, %arg10: memref<3x64x64xf32, #tpu.memory_space<vmem>>, %arg11: memref<3x1x64xf32, #tpu.memory_space<vmem>>, %arg12: memref<64x64xf32, #tpu.memory_space<vmem>>, %arg13: memref<3x8x4xf32, #tpu.memory_space<vmem>>, %arg14: memref<3x64x64xf32, #tpu.memory_space<vmem>>, %arg15: memref<3x1x64xf32, #tpu.memory_space<vmem>>, %arg16: memref<64x64xf32, #tpu.memory_space<vmem>>, %arg17: memref<5x16x8xf32, #tpu.memory_space<vmem>>, %arg18: memref<5x64x64xf32, #tpu.memory_space<vmem>>, %arg19: memref<3x1x64xf32, #tpu.memory_space<vmem>>, %arg20: memref<64x64xf32, #tpu.memory_space<vmem>>, %arg21: memref<3x32x16xf32, #tpu.memory_space<vmem>>, %arg22: memref<3x64x64xf32, #tpu.memory_space<vmem>>, %arg23: memref<3x1x64xf32, #tpu.memory_space<vmem>>, %arg24: memref<64x64xf32, #tpu.memory_space<vmem>>, %arg25: memref<4x64x32xf32, #tpu.memory_space<vmem>>, %arg26: memref<1x32xf32, #tpu.memory_space<vmem>>, %arg27: memref<32x16xf32, #tpu.memory_space<vmem>>, %arg28: memref<1x16xf32, #tpu.memory_space<vmem>>, %arg29: memref<16x32xf32, #tpu.memory_space<vmem>>, %arg30: memref<1x32xf32, #tpu.memory_space<vmem>>, %arg31: memref<4x32x64xf32, #tpu.memory_space<vmem>>, %arg32: memref<4x1x64xf32, #tpu.memory_space<vmem>>, %arg33: memref<4x4x1xf32, #tpu.memory_space<vmem>>, %arg34: memref<32x64xf32, #tpu.memory_space<vmem>>, %arg35: memref<1x16xf32, #tpu.memory_space<vmem>>) attributes {dimension_semantics = [], scalar_prefetch = 0 : i64, scratch_operands = 0 : i64, tpu.core_type = #tpu.core_type<tc>} {
    %c0 = arith.constant 0 : index
    %c0_0 = arith.constant 0 : index
    %0 = vector.load %arg0[%c0, %c0_0] : memref<32x64xf32, #tpu.memory_space<vmem>>, vector<32x64xf32>
    %c0_1 = arith.constant 0 : index
    %c0_2 = arith.constant 0 : index
    %c0_3 = arith.constant 0 : index
    %1 = vector.load %arg1[%c0_1, %c0_2, %c0_3] : memref<3x16x32xf32, #tpu.memory_space<vmem>>, vector<1x16x32xf32>
    %2 = vector.shape_cast %1 : vector<1x16x32xf32> to vector<16x32xf32>
    %cst = arith.constant dense<0.000000e+00> : vector<16x64xf32>
    %3 = tpu.matmul %2, %0, %cst {dimension_numbers = #tpu.dot_dimension_numbers<[1], [0], [0], [1], [0, 0, 1, 1], [], []>} : vector<16x32xf32>, vector<32x64xf32>, vector<16x64xf32> -> vector<16x64xf32>
    %c0_4 = arith.constant 0 : index
    %c0_5 = arith.constant 0 : index
    %c0_6 = arith.constant 0 : index
    %4 = vector.load %arg2[%c0_4, %c0_5, %c0_6] : memref<3x64x64xf32, #tpu.memory_space<vmem>>, vector<1x64x64xf32>
    %5 = vector.shape_cast %4 : vector<1x64x64xf32> to vector<64x64xf32>
    %cst_7 = arith.constant dense<0.000000e+00> : vector<16x64xf32>
    %6 = tpu.matmul %3, %5, %cst_7 {dimension_numbers = #tpu.dot_dimension_numbers<[1], [0], [0], [1], [0, 0, 1, 1], [], []>} : vector<16x64xf32>, vector<64x64xf32>, vector<16x64xf32> -> vector<16x64xf32>
    %c1 = arith.constant 1 : index
    %c0_8 = arith.constant 0 : index
    %c0_9 = arith.constant 0 : index
    %7 = vector.load %arg1[%c1, %c0_8, %c0_9] : memref<3x16x32xf32, #tpu.memory_space<vmem>>, vector<1x16x32xf32>
    %8 = vector.shape_cast %7 : vector<1x16x32xf32> to vector<16x32xf32>
    %cst_10 = arith.constant dense<0.000000e+00> : vector<16x64xf32>
    %9 = tpu.matmul %8, %0, %cst_10 {dimension_numbers = #tpu.dot_dimension_numbers<[1], [0], [0], [1], [0, 0, 1, 1], [], []>} : vector<16x32xf32>, vector<32x64xf32>, vector<16x64xf32> -> vector<16x64xf32>
    %c1_11 = arith.constant 1 : index
    %c0_12 = arith.constant 0 : index
    %c0_13 = arith.constant 0 : index
    %10 = vector.load %arg2[%c1_11, %c0_12, %c0_13] : memref<3x64x64xf32, #tpu.memory_space<vmem>>, vector<1x64x64xf32>
    %11 = vector.shape_cast %10 : vector<1x64x64xf32> to vector<64x64xf32>
    %cst_14 = arith.constant dense<0.000000e+00> : vector<16x64xf32>
    %12 = tpu.matmul %9, %11, %cst_14 {dimension_numbers = #tpu.dot_dimension_numbers<[1], [0], [0], [1], [0, 0, 1, 1], [], []>} : vector<16x64xf32>, vector<64x64xf32>, vector<16x64xf32> -> vector<16x64xf32>
    %13 = arith.addf %6, %12 : vector<16x64xf32>
    %c2 = arith.constant 2 : index
    %c0_15 = arith.constant 0 : index
    %c0_16 = arith.constant 0 : index
    %14 = vector.load %arg1[%c2, %c0_15, %c0_16] : memref<3x16x32xf32, #tpu.memory_space<vmem>>, vector<1x16x32xf32>
    %15 = vector.shape_cast %14 : vector<1x16x32xf32> to vector<16x32xf32>
    %cst_17 = arith.constant dense<0.000000e+00> : vector<16x64xf32>
    %16 = tpu.matmul %15, %0, %cst_17 {dimension_numbers = #tpu.dot_dimension_numbers<[1], [0], [0], [1], [0, 0, 1, 1], [], []>} : vector<16x32xf32>, vector<32x64xf32>, vector<16x64xf32> -> vector<16x64xf32>
    %c2_18 = arith.constant 2 : index
    %c0_19 = arith.constant 0 : index
    %c0_20 = arith.constant 0 : index
    %17 = vector.load %arg2[%c2_18, %c0_19, %c0_20] : memref<3x64x64xf32, #tpu.memory_space<vmem>>, vector<1x64x64xf32>
    %18 = vector.shape_cast %17 : vector<1x64x64xf32> to vector<64x64xf32>
    %cst_21 = arith.constant dense<0.000000e+00> : vector<16x64xf32>
    %19 = tpu.matmul %16, %18, %cst_21 {dimension_numbers = #tpu.dot_dimension_numbers<[1], [0], [0], [1], [0, 0, 1, 1], [], []>} : vector<16x64xf32>, vector<64x64xf32>, vector<16x64xf32> -> vector<16x64xf32>
    %20 = arith.addf %13, %19 : vector<16x64xf32>
    %c0_22 = arith.constant 0 : index
    %c0_23 = arith.constant 0 : index
    %c0_24 = arith.constant 0 : index
    %21 = vector.load %arg3[%c0_22, %c0_23, %c0_24] : memref<3x1x64xf32, #tpu.memory_space<vmem>>, vector<1x1x64xf32>
    %22 = vector.shape_cast %21 : vector<1x1x64xf32> to vector<1x64xf32>
    %23 = vector.broadcast %22 : vector<1x64xf32> to vector<16x64xf32>
    %24 = arith.addf %20, %23 : vector<16x64xf32>
    %c0_25 = arith.constant 0 : index
    %c0_26 = arith.constant 0 : index
    %25 = vector.load %arg4[%c0_25, %c0_26] : memref<64x64xf32, #tpu.memory_space<vmem>>, vector<64x64xf32>
    %cst_27 = arith.constant dense<0.000000e+00> : vector<64xf32>
    %26 = vector.multi_reduction <add>, %24, %cst_27 [0] : vector<16x64xf32> to vector<64xf32>
    %27 = vector.shape_cast %26 : vector<64xf32> to vector<1x64xf32>
    %cst_28 = arith.constant 1.600000e+01 : f32
    %28 = vector.broadcast %cst_28 : f32 to vector<1x64xf32>
    %29 = arith.divf %27, %28 : vector<1x64xf32>
    %cst_29 = arith.constant dense<0.000000e+00> : vector<1x64xf32>
    %30 = tpu.matmul %29, %25, %cst_29 {dimension_numbers = #tpu.dot_dimension_numbers<[1], [0], [0], [1], [0, 0, 1, 1], [], []>} : vector<1x64xf32>, vector<64x64xf32>, vector<1x64xf32> -> vector<1x64xf32>
    %31 = vector.broadcast %30 : vector<1x64xf32> to vector<16x64xf32>
    %32 = arith.subf %24, %31 : vector<16x64xf32>
    %33 = arith.mulf %32, %32 : vector<16x64xf32>
    %cst_30 = arith.constant dense<0.000000e+00> : vector<64xf32>
    %34 = vector.multi_reduction <add>, %33, %cst_30 [0] : vector<16x64xf32> to vector<64xf32>
    %35 = vector.shape_cast %34 : vector<64xf32> to vector<1x64xf32>
    %cst_31 = arith.constant 1.600000e+01 : f32
    %36 = vector.broadcast %cst_31 : f32 to vector<1x64xf32>
    %37 = arith.divf %35, %36 : vector<1x64xf32>
    %cst_32 = arith.constant dense<0.000000e+00> : vector<1x64xf32>
    %38 = tpu.matmul %37, %25, %cst_32 {dimension_numbers = #tpu.dot_dimension_numbers<[1], [0], [0], [1], [0, 0, 1, 1], [], []>} : vector<1x64xf32>, vector<64x64xf32>, vector<1x64xf32> -> vector<1x64xf32>
    %cst_33 = arith.constant 9.99999974E-6 : f32
    %39 = vector.broadcast %cst_33 : f32 to vector<1x64xf32>
    %40 = arith.addf %38, %39 : vector<1x64xf32>
    %41 = math.rsqrt %40 : vector<1x64xf32>
    %c1_34 = arith.constant 1 : index
    %c0_35 = arith.constant 0 : index
    %c0_36 = arith.constant 0 : index
    %42 = vector.load %arg3[%c1_34, %c0_35, %c0_36] : memref<3x1x64xf32, #tpu.memory_space<vmem>>, vector<1x1x64xf32>
    %43 = vector.shape_cast %42 : vector<1x1x64xf32> to vector<1x64xf32>
    %44 = arith.mulf %41, %43 : vector<1x64xf32>
    %45 = vector.broadcast %44 : vector<1x64xf32> to vector<16x64xf32>
    %46 = arith.mulf %32, %45 : vector<16x64xf32>
    %c2_37 = arith.constant 2 : index
    %c0_38 = arith.constant 0 : index
    %c0_39 = arith.constant 0 : index
    %47 = vector.load %arg3[%c2_37, %c0_38, %c0_39] : memref<3x1x64xf32, #tpu.memory_space<vmem>>, vector<1x1x64xf32>
    %48 = vector.shape_cast %47 : vector<1x1x64xf32> to vector<1x64xf32>
    %49 = vector.broadcast %48 : vector<1x64xf32> to vector<16x64xf32>
    %50 = arith.addf %46, %49 : vector<16x64xf32>
    %cst_40 = arith.constant 0.000000e+00 : f32
    %51 = vector.broadcast %cst_40 : f32 to vector<16x64xf32>
    %52 = arith.maximumf %50, %51 : vector<16x64xf32>
    %c0_41 = arith.constant 0 : index
    %c0_42 = arith.constant 0 : index
    %c0_43 = arith.constant 0 : index
    %53 = vector.load %arg5[%c0_41, %c0_42, %c0_43] : memref<5x8x16xf32, #tpu.memory_space<vmem>>, vector<1x8x16xf32>
    %54 = vector.shape_cast %53 : vector<1x8x16xf32> to vector<8x16xf32>
    %cst_44 = arith.constant dense<0.000000e+00> : vector<8x64xf32>
    %55 = tpu.matmul %54, %52, %cst_44 {dimension_numbers = #tpu.dot_dimension_numbers<[1], [0], [0], [1], [0, 0, 1, 1], [], []>} : vector<8x16xf32>, vector<16x64xf32>, vector<8x64xf32> -> vector<8x64xf32>
    %c0_45 = arith.constant 0 : index
    %c0_46 = arith.constant 0 : index
    %c0_47 = arith.constant 0 : index
    %56 = vector.load %arg6[%c0_45, %c0_46, %c0_47] : memref<5x64x64xf32, #tpu.memory_space<vmem>>, vector<1x64x64xf32>
    %57 = vector.shape_cast %56 : vector<1x64x64xf32> to vector<64x64xf32>
    %cst_48 = arith.constant dense<0.000000e+00> : vector<8x64xf32>
    %58 = tpu.matmul %55, %57, %cst_48 {dimension_numbers = #tpu.dot_dimension_numbers<[1], [0], [0], [1], [0, 0, 1, 1], [], []>} : vector<8x64xf32>, vector<64x64xf32>, vector<8x64xf32> -> vector<8x64xf32>
    %c1_49 = arith.constant 1 : index
    %c0_50 = arith.constant 0 : index
    %c0_51 = arith.constant 0 : index
    %59 = vector.load %arg5[%c1_49, %c0_50, %c0_51] : memref<5x8x16xf32, #tpu.memory_space<vmem>>, vector<1x8x16xf32>
    %60 = vector.shape_cast %59 : vector<1x8x16xf32> to vector<8x16xf32>
    %cst_52 = arith.constant dense<0.000000e+00> : vector<8x64xf32>
    %61 = tpu.matmul %60, %52, %cst_52 {dimension_numbers = #tpu.dot_dimension_numbers<[1], [0], [0], [1], [0, 0, 1, 1], [], []>} : vector<8x16xf32>, vector<16x64xf32>, vector<8x64xf32> -> vector<8x64xf32>
    %c1_53 = arith.constant 1 : index
    %c0_54 = arith.constant 0 : index
    %c0_55 = arith.constant 0 : index
    %62 = vector.load %arg6[%c1_53, %c0_54, %c0_55] : memref<5x64x64xf32, #tpu.memory_space<vmem>>, vector<1x64x64xf32>
    %63 = vector.shape_cast %62 : vector<1x64x64xf32> to vector<64x64xf32>
    %cst_56 = arith.constant dense<0.000000e+00> : vector<8x64xf32>
    %64 = tpu.matmul %61, %63, %cst_56 {dimension_numbers = #tpu.dot_dimension_numbers<[1], [0], [0], [1], [0, 0, 1, 1], [], []>} : vector<8x64xf32>, vector<64x64xf32>, vector<8x64xf32> -> vector<8x64xf32>
    %65 = arith.addf %58, %64 : vector<8x64xf32>
    %c2_57 = arith.constant 2 : index
    %c0_58 = arith.constant 0 : index
    %c0_59 = arith.constant 0 : index
    %66 = vector.load %arg5[%c2_57, %c0_58, %c0_59] : memref<5x8x16xf32, #tpu.memory_space<vmem>>, vector<1x8x16xf32>
    %67 = vector.shape_cast %66 : vector<1x8x16xf32> to vector<8x16xf32>
    %cst_60 = arith.constant dense<0.000000e+00> : vector<8x64xf32>
    %68 = tpu.matmul %67, %52, %cst_60 {dimension_numbers = #tpu.dot_dimension_numbers<[1], [0], [0], [1], [0, 0, 1, 1], [], []>} : vector<8x16xf32>, vector<16x64xf32>, vector<8x64xf32> -> vector<8x64xf32>
    %c2_61 = arith.constant 2 : index
    %c0_62 = arith.constant 0 : index
    %c0_63 = arith.constant 0 : index
    %69 = vector.load %arg6[%c2_61, %c0_62, %c0_63] : memref<5x64x64xf32, #tpu.memory_space<vmem>>, vector<1x64x64xf32>
    %70 = vector.shape_cast %69 : vector<1x64x64xf32> to vector<64x64xf32>
    %cst_64 = arith.constant dense<0.000000e+00> : vector<8x64xf32>
    %71 = tpu.matmul %68, %70, %cst_64 {dimension_numbers = #tpu.dot_dimension_numbers<[1], [0], [0], [1], [0, 0, 1, 1], [], []>} : vector<8x64xf32>, vector<64x64xf32>, vector<8x64xf32> -> vector<8x64xf32>
    %72 = arith.addf %65, %71 : vector<8x64xf32>
    %c3 = arith.constant 3 : index
    %c0_65 = arith.constant 0 : index
    %c0_66 = arith.constant 0 : index
    %73 = vector.load %arg5[%c3, %c0_65, %c0_66] : memref<5x8x16xf32, #tpu.memory_space<vmem>>, vector<1x8x16xf32>
    %74 = vector.shape_cast %73 : vector<1x8x16xf32> to vector<8x16xf32>
    %cst_67 = arith.constant dense<0.000000e+00> : vector<8x64xf32>
    %75 = tpu.matmul %74, %52, %cst_67 {dimension_numbers = #tpu.dot_dimension_numbers<[1], [0], [0], [1], [0, 0, 1, 1], [], []>} : vector<8x16xf32>, vector<16x64xf32>, vector<8x64xf32> -> vector<8x64xf32>
    %c3_68 = arith.constant 3 : index
    %c0_69 = arith.constant 0 : index
    %c0_70 = arith.constant 0 : index
    %76 = vector.load %arg6[%c3_68, %c0_69, %c0_70] : memref<5x64x64xf32, #tpu.memory_space<vmem>>, vector<1x64x64xf32>
    %77 = vector.shape_cast %76 : vector<1x64x64xf32> to vector<64x64xf32>
    %cst_71 = arith.constant dense<0.000000e+00> : vector<8x64xf32>
    %78 = tpu.matmul %75, %77, %cst_71 {dimension_numbers = #tpu.dot_dimension_numbers<[1], [0], [0], [1], [0, 0, 1, 1], [], []>} : vector<8x64xf32>, vector<64x64xf32>, vector<8x64xf32> -> vector<8x64xf32>
    %79 = arith.addf %72, %78 : vector<8x64xf32>
    %c4 = arith.constant 4 : index
    %c0_72 = arith.constant 0 : index
    %c0_73 = arith.constant 0 : index
    %80 = vector.load %arg5[%c4, %c0_72, %c0_73] : memref<5x8x16xf32, #tpu.memory_space<vmem>>, vector<1x8x16xf32>
    %81 = vector.shape_cast %80 : vector<1x8x16xf32> to vector<8x16xf32>
    %cst_74 = arith.constant dense<0.000000e+00> : vector<8x64xf32>
    %82 = tpu.matmul %81, %52, %cst_74 {dimension_numbers = #tpu.dot_dimension_numbers<[1], [0], [0], [1], [0, 0, 1, 1], [], []>} : vector<8x16xf32>, vector<16x64xf32>, vector<8x64xf32> -> vector<8x64xf32>
    %c4_75 = arith.constant 4 : index
    %c0_76 = arith.constant 0 : index
    %c0_77 = arith.constant 0 : index
    %83 = vector.load %arg6[%c4_75, %c0_76, %c0_77] : memref<5x64x64xf32, #tpu.memory_space<vmem>>, vector<1x64x64xf32>
    %84 = vector.shape_cast %83 : vector<1x64x64xf32> to vector<64x64xf32>
    %cst_78 = arith.constant dense<0.000000e+00> : vector<8x64xf32>
    %85 = tpu.matmul %82, %84, %cst_78 {dimension_numbers = #tpu.dot_dimension_numbers<[1], [0], [0], [1], [0, 0, 1, 1], [], []>} : vector<8x64xf32>, vector<64x64xf32>, vector<8x64xf32> -> vector<8x64xf32>
    %86 = arith.addf %79, %85 : vector<8x64xf32>
    %c0_79 = arith.constant 0 : index
    %c0_80 = arith.constant 0 : index
    %c0_81 = arith.constant 0 : index
    %87 = vector.load %arg7[%c0_79, %c0_80, %c0_81] : memref<3x1x64xf32, #tpu.memory_space<vmem>>, vector<1x1x64xf32>
    %88 = vector.shape_cast %87 : vector<1x1x64xf32> to vector<1x64xf32>
    %89 = vector.broadcast %88 : vector<1x64xf32> to vector<8x64xf32>
    %90 = arith.addf %86, %89 : vector<8x64xf32>
    %c0_82 = arith.constant 0 : index
    %c0_83 = arith.constant 0 : index
    %91 = vector.load %arg8[%c0_82, %c0_83] : memref<64x64xf32, #tpu.memory_space<vmem>>, vector<64x64xf32>
    %cst_84 = arith.constant dense<0.000000e+00> : vector<64xf32>
    %92 = vector.multi_reduction <add>, %90, %cst_84 [0] : vector<8x64xf32> to vector<64xf32>
    %93 = vector.shape_cast %92 : vector<64xf32> to vector<1x64xf32>
    %cst_85 = arith.constant 8.000000e+00 : f32
    %94 = vector.broadcast %cst_85 : f32 to vector<1x64xf32>
    %95 = arith.divf %93, %94 : vector<1x64xf32>
    %cst_86 = arith.constant dense<0.000000e+00> : vector<1x64xf32>
    %96 = tpu.matmul %95, %91, %cst_86 {dimension_numbers = #tpu.dot_dimension_numbers<[1], [0], [0], [1], [0, 0, 1, 1], [], []>} : vector<1x64xf32>, vector<64x64xf32>, vector<1x64xf32> -> vector<1x64xf32>
    %97 = vector.broadcast %96 : vector<1x64xf32> to vector<8x64xf32>
    %98 = arith.subf %90, %97 : vector<8x64xf32>
    %99 = arith.mulf %98, %98 : vector<8x64xf32>
    %cst_87 = arith.constant dense<0.000000e+00> : vector<64xf32>
    %100 = vector.multi_reduction <add>, %99, %cst_87 [0] : vector<8x64xf32> to vector<64xf32>
    %101 = vector.shape_cast %100 : vector<64xf32> to vector<1x64xf32>
    %cst_88 = arith.constant 8.000000e+00 : f32
    %102 = vector.broadcast %cst_88 : f32 to vector<1x64xf32>
    %103 = arith.divf %101, %102 : vector<1x64xf32>
    %cst_89 = arith.constant dense<0.000000e+00> : vector<1x64xf32>
    %104 = tpu.matmul %103, %91, %cst_89 {dimension_numbers = #tpu.dot_dimension_numbers<[1], [0], [0], [1], [0, 0, 1, 1], [], []>} : vector<1x64xf32>, vector<64x64xf32>, vector<1x64xf32> -> vector<1x64xf32>
    %cst_90 = arith.constant 9.99999974E-6 : f32
    %105 = vector.broadcast %cst_90 : f32 to vector<1x64xf32>
    %106 = arith.addf %104, %105 : vector<1x64xf32>
    %107 = math.rsqrt %106 : vector<1x64xf32>
    %c1_91 = arith.constant 1 : index
    %c0_92 = arith.constant 0 : index
    %c0_93 = arith.constant 0 : index
    %108 = vector.load %arg7[%c1_91, %c0_92, %c0_93] : memref<3x1x64xf32, #tpu.memory_space<vmem>>, vector<1x1x64xf32>
    %109 = vector.shape_cast %108 : vector<1x1x64xf32> to vector<1x64xf32>
    %110 = arith.mulf %107, %109 : vector<1x64xf32>
    %111 = vector.broadcast %110 : vector<1x64xf32> to vector<8x64xf32>
    %112 = arith.mulf %98, %111 : vector<8x64xf32>
    %c2_94 = arith.constant 2 : index
    %c0_95 = arith.constant 0 : index
    %c0_96 = arith.constant 0 : index
    %113 = vector.load %arg7[%c2_94, %c0_95, %c0_96] : memref<3x1x64xf32, #tpu.memory_space<vmem>>, vector<1x1x64xf32>
    %114 = vector.shape_cast %113 : vector<1x1x64xf32> to vector<1x64xf32>
    %115 = vector.broadcast %114 : vector<1x64xf32> to vector<8x64xf32>
    %116 = arith.addf %112, %115 : vector<8x64xf32>
    %cst_97 = arith.constant 0.000000e+00 : f32
    %117 = vector.broadcast %cst_97 : f32 to vector<8x64xf32>
    %118 = arith.maximumf %116, %117 : vector<8x64xf32>
    %c0_98 = arith.constant 0 : index
    %c0_99 = arith.constant 0 : index
    %c0_100 = arith.constant 0 : index
    %119 = vector.load %arg9[%c0_98, %c0_99, %c0_100] : memref<3x4x8xf32, #tpu.memory_space<vmem>>, vector<1x4x8xf32>
    %120 = vector.shape_cast %119 : vector<1x4x8xf32> to vector<4x8xf32>
    %cst_101 = arith.constant dense<0.000000e+00> : vector<4x64xf32>
    %121 = tpu.matmul %120, %118, %cst_101 {dimension_numbers = #tpu.dot_dimension_numbers<[1], [0], [0], [1], [0, 0, 1, 1], [], []>} : vector<4x8xf32>, vector<8x64xf32>, vector<4x64xf32> -> vector<4x64xf32>
    %c0_102 = arith.constant 0 : index
    %c0_103 = arith.constant 0 : index
    %c0_104 = arith.constant 0 : index
    %122 = vector.load %arg10[%c0_102, %c0_103, %c0_104] : memref<3x64x64xf32, #tpu.memory_space<vmem>>, vector<1x64x64xf32>
    %123 = vector.shape_cast %122 : vector<1x64x64xf32> to vector<64x64xf32>
    %cst_105 = arith.constant dense<0.000000e+00> : vector<4x64xf32>
    %124 = tpu.matmul %121, %123, %cst_105 {dimension_numbers = #tpu.dot_dimension_numbers<[1], [0], [0], [1], [0, 0, 1, 1], [], []>} : vector<4x64xf32>, vector<64x64xf32>, vector<4x64xf32> -> vector<4x64xf32>
    %c1_106 = arith.constant 1 : index
    %c0_107 = arith.constant 0 : index
    %c0_108 = arith.constant 0 : index
    %125 = vector.load %arg9[%c1_106, %c0_107, %c0_108] : memref<3x4x8xf32, #tpu.memory_space<vmem>>, vector<1x4x8xf32>
    %126 = vector.shape_cast %125 : vector<1x4x8xf32> to vector<4x8xf32>
    %cst_109 = arith.constant dense<0.000000e+00> : vector<4x64xf32>
    %127 = tpu.matmul %126, %118, %cst_109 {dimension_numbers = #tpu.dot_dimension_numbers<[1], [0], [0], [1], [0, 0, 1, 1], [], []>} : vector<4x8xf32>, vector<8x64xf32>, vector<4x64xf32> -> vector<4x64xf32>
    %c1_110 = arith.constant 1 : index
    %c0_111 = arith.constant 0 : index
    %c0_112 = arith.constant 0 : index
    %128 = vector.load %arg10[%c1_110, %c0_111, %c0_112] : memref<3x64x64xf32, #tpu.memory_space<vmem>>, vector<1x64x64xf32>
    %129 = vector.shape_cast %128 : vector<1x64x64xf32> to vector<64x64xf32>
    %cst_113 = arith.constant dense<0.000000e+00> : vector<4x64xf32>
    %130 = tpu.matmul %127, %129, %cst_113 {dimension_numbers = #tpu.dot_dimension_numbers<[1], [0], [0], [1], [0, 0, 1, 1], [], []>} : vector<4x64xf32>, vector<64x64xf32>, vector<4x64xf32> -> vector<4x64xf32>
    %131 = arith.addf %124, %130 : vector<4x64xf32>
    %c2_114 = arith.constant 2 : index
    %c0_115 = arith.constant 0 : index
    %c0_116 = arith.constant 0 : index
    %132 = vector.load %arg9[%c2_114, %c0_115, %c0_116] : memref<3x4x8xf32, #tpu.memory_space<vmem>>, vector<1x4x8xf32>
    %133 = vector.shape_cast %132 : vector<1x4x8xf32> to vector<4x8xf32>
    %cst_117 = arith.constant dense<0.000000e+00> : vector<4x64xf32>
    %134 = tpu.matmul %133, %118, %cst_117 {dimension_numbers = #tpu.dot_dimension_numbers<[1], [0], [0], [1], [0, 0, 1, 1], [], []>} : vector<4x8xf32>, vector<8x64xf32>, vector<4x64xf32> -> vector<4x64xf32>
    %c2_118 = arith.constant 2 : index
    %c0_119 = arith.constant 0 : index
    %c0_120 = arith.constant 0 : index
    %135 = vector.load %arg10[%c2_118, %c0_119, %c0_120] : memref<3x64x64xf32, #tpu.memory_space<vmem>>, vector<1x64x64xf32>
    %136 = vector.shape_cast %135 : vector<1x64x64xf32> to vector<64x64xf32>
    %cst_121 = arith.constant dense<0.000000e+00> : vector<4x64xf32>
    %137 = tpu.matmul %134, %136, %cst_121 {dimension_numbers = #tpu.dot_dimension_numbers<[1], [0], [0], [1], [0, 0, 1, 1], [], []>} : vector<4x64xf32>, vector<64x64xf32>, vector<4x64xf32> -> vector<4x64xf32>
    %138 = arith.addf %131, %137 : vector<4x64xf32>
    %c0_122 = arith.constant 0 : index
    %c0_123 = arith.constant 0 : index
    %c0_124 = arith.constant 0 : index
    %139 = vector.load %arg11[%c0_122, %c0_123, %c0_124] : memref<3x1x64xf32, #tpu.memory_space<vmem>>, vector<1x1x64xf32>
    %140 = vector.shape_cast %139 : vector<1x1x64xf32> to vector<1x64xf32>
    %141 = vector.broadcast %140 : vector<1x64xf32> to vector<4x64xf32>
    %142 = arith.addf %138, %141 : vector<4x64xf32>
    %c0_125 = arith.constant 0 : index
    %c0_126 = arith.constant 0 : index
    %143 = vector.load %arg12[%c0_125, %c0_126] : memref<64x64xf32, #tpu.memory_space<vmem>>, vector<64x64xf32>
    %cst_127 = arith.constant dense<0.000000e+00> : vector<64xf32>
    %144 = vector.multi_reduction <add>, %142, %cst_127 [0] : vector<4x64xf32> to vector<64xf32>
    %145 = vector.shape_cast %144 : vector<64xf32> to vector<1x64xf32>
    %cst_128 = arith.constant 4.000000e+00 : f32
    %146 = vector.broadcast %cst_128 : f32 to vector<1x64xf32>
    %147 = arith.divf %145, %146 : vector<1x64xf32>
    %cst_129 = arith.constant dense<0.000000e+00> : vector<1x64xf32>
    %148 = tpu.matmul %147, %143, %cst_129 {dimension_numbers = #tpu.dot_dimension_numbers<[1], [0], [0], [1], [0, 0, 1, 1], [], []>} : vector<1x64xf32>, vector<64x64xf32>, vector<1x64xf32> -> vector<1x64xf32>
    %149 = vector.broadcast %148 : vector<1x64xf32> to vector<4x64xf32>
    %150 = arith.subf %142, %149 : vector<4x64xf32>
    %151 = arith.mulf %150, %150 : vector<4x64xf32>
    %cst_130 = arith.constant dense<0.000000e+00> : vector<64xf32>
    %152 = vector.multi_reduction <add>, %151, %cst_130 [0] : vector<4x64xf32> to vector<64xf32>
    %153 = vector.shape_cast %152 : vector<64xf32> to vector<1x64xf32>
    %cst_131 = arith.constant 4.000000e+00 : f32
    %154 = vector.broadcast %cst_131 : f32 to vector<1x64xf32>
    %155 = arith.divf %153, %154 : vector<1x64xf32>
    %cst_132 = arith.constant dense<0.000000e+00> : vector<1x64xf32>
    %156 = tpu.matmul %155, %143, %cst_132 {dimension_numbers = #tpu.dot_dimension_numbers<[1], [0], [0], [1], [0, 0, 1, 1], [], []>} : vector<1x64xf32>, vector<64x64xf32>, vector<1x64xf32> -> vector<1x64xf32>
    %cst_133 = arith.constant 9.99999974E-6 : f32
    %157 = vector.broadcast %cst_133 : f32 to vector<1x64xf32>
    %158 = arith.addf %156, %157 : vector<1x64xf32>
    %159 = math.rsqrt %158 : vector<1x64xf32>
    %c1_134 = arith.constant 1 : index
    %c0_135 = arith.constant 0 : index
    %c0_136 = arith.constant 0 : index
    %160 = vector.load %arg11[%c1_134, %c0_135, %c0_136] : memref<3x1x64xf32, #tpu.memory_space<vmem>>, vector<1x1x64xf32>
    %161 = vector.shape_cast %160 : vector<1x1x64xf32> to vector<1x64xf32>
    %162 = arith.mulf %159, %161 : vector<1x64xf32>
    %163 = vector.broadcast %162 : vector<1x64xf32> to vector<4x64xf32>
    %164 = arith.mulf %150, %163 : vector<4x64xf32>
    %c2_137 = arith.constant 2 : index
    %c0_138 = arith.constant 0 : index
    %c0_139 = arith.constant 0 : index
    %165 = vector.load %arg11[%c2_137, %c0_138, %c0_139] : memref<3x1x64xf32, #tpu.memory_space<vmem>>, vector<1x1x64xf32>
    %166 = vector.shape_cast %165 : vector<1x1x64xf32> to vector<1x64xf32>
    %167 = vector.broadcast %166 : vector<1x64xf32> to vector<4x64xf32>
    %168 = arith.addf %164, %167 : vector<4x64xf32>
    %cst_140 = arith.constant 0.000000e+00 : f32
    %169 = vector.broadcast %cst_140 : f32 to vector<4x64xf32>
    %170 = arith.maximumf %168, %169 : vector<4x64xf32>
    %c0_141 = arith.constant 0 : index
    %c0_142 = arith.constant 0 : index
    %171 = vector.load %arg26[%c0_141, %c0_142] : memref<1x32xf32, #tpu.memory_space<vmem>>, vector<1x32xf32>
    %c0_143 = arith.constant 0 : index
    %c0_144 = arith.constant 0 : index
    %c0_145 = arith.constant 0 : index
    %172 = vector.load %arg33[%c0_143, %c0_144, %c0_145] : memref<4x4x1xf32, #tpu.memory_space<vmem>>, vector<1x4x1xf32>
    %173 = vector.shape_cast %172 : vector<1x4x1xf32> to vector<4x1xf32>
    %174 = vector.broadcast %173 : vector<4x1xf32> to vector<4x64xf32>
    %175 = arith.mulf %174, %170 : vector<4x64xf32>
    %cst_146 = arith.constant dense<0.000000e+00> : vector<64xf32>
    %176 = vector.multi_reduction <add>, %175, %cst_146 [0] : vector<4x64xf32> to vector<64xf32>
    %177 = vector.shape_cast %176 : vector<64xf32> to vector<1x64xf32>
    %c0_147 = arith.constant 0 : index
    %c0_148 = arith.constant 0 : index
    %c0_149 = arith.constant 0 : index
    %178 = vector.load %arg25[%c0_147, %c0_148, %c0_149] : memref<4x64x32xf32, #tpu.memory_space<vmem>>, vector<1x64x32xf32>
    %179 = vector.shape_cast %178 : vector<1x64x32xf32> to vector<64x32xf32>
    %cst_150 = arith.constant dense<0.000000e+00> : vector<1x32xf32>
    %180 = tpu.matmul %177, %179, %cst_150 {dimension_numbers = #tpu.dot_dimension_numbers<[1], [0], [0], [1], [0, 0, 1, 1], [], []>} : vector<1x64xf32>, vector<64x32xf32>, vector<1x32xf32> -> vector<1x32xf32>
    %181 = arith.addf %171, %180 : vector<1x32xf32>
    %c1_151 = arith.constant 1 : index
    %c0_152 = arith.constant 0 : index
    %c0_153 = arith.constant 0 : index
    %182 = vector.load %arg33[%c1_151, %c0_152, %c0_153] : memref<4x4x1xf32, #tpu.memory_space<vmem>>, vector<1x4x1xf32>
    %183 = vector.shape_cast %182 : vector<1x4x1xf32> to vector<4x1xf32>
    %184 = vector.broadcast %183 : vector<4x1xf32> to vector<4x64xf32>
    %185 = arith.mulf %184, %170 : vector<4x64xf32>
    %cst_154 = arith.constant dense<0.000000e+00> : vector<64xf32>
    %186 = vector.multi_reduction <add>, %185, %cst_154 [0] : vector<4x64xf32> to vector<64xf32>
    %187 = vector.shape_cast %186 : vector<64xf32> to vector<1x64xf32>
    %c1_155 = arith.constant 1 : index
    %c0_156 = arith.constant 0 : index
    %c0_157 = arith.constant 0 : index
    %188 = vector.load %arg25[%c1_155, %c0_156, %c0_157] : memref<4x64x32xf32, #tpu.memory_space<vmem>>, vector<1x64x32xf32>
    %189 = vector.shape_cast %188 : vector<1x64x32xf32> to vector<64x32xf32>
    %cst_158 = arith.constant dense<0.000000e+00> : vector<1x32xf32>
    %190 = tpu.matmul %187, %189, %cst_158 {dimension_numbers = #tpu.dot_dimension_numbers<[1], [0], [0], [1], [0, 0, 1, 1], [], []>} : vector<1x64xf32>, vector<64x32xf32>, vector<1x32xf32> -> vector<1x32xf32>
    %191 = arith.addf %181, %190 : vector<1x32xf32>
    %c2_159 = arith.constant 2 : index
    %c0_160 = arith.constant 0 : index
    %c0_161 = arith.constant 0 : index
    %192 = vector.load %arg33[%c2_159, %c0_160, %c0_161] : memref<4x4x1xf32, #tpu.memory_space<vmem>>, vector<1x4x1xf32>
    %193 = vector.shape_cast %192 : vector<1x4x1xf32> to vector<4x1xf32>
    %194 = vector.broadcast %193 : vector<4x1xf32> to vector<4x64xf32>
    %195 = arith.mulf %194, %170 : vector<4x64xf32>
    %cst_162 = arith.constant dense<0.000000e+00> : vector<64xf32>
    %196 = vector.multi_reduction <add>, %195, %cst_162 [0] : vector<4x64xf32> to vector<64xf32>
    %197 = vector.shape_cast %196 : vector<64xf32> to vector<1x64xf32>
    %c2_163 = arith.constant 2 : index
    %c0_164 = arith.constant 0 : index
    %c0_165 = arith.constant 0 : index
    %198 = vector.load %arg25[%c2_163, %c0_164, %c0_165] : memref<4x64x32xf32, #tpu.memory_space<vmem>>, vector<1x64x32xf32>
    %199 = vector.shape_cast %198 : vector<1x64x32xf32> to vector<64x32xf32>
    %cst_166 = arith.constant dense<0.000000e+00> : vector<1x32xf32>
    %200 = tpu.matmul %197, %199, %cst_166 {dimension_numbers = #tpu.dot_dimension_numbers<[1], [0], [0], [1], [0, 0, 1, 1], [], []>} : vector<1x64xf32>, vector<64x32xf32>, vector<1x32xf32> -> vector<1x32xf32>
    %201 = arith.addf %191, %200 : vector<1x32xf32>
    %c3_167 = arith.constant 3 : index
    %c0_168 = arith.constant 0 : index
    %c0_169 = arith.constant 0 : index
    %202 = vector.load %arg33[%c3_167, %c0_168, %c0_169] : memref<4x4x1xf32, #tpu.memory_space<vmem>>, vector<1x4x1xf32>
    %203 = vector.shape_cast %202 : vector<1x4x1xf32> to vector<4x1xf32>
    %204 = vector.broadcast %203 : vector<4x1xf32> to vector<4x64xf32>
    %205 = arith.mulf %204, %170 : vector<4x64xf32>
    %cst_170 = arith.constant dense<0.000000e+00> : vector<64xf32>
    %206 = vector.multi_reduction <add>, %205, %cst_170 [0] : vector<4x64xf32> to vector<64xf32>
    %207 = vector.shape_cast %206 : vector<64xf32> to vector<1x64xf32>
    %c3_171 = arith.constant 3 : index
    %c0_172 = arith.constant 0 : index
    %c0_173 = arith.constant 0 : index
    %208 = vector.load %arg25[%c3_171, %c0_172, %c0_173] : memref<4x64x32xf32, #tpu.memory_space<vmem>>, vector<1x64x32xf32>
    %209 = vector.shape_cast %208 : vector<1x64x32xf32> to vector<64x32xf32>
    %cst_174 = arith.constant dense<0.000000e+00> : vector<1x32xf32>
    %210 = tpu.matmul %207, %209, %cst_174 {dimension_numbers = #tpu.dot_dimension_numbers<[1], [0], [0], [1], [0, 0, 1, 1], [], []>} : vector<1x64xf32>, vector<64x32xf32>, vector<1x32xf32> -> vector<1x32xf32>
    %211 = arith.addf %201, %210 : vector<1x32xf32>
    %cst_175 = arith.constant 0.000000e+00 : f32
    %212 = vector.broadcast %cst_175 : f32 to vector<1x32xf32>
    %213 = arith.maximumf %211, %212 : vector<1x32xf32>
    %c0_176 = arith.constant 0 : index
    %c0_177 = arith.constant 0 : index
    %214 = vector.load %arg27[%c0_176, %c0_177] : memref<32x16xf32, #tpu.memory_space<vmem>>, vector<32x16xf32>
    %cst_178 = arith.constant dense<0.000000e+00> : vector<1x16xf32>
    %215 = tpu.matmul %213, %214, %cst_178 {dimension_numbers = #tpu.dot_dimension_numbers<[1], [0], [0], [1], [0, 0, 1, 1], [], []>} : vector<1x32xf32>, vector<32x16xf32>, vector<1x16xf32> -> vector<1x16xf32>
    %c0_179 = arith.constant 0 : index
    %c0_180 = arith.constant 0 : index
    %216 = vector.load %arg28[%c0_179, %c0_180] : memref<1x16xf32, #tpu.memory_space<vmem>>, vector<1x16xf32>
    %217 = arith.addf %215, %216 : vector<1x16xf32>
    %cst_181 = arith.constant 0.000000e+00 : f32
    %218 = vector.broadcast %cst_181 : f32 to vector<1x16xf32>
    %219 = arith.maximumf %217, %218 : vector<1x16xf32>
    %cst_182 = arith.constant 0.000000e+00 : f32
    %220 = vector.broadcast %cst_182 : f32 to vector<1x16xf32>
    %221 = arith.subf %220, %219 : vector<1x16xf32>
    %222 = math.exp %221 : vector<1x16xf32>
    %cst_183 = arith.constant 1.000000e+00 : f32
    %223 = vector.broadcast %cst_183 : f32 to vector<1x16xf32>
    %224 = arith.addf %223, %222 : vector<1x16xf32>
    %cst_184 = arith.constant 1.000000e+00 : f32
    %225 = vector.broadcast %cst_184 : f32 to vector<1x16xf32>
    %226 = arith.divf %225, %224 : vector<1x16xf32>
    %c0_185 = arith.constant 0 : index
    %c0_186 = arith.constant 0 : index
    %227 = vector.load %arg35[%c0_185, %c0_186] : memref<1x16xf32, #tpu.memory_space<vmem>>, vector<1x16xf32>
    tpu.vector_store %arg35[%c0_185, %c0_186], %226 {strides = array<i32>} : memref<1x16xf32, #tpu.memory_space<vmem>>, vector<1x16xf32>,
    %c0_187 = arith.constant 0 : index
    %c0_188 = arith.constant 0 : index
    %228 = vector.load %arg29[%c0_187, %c0_188] : memref<16x32xf32, #tpu.memory_space<vmem>>, vector<16x32xf32>
    %cst_189 = arith.constant dense<0.000000e+00> : vector<1x32xf32>
    %229 = tpu.matmul %226, %228, %cst_189 {dimension_numbers = #tpu.dot_dimension_numbers<[1], [0], [0], [1], [0, 0, 1, 1], [], []>} : vector<1x16xf32>, vector<16x32xf32>, vector<1x32xf32> -> vector<1x32xf32>
    %c0_190 = arith.constant 0 : index
    %c0_191 = arith.constant 0 : index
    %230 = vector.load %arg30[%c0_190, %c0_191] : memref<1x32xf32, #tpu.memory_space<vmem>>, vector<1x32xf32>
    %231 = arith.addf %229, %230 : vector<1x32xf32>
    %cst_192 = arith.constant 0.000000e+00 : f32
    %232 = vector.broadcast %cst_192 : f32 to vector<1x32xf32>
    %233 = arith.maximumf %231, %232 : vector<1x32xf32>
    %cst_193 = arith.constant 0.000000e+00 : f32
    %234 = vector.broadcast %cst_193 : f32 to vector<4x64xf32>
    %c0_194 = arith.constant 0 : index
    %c0_195 = arith.constant 0 : index
    %c0_196 = arith.constant 0 : index
    %235 = vector.load %arg31[%c0_194, %c0_195, %c0_196] : memref<4x32x64xf32, #tpu.memory_space<vmem>>, vector<1x32x64xf32>
    %236 = vector.shape_cast %235 : vector<1x32x64xf32> to vector<32x64xf32>
    %cst_197 = arith.constant dense<0.000000e+00> : vector<1x64xf32>
    %237 = tpu.matmul %233, %236, %cst_197 {dimension_numbers = #tpu.dot_dimension_numbers<[1], [0], [0], [1], [0, 0, 1, 1], [], []>} : vector<1x32xf32>, vector<32x64xf32>, vector<1x64xf32> -> vector<1x64xf32>
    %c0_198 = arith.constant 0 : index
    %c0_199 = arith.constant 0 : index
    %c0_200 = arith.constant 0 : index
    %238 = vector.load %arg32[%c0_198, %c0_199, %c0_200] : memref<4x1x64xf32, #tpu.memory_space<vmem>>, vector<1x1x64xf32>
    %239 = vector.shape_cast %238 : vector<1x1x64xf32> to vector<1x64xf32>
    %240 = arith.addf %237, %239 : vector<1x64xf32>
    %cst_201 = arith.constant 0.000000e+00 : f32
    %241 = vector.broadcast %cst_201 : f32 to vector<1x64xf32>
    %242 = arith.maximumf %240, %241 : vector<1x64xf32>
    %c0_202 = arith.constant 0 : index
    %c0_203 = arith.constant 0 : index
    %c0_204 = arith.constant 0 : index
    %243 = vector.load %arg33[%c0_202, %c0_203, %c0_204] : memref<4x4x1xf32, #tpu.memory_space<vmem>>, vector<1x4x1xf32>
    %244 = vector.shape_cast %243 : vector<1x4x1xf32> to vector<4x1xf32>
    %245 = vector.broadcast %244 : vector<4x1xf32> to vector<4x64xf32>
    %246 = vector.broadcast %242 : vector<1x64xf32> to vector<4x64xf32>
    %247 = arith.mulf %245, %246 : vector<4x64xf32>
    %248 = arith.addf %234, %247 : vector<4x64xf32>
    %c1_205 = arith.constant 1 : index
    %c0_206 = arith.constant 0 : index
    %c0_207 = arith.constant 0 : index
    %249 = vector.load %arg31[%c1_205, %c0_206, %c0_207] : memref<4x32x64xf32, #tpu.memory_space<vmem>>, vector<1x32x64xf32>
    %250 = vector.shape_cast %249 : vector<1x32x64xf32> to vector<32x64xf32>
    %cst_208 = arith.constant dense<0.000000e+00> : vector<1x64xf32>
    %251 = tpu.matmul %233, %250, %cst_208 {dimension_numbers = #tpu.dot_dimension_numbers<[1], [0], [0], [1], [0, 0, 1, 1], [], []>} : vector<1x32xf32>, vector<32x64xf32>, vector<1x64xf32> -> vector<1x64xf32>
    %c1_209 = arith.constant 1 : index
    %c0_210 = arith.constant 0 : index
    %c0_211 = arith.constant 0 : index
    %252 = vector.load %arg32[%c1_209, %c0_210, %c0_211] : memref<4x1x64xf32, #tpu.memory_space<vmem>>, vector<1x1x64xf32>
    %253 = vector.shape_cast %252 : vector<1x1x64xf32> to vector<1x64xf32>
    %254 = arith.addf %251, %253 : vector<1x64xf32>
    %cst_212 = arith.constant 0.000000e+00 : f32
    %255 = vector.broadcast %cst_212 : f32 to vector<1x64xf32>
    %256 = arith.maximumf %254, %255 : vector<1x64xf32>
    %c1_213 = arith.constant 1 : index
    %c0_214 = arith.constant 0 : index
    %c0_215 = arith.constant 0 : index
    %257 = vector.load %arg33[%c1_213, %c0_214, %c0_215] : memref<4x4x1xf32, #tpu.memory_space<vmem>>, vector<1x4x1xf32>
    %258 = vector.shape_cast %257 : vector<1x4x1xf32> to vector<4x1xf32>
    %259 = vector.broadcast %258 : vector<4x1xf32> to vector<4x64xf32>
    %260 = vector.broadcast %256 : vector<1x64xf32> to vector<4x64xf32>
    %261 = arith.mulf %259, %260 : vector<4x64xf32>
    %262 = arith.addf %248, %261 : vector<4x64xf32>
    %c2_216 = arith.constant 2 : index
    %c0_217 = arith.constant 0 : index
    %c0_218 = arith.constant 0 : index
    %263 = vector.load %arg31[%c2_216, %c0_217, %c0_218] : memref<4x32x64xf32, #tpu.memory_space<vmem>>, vector<1x32x64xf32>
    %264 = vector.shape_cast %263 : vector<1x32x64xf32> to vector<32x64xf32>
    %cst_219 = arith.constant dense<0.000000e+00> : vector<1x64xf32>
    %265 = tpu.matmul %233, %264, %cst_219 {dimension_numbers = #tpu.dot_dimension_numbers<[1], [0], [0], [1], [0, 0, 1, 1], [], []>} : vector<1x32xf32>, vector<32x64xf32>, vector<1x64xf32> -> vector<1x64xf32>
    %c2_220 = arith.constant 2 : index
    %c0_221 = arith.constant 0 : index
    %c0_222 = arith.constant 0 : index
    %266 = vector.load %arg32[%c2_220, %c0_221, %c0_222] : memref<4x1x64xf32, #tpu.memory_space<vmem>>, vector<1x1x64xf32>
    %267 = vector.shape_cast %266 : vector<1x1x64xf32> to vector<1x64xf32>
    %268 = arith.addf %265, %267 : vector<1x64xf32>
    %cst_223 = arith.constant 0.000000e+00 : f32
    %269 = vector.broadcast %cst_223 : f32 to vector<1x64xf32>
    %270 = arith.maximumf %268, %269 : vector<1x64xf32>
    %c2_224 = arith.constant 2 : index
    %c0_225 = arith.constant 0 : index
    %c0_226 = arith.constant 0 : index
    %271 = vector.load %arg33[%c2_224, %c0_225, %c0_226] : memref<4x4x1xf32, #tpu.memory_space<vmem>>, vector<1x4x1xf32>
    %272 = vector.shape_cast %271 : vector<1x4x1xf32> to vector<4x1xf32>
    %273 = vector.broadcast %272 : vector<4x1xf32> to vector<4x64xf32>
    %274 = vector.broadcast %270 : vector<1x64xf32> to vector<4x64xf32>
    %275 = arith.mulf %273, %274 : vector<4x64xf32>
    %276 = arith.addf %262, %275 : vector<4x64xf32>
    %c3_227 = arith.constant 3 : index
    %c0_228 = arith.constant 0 : index
    %c0_229 = arith.constant 0 : index
    %277 = vector.load %arg31[%c3_227, %c0_228, %c0_229] : memref<4x32x64xf32, #tpu.memory_space<vmem>>, vector<1x32x64xf32>
    %278 = vector.shape_cast %277 : vector<1x32x64xf32> to vector<32x64xf32>
    %cst_230 = arith.constant dense<0.000000e+00> : vector<1x64xf32>
    %279 = tpu.matmul %233, %278, %cst_230 {dimension_numbers = #tpu.dot_dimension_numbers<[1], [0], [0], [1], [0, 0, 1, 1], [], []>} : vector<1x32xf32>, vector<32x64xf32>, vector<1x64xf32> -> vector<1x64xf32>
    %c3_231 = arith.constant 3 : index
    %c0_232 = arith.constant 0 : index
    %c0_233 = arith.constant 0 : index
    %280 = vector.load %arg32[%c3_231, %c0_232, %c0_233] : memref<4x1x64xf32, #tpu.memory_space<vmem>>, vector<1x1x64xf32>
    %281 = vector.shape_cast %280 : vector<1x1x64xf32> to vector<1x64xf32>
    %282 = arith.addf %279, %281 : vector<1x64xf32>
    %cst_234 = arith.constant 0.000000e+00 : f32
    %283 = vector.broadcast %cst_234 : f32 to vector<1x64xf32>
    %284 = arith.maximumf %282, %283 : vector<1x64xf32>
    %c3_235 = arith.constant 3 : index
    %c0_236 = arith.constant 0 : index
    %c0_237 = arith.constant 0 : index
    %285 = vector.load %arg33[%c3_235, %c0_236, %c0_237] : memref<4x4x1xf32, #tpu.memory_space<vmem>>, vector<1x4x1xf32>
    %286 = vector.shape_cast %285 : vector<1x4x1xf32> to vector<4x1xf32>
    %287 = vector.broadcast %286 : vector<4x1xf32> to vector<4x64xf32>
    %288 = vector.broadcast %284 : vector<1x64xf32> to vector<4x64xf32>
    %289 = arith.mulf %287, %288 : vector<4x64xf32>
    %290 = arith.addf %276, %289 : vector<4x64xf32>
    %c0_238 = arith.constant 0 : index
    %c0_239 = arith.constant 0 : index
    %c0_240 = arith.constant 0 : index
    %291 = vector.load %arg13[%c0_238, %c0_239, %c0_240] : memref<3x8x4xf32, #tpu.memory_space<vmem>>, vector<1x8x4xf32>
    %292 = vector.shape_cast %291 : vector<1x8x4xf32> to vector<8x4xf32>
    %cst_241 = arith.constant dense<0.000000e+00> : vector<8x64xf32>
    %293 = tpu.matmul %292, %290, %cst_241 {dimension_numbers = #tpu.dot_dimension_numbers<[1], [0], [0], [1], [0, 0, 1, 1], [], []>} : vector<8x4xf32>, vector<4x64xf32>, vector<8x64xf32> -> vector<8x64xf32>
    %c0_242 = arith.constant 0 : index
    %c0_243 = arith.constant 0 : index
    %c0_244 = arith.constant 0 : index
    %294 = vector.load %arg14[%c0_242, %c0_243, %c0_244] : memref<3x64x64xf32, #tpu.memory_space<vmem>>, vector<1x64x64xf32>
    %295 = vector.shape_cast %294 : vector<1x64x64xf32> to vector<64x64xf32>
    %cst_245 = arith.constant dense<0.000000e+00> : vector<8x64xf32>
    %296 = tpu.matmul %293, %295, %cst_245 {dimension_numbers = #tpu.dot_dimension_numbers<[1], [0], [0], [1], [0, 0, 1, 1], [], []>} : vector<8x64xf32>, vector<64x64xf32>, vector<8x64xf32> -> vector<8x64xf32>
    %c1_246 = arith.constant 1 : index
    %c0_247 = arith.constant 0 : index
    %c0_248 = arith.constant 0 : index
    %297 = vector.load %arg13[%c1_246, %c0_247, %c0_248] : memref<3x8x4xf32, #tpu.memory_space<vmem>>, vector<1x8x4xf32>
    %298 = vector.shape_cast %297 : vector<1x8x4xf32> to vector<8x4xf32>
    %cst_249 = arith.constant dense<0.000000e+00> : vector<8x64xf32>
    %299 = tpu.matmul %298, %290, %cst_249 {dimension_numbers = #tpu.dot_dimension_numbers<[1], [0], [0], [1], [0, 0, 1, 1], [], []>} : vector<8x4xf32>, vector<4x64xf32>, vector<8x64xf32> -> vector<8x64xf32>
    %c1_250 = arith.constant 1 : index
    %c0_251 = arith.constant 0 : index
    %c0_252 = arith.constant 0 : index
    %300 = vector.load %arg14[%c1_250, %c0_251, %c0_252] : memref<3x64x64xf32, #tpu.memory_space<vmem>>, vector<1x64x64xf32>
    %301 = vector.shape_cast %300 : vector<1x64x64xf32> to vector<64x64xf32>
    %cst_253 = arith.constant dense<0.000000e+00> : vector<8x64xf32>
    %302 = tpu.matmul %299, %301, %cst_253 {dimension_numbers = #tpu.dot_dimension_numbers<[1], [0], [0], [1], [0, 0, 1, 1], [], []>} : vector<8x64xf32>, vector<64x64xf32>, vector<8x64xf32> -> vector<8x64xf32>
    %303 = arith.addf %296, %302 : vector<8x64xf32>
    %c2_254 = arith.constant 2 : index
    %c0_255 = arith.constant 0 : index
    %c0_256 = arith.constant 0 : index
    %304 = vector.load %arg13[%c2_254, %c0_255, %c0_256] : memref<3x8x4xf32, #tpu.memory_space<vmem>>, vector<1x8x4xf32>
    %305 = vector.shape_cast %304 : vector<1x8x4xf32> to vector<8x4xf32>
    %cst_257 = arith.constant dense<0.000000e+00> : vector<8x64xf32>
    %306 = tpu.matmul %305, %290, %cst_257 {dimension_numbers = #tpu.dot_dimension_numbers<[1], [0], [0], [1], [0, 0, 1, 1], [], []>} : vector<8x4xf32>, vector<4x64xf32>, vector<8x64xf32> -> vector<8x64xf32>
    %c2_258 = arith.constant 2 : index
    %c0_259 = arith.constant 0 : index
    %c0_260 = arith.constant 0 : index
    %307 = vector.load %arg14[%c2_258, %c0_259, %c0_260] : memref<3x64x64xf32, #tpu.memory_space<vmem>>, vector<1x64x64xf32>
    %308 = vector.shape_cast %307 : vector<1x64x64xf32> to vector<64x64xf32>
    %cst_261 = arith.constant dense<0.000000e+00> : vector<8x64xf32>
    %309 = tpu.matmul %306, %308, %cst_261 {dimension_numbers = #tpu.dot_dimension_numbers<[1], [0], [0], [1], [0, 0, 1, 1], [], []>} : vector<8x64xf32>, vector<64x64xf32>, vector<8x64xf32> -> vector<8x64xf32>
    %310 = arith.addf %303, %309 : vector<8x64xf32>
    %c0_262 = arith.constant 0 : index
    %c0_263 = arith.constant 0 : index
    %c0_264 = arith.constant 0 : index
    %311 = vector.load %arg15[%c0_262, %c0_263, %c0_264] : memref<3x1x64xf32, #tpu.memory_space<vmem>>, vector<1x1x64xf32>
    %312 = vector.shape_cast %311 : vector<1x1x64xf32> to vector<1x64xf32>
    %313 = vector.broadcast %312 : vector<1x64xf32> to vector<8x64xf32>
    %314 = arith.addf %310, %313 : vector<8x64xf32>
    %c0_265 = arith.constant 0 : index
    %c0_266 = arith.constant 0 : index
    %315 = vector.load %arg16[%c0_265, %c0_266] : memref<64x64xf32, #tpu.memory_space<vmem>>, vector<64x64xf32>
    %cst_267 = arith.constant dense<0.000000e+00> : vector<64xf32>
    %316 = vector.multi_reduction <add>, %314, %cst_267 [0] : vector<8x64xf32> to vector<64xf32>
    %317 = vector.shape_cast %316 : vector<64xf32> to vector<1x64xf32>
    %cst_268 = arith.constant 8.000000e+00 : f32
    %318 = vector.broadcast %cst_268 : f32 to vector<1x64xf32>
    %319 = arith.divf %317, %318 : vector<1x64xf32>
    %cst_269 = arith.constant dense<0.000000e+00> : vector<1x64xf32>
    %320 = tpu.matmul %319, %315, %cst_269 {dimension_numbers = #tpu.dot_dimension_numbers<[1], [0], [0], [1], [0, 0, 1, 1], [], []>} : vector<1x64xf32>, vector<64x64xf32>, vector<1x64xf32> -> vector<1x64xf32>
    %321 = vector.broadcast %320 : vector<1x64xf32> to vector<8x64xf32>
    %322 = arith.subf %314, %321 : vector<8x64xf32>
    %323 = arith.mulf %322, %322 : vector<8x64xf32>
    %cst_270 = arith.constant dense<0.000000e+00> : vector<64xf32>
    %324 = vector.multi_reduction <add>, %323, %cst_270 [0] : vector<8x64xf32> to vector<64xf32>
    %325 = vector.shape_cast %324 : vector<64xf32> to vector<1x64xf32>
    %cst_271 = arith.constant 8.000000e+00 : f32
    %326 = vector.broadcast %cst_271 : f32 to vector<1x64xf32>
    %327 = arith.divf %325, %326 : vector<1x64xf32>
    %cst_272 = arith.constant dense<0.000000e+00> : vector<1x64xf32>
    %328 = tpu.matmul %327, %315, %cst_272 {dimension_numbers = #tpu.dot_dimension_numbers<[1], [0], [0], [1], [0, 0, 1, 1], [], []>} : vector<1x64xf32>, vector<64x64xf32>, vector<1x64xf32> -> vector<1x64xf32>
    %cst_273 = arith.constant 9.99999974E-6 : f32
    %329 = vector.broadcast %cst_273 : f32 to vector<1x64xf32>
    %330 = arith.addf %328, %329 : vector<1x64xf32>
    %331 = math.rsqrt %330 : vector<1x64xf32>
    %c1_274 = arith.constant 1 : index
    %c0_275 = arith.constant 0 : index
    %c0_276 = arith.constant 0 : index
    %332 = vector.load %arg15[%c1_274, %c0_275, %c0_276] : memref<3x1x64xf32, #tpu.memory_space<vmem>>, vector<1x1x64xf32>
    %333 = vector.shape_cast %332 : vector<1x1x64xf32> to vector<1x64xf32>
    %334 = arith.mulf %331, %333 : vector<1x64xf32>
    %335 = vector.broadcast %334 : vector<1x64xf32> to vector<8x64xf32>
    %336 = arith.mulf %322, %335 : vector<8x64xf32>
    %c2_277 = arith.constant 2 : index
    %c0_278 = arith.constant 0 : index
    %c0_279 = arith.constant 0 : index
    %337 = vector.load %arg15[%c2_277, %c0_278, %c0_279] : memref<3x1x64xf32, #tpu.memory_space<vmem>>, vector<1x1x64xf32>
    %338 = vector.shape_cast %337 : vector<1x1x64xf32> to vector<1x64xf32>
    %339 = vector.broadcast %338 : vector<1x64xf32> to vector<8x64xf32>
    %340 = arith.addf %336, %339 : vector<8x64xf32>
    %cst_280 = arith.constant 0.000000e+00 : f32
    %341 = vector.broadcast %cst_280 : f32 to vector<8x64xf32>
    %342 = arith.maximumf %340, %341 : vector<8x64xf32>
    %c0_281 = arith.constant 0 : index
    %c0_282 = arith.constant 0 : index
    %c0_283 = arith.constant 0 : index
    %343 = vector.load %arg17[%c0_281, %c0_282, %c0_283] : memref<5x16x8xf32, #tpu.memory_space<vmem>>, vector<1x16x8xf32>
    %344 = vector.shape_cast %343 : vector<1x16x8xf32> to vector<16x8xf32>
    %cst_284 = arith.constant dense<0.000000e+00> : vector<16x64xf32>
    %345 = tpu.matmul %344, %342, %cst_284 {dimension_numbers = #tpu.dot_dimension_numbers<[1], [0], [0], [1], [0, 0, 1, 1], [], []>} : vector<16x8xf32>, vector<8x64xf32>, vector<16x64xf32> -> vector<16x64xf32>
    %c0_285 = arith.constant 0 : index
    %c0_286 = arith.constant 0 : index
    %c0_287 = arith.constant 0 : index
    %346 = vector.load %arg18[%c0_285, %c0_286, %c0_287] : memref<5x64x64xf32, #tpu.memory_space<vmem>>, vector<1x64x64xf32>
    %347 = vector.shape_cast %346 : vector<1x64x64xf32> to vector<64x64xf32>
    %cst_288 = arith.constant dense<0.000000e+00> : vector<16x64xf32>
    %348 = tpu.matmul %345, %347, %cst_288 {dimension_numbers = #tpu.dot_dimension_numbers<[1], [0], [0], [1], [0, 0, 1, 1], [], []>} : vector<16x64xf32>, vector<64x64xf32>, vector<16x64xf32> -> vector<16x64xf32>
    %c1_289 = arith.constant 1 : index
    %c0_290 = arith.constant 0 : index
    %c0_291 = arith.constant 0 : index
    %349 = vector.load %arg17[%c1_289, %c0_290, %c0_291] : memref<5x16x8xf32, #tpu.memory_space<vmem>>, vector<1x16x8xf32>
    %350 = vector.shape_cast %349 : vector<1x16x8xf32> to vector<16x8xf32>
    %cst_292 = arith.constant dense<0.000000e+00> : vector<16x64xf32>
    %351 = tpu.matmul %350, %342, %cst_292 {dimension_numbers = #tpu.dot_dimension_numbers<[1], [0], [0], [1], [0, 0, 1, 1], [], []>} : vector<16x8xf32>, vector<8x64xf32>, vector<16x64xf32> -> vector<16x64xf32>
    %c1_293 = arith.constant 1 : index
    %c0_294 = arith.constant 0 : index
    %c0_295 = arith.constant 0 : index
    %352 = vector.load %arg18[%c1_293, %c0_294, %c0_295] : memref<5x64x64xf32, #tpu.memory_space<vmem>>, vector<1x64x64xf32>
    %353 = vector.shape_cast %352 : vector<1x64x64xf32> to vector<64x64xf32>
    %cst_296 = arith.constant dense<0.000000e+00> : vector<16x64xf32>
    %354 = tpu.matmul %351, %353, %cst_296 {dimension_numbers = #tpu.dot_dimension_numbers<[1], [0], [0], [1], [0, 0, 1, 1], [], []>} : vector<16x64xf32>, vector<64x64xf32>, vector<16x64xf32> -> vector<16x64xf32>
    %355 = arith.addf %348, %354 : vector<16x64xf32>
    %c2_297 = arith.constant 2 : index
    %c0_298 = arith.constant 0 : index
    %c0_299 = arith.constant 0 : index
    %356 = vector.load %arg17[%c2_297, %c0_298, %c0_299] : memref<5x16x8xf32, #tpu.memory_space<vmem>>, vector<1x16x8xf32>
    %357 = vector.shape_cast %356 : vector<1x16x8xf32> to vector<16x8xf32>
    %cst_300 = arith.constant dense<0.000000e+00> : vector<16x64xf32>
    %358 = tpu.matmul %357, %342, %cst_300 {dimension_numbers = #tpu.dot_dimension_numbers<[1], [0], [0], [1], [0, 0, 1, 1], [], []>} : vector<16x8xf32>, vector<8x64xf32>, vector<16x64xf32> -> vector<16x64xf32>
    %c2_301 = arith.constant 2 : index
    %c0_302 = arith.constant 0 : index
    %c0_303 = arith.constant 0 : index
    %359 = vector.load %arg18[%c2_301, %c0_302, %c0_303] : memref<5x64x64xf32, #tpu.memory_space<vmem>>, vector<1x64x64xf32>
    %360 = vector.shape_cast %359 : vector<1x64x64xf32> to vector<64x64xf32>
    %cst_304 = arith.constant dense<0.000000e+00> : vector<16x64xf32>
    %361 = tpu.matmul %358, %360, %cst_304 {dimension_numbers = #tpu.dot_dimension_numbers<[1], [0], [0], [1], [0, 0, 1, 1], [], []>} : vector<16x64xf32>, vector<64x64xf32>, vector<16x64xf32> -> vector<16x64xf32>
    %362 = arith.addf %355, %361 : vector<16x64xf32>
    %c3_305 = arith.constant 3 : index
    %c0_306 = arith.constant 0 : index
    %c0_307 = arith.constant 0 : index
    %363 = vector.load %arg17[%c3_305, %c0_306, %c0_307] : memref<5x16x8xf32, #tpu.memory_space<vmem>>, vector<1x16x8xf32>
    %364 = vector.shape_cast %363 : vector<1x16x8xf32> to vector<16x8xf32>
    %cst_308 = arith.constant dense<0.000000e+00> : vector<16x64xf32>
    %365 = tpu.matmul %364, %342, %cst_308 {dimension_numbers = #tpu.dot_dimension_numbers<[1], [0], [0], [1], [0, 0, 1, 1], [], []>} : vector<16x8xf32>, vector<8x64xf32>, vector<16x64xf32> -> vector<16x64xf32>
    %c3_309 = arith.constant 3 : index
    %c0_310 = arith.constant 0 : index
    %c0_311 = arith.constant 0 : index
    %366 = vector.load %arg18[%c3_309, %c0_310, %c0_311] : memref<5x64x64xf32, #tpu.memory_space<vmem>>, vector<1x64x64xf32>
    %367 = vector.shape_cast %366 : vector<1x64x64xf32> to vector<64x64xf32>
    %cst_312 = arith.constant dense<0.000000e+00> : vector<16x64xf32>
    %368 = tpu.matmul %365, %367, %cst_312 {dimension_numbers = #tpu.dot_dimension_numbers<[1], [0], [0], [1], [0, 0, 1, 1], [], []>} : vector<16x64xf32>, vector<64x64xf32>, vector<16x64xf32> -> vector<16x64xf32>
    %369 = arith.addf %362, %368 : vector<16x64xf32>
    %c4_313 = arith.constant 4 : index
    %c0_314 = arith.constant 0 : index
    %c0_315 = arith.constant 0 : index
    %370 = vector.load %arg17[%c4_313, %c0_314, %c0_315] : memref<5x16x8xf32, #tpu.memory_space<vmem>>, vector<1x16x8xf32>
    %371 = vector.shape_cast %370 : vector<1x16x8xf32> to vector<16x8xf32>
    %cst_316 = arith.constant dense<0.000000e+00> : vector<16x64xf32>
    %372 = tpu.matmul %371, %342, %cst_316 {dimension_numbers = #tpu.dot_dimension_numbers<[1], [0], [0], [1], [0, 0, 1, 1], [], []>} : vector<16x8xf32>, vector<8x64xf32>, vector<16x64xf32> -> vector<16x64xf32>
    %c4_317 = arith.constant 4 : index
    %c0_318 = arith.constant 0 : index
    %c0_319 = arith.constant 0 : index
    %373 = vector.load %arg18[%c4_317, %c0_318, %c0_319] : memref<5x64x64xf32, #tpu.memory_space<vmem>>, vector<1x64x64xf32>
    %374 = vector.shape_cast %373 : vector<1x64x64xf32> to vector<64x64xf32>
    %cst_320 = arith.constant dense<0.000000e+00> : vector<16x64xf32>
    %375 = tpu.matmul %372, %374, %cst_320 {dimension_numbers = #tpu.dot_dimension_numbers<[1], [0], [0], [1], [0, 0, 1, 1], [], []>} : vector<16x64xf32>, vector<64x64xf32>, vector<16x64xf32> -> vector<16x64xf32>
    %376 = arith.addf %369, %375 : vector<16x64xf32>
    %c0_321 = arith.constant 0 : index
    %c0_322 = arith.constant 0 : index
    %c0_323 = arith.constant 0 : index
    %377 = vector.load %arg19[%c0_321, %c0_322, %c0_323] : memref<3x1x64xf32, #tpu.memory_space<vmem>>, vector<1x1x64xf32>
    %378 = vector.shape_cast %377 : vector<1x1x64xf32> to vector<1x64xf32>
    %379 = vector.broadcast %378 : vector<1x64xf32> to vector<16x64xf32>
    %380 = arith.addf %376, %379 : vector<16x64xf32>
    %c0_324 = arith.constant 0 : index
    %c0_325 = arith.constant 0 : index
    %381 = vector.load %arg20[%c0_324, %c0_325] : memref<64x64xf32, #tpu.memory_space<vmem>>, vector<64x64xf32>
    %cst_326 = arith.constant dense<0.000000e+00> : vector<64xf32>
    %382 = vector.multi_reduction <add>, %380, %cst_326 [0] : vector<16x64xf32> to vector<64xf32>
    %383 = vector.shape_cast %382 : vector<64xf32> to vector<1x64xf32>
    %cst_327 = arith.constant 1.600000e+01 : f32
    %384 = vector.broadcast %cst_327 : f32 to vector<1x64xf32>
    %385 = arith.divf %383, %384 : vector<1x64xf32>
    %cst_328 = arith.constant dense<0.000000e+00> : vector<1x64xf32>
    %386 = tpu.matmul %385, %381, %cst_328 {dimension_numbers = #tpu.dot_dimension_numbers<[1], [0], [0], [1], [0, 0, 1, 1], [], []>} : vector<1x64xf32>, vector<64x64xf32>, vector<1x64xf32> -> vector<1x64xf32>
    %387 = vector.broadcast %386 : vector<1x64xf32> to vector<16x64xf32>
    %388 = arith.subf %380, %387 : vector<16x64xf32>
    %389 = arith.mulf %388, %388 : vector<16x64xf32>
    %cst_329 = arith.constant dense<0.000000e+00> : vector<64xf32>
    %390 = vector.multi_reduction <add>, %389, %cst_329 [0] : vector<16x64xf32> to vector<64xf32>
    %391 = vector.shape_cast %390 : vector<64xf32> to vector<1x64xf32>
    %cst_330 = arith.constant 1.600000e+01 : f32
    %392 = vector.broadcast %cst_330 : f32 to vector<1x64xf32>
    %393 = arith.divf %391, %392 : vector<1x64xf32>
    %cst_331 = arith.constant dense<0.000000e+00> : vector<1x64xf32>
    %394 = tpu.matmul %393, %381, %cst_331 {dimension_numbers = #tpu.dot_dimension_numbers<[1], [0], [0], [1], [0, 0, 1, 1], [], []>} : vector<1x64xf32>, vector<64x64xf32>, vector<1x64xf32> -> vector<1x64xf32>
    %cst_332 = arith.constant 9.99999974E-6 : f32
    %395 = vector.broadcast %cst_332 : f32 to vector<1x64xf32>
    %396 = arith.addf %394, %395 : vector<1x64xf32>
    %397 = math.rsqrt %396 : vector<1x64xf32>
    %c1_333 = arith.constant 1 : index
    %c0_334 = arith.constant 0 : index
    %c0_335 = arith.constant 0 : index
    %398 = vector.load %arg19[%c1_333, %c0_334, %c0_335] : memref<3x1x64xf32, #tpu.memory_space<vmem>>, vector<1x1x64xf32>
    %399 = vector.shape_cast %398 : vector<1x1x64xf32> to vector<1x64xf32>
    %400 = arith.mulf %397, %399 : vector<1x64xf32>
    %401 = vector.broadcast %400 : vector<1x64xf32> to vector<16x64xf32>
    %402 = arith.mulf %388, %401 : vector<16x64xf32>
    %c2_336 = arith.constant 2 : index
    %c0_337 = arith.constant 0 : index
    %c0_338 = arith.constant 0 : index
    %403 = vector.load %arg19[%c2_336, %c0_337, %c0_338] : memref<3x1x64xf32, #tpu.memory_space<vmem>>, vector<1x1x64xf32>
    %404 = vector.shape_cast %403 : vector<1x1x64xf32> to vector<1x64xf32>
    %405 = vector.broadcast %404 : vector<1x64xf32> to vector<16x64xf32>
    %406 = arith.addf %402, %405 : vector<16x64xf32>
    %cst_339 = arith.constant 0.000000e+00 : f32
    %407 = vector.broadcast %cst_339 : f32 to vector<16x64xf32>
    %408 = arith.maximumf %406, %407 : vector<16x64xf32>
    %c0_340 = arith.constant 0 : index
    %c0_341 = arith.constant 0 : index
    %c0_342 = arith.constant 0 : index
    %409 = vector.load %arg21[%c0_340, %c0_341, %c0_342] : memref<3x32x16xf32, #tpu.memory_space<vmem>>, vector<1x32x16xf32>
    %410 = vector.shape_cast %409 : vector<1x32x16xf32> to vector<32x16xf32>
    %cst_343 = arith.constant dense<0.000000e+00> : vector<32x64xf32>
    %411 = tpu.matmul %410, %408, %cst_343 {dimension_numbers = #tpu.dot_dimension_numbers<[1], [0], [0], [1], [0, 0, 1, 1], [], []>} : vector<32x16xf32>, vector<16x64xf32>, vector<32x64xf32> -> vector<32x64xf32>
    %c0_344 = arith.constant 0 : index
    %c0_345 = arith.constant 0 : index
    %c0_346 = arith.constant 0 : index
    %412 = vector.load %arg22[%c0_344, %c0_345, %c0_346] : memref<3x64x64xf32, #tpu.memory_space<vmem>>, vector<1x64x64xf32>
    %413 = vector.shape_cast %412 : vector<1x64x64xf32> to vector<64x64xf32>
    %cst_347 = arith.constant dense<0.000000e+00> : vector<32x64xf32>
    %414 = tpu.matmul %411, %413, %cst_347 {dimension_numbers = #tpu.dot_dimension_numbers<[1], [0], [0], [1], [0, 0, 1, 1], [], []>} : vector<32x64xf32>, vector<64x64xf32>, vector<32x64xf32> -> vector<32x64xf32>
    %c1_348 = arith.constant 1 : index
    %c0_349 = arith.constant 0 : index
    %c0_350 = arith.constant 0 : index
    %415 = vector.load %arg21[%c1_348, %c0_349, %c0_350] : memref<3x32x16xf32, #tpu.memory_space<vmem>>, vector<1x32x16xf32>
    %416 = vector.shape_cast %415 : vector<1x32x16xf32> to vector<32x16xf32>
    %cst_351 = arith.constant dense<0.000000e+00> : vector<32x64xf32>
    %417 = tpu.matmul %416, %408, %cst_351 {dimension_numbers = #tpu.dot_dimension_numbers<[1], [0], [0], [1], [0, 0, 1, 1], [], []>} : vector<32x16xf32>, vector<16x64xf32>, vector<32x64xf32> -> vector<32x64xf32>
    %c1_352 = arith.constant 1 : index
    %c0_353 = arith.constant 0 : index
    %c0_354 = arith.constant 0 : index
    %418 = vector.load %arg22[%c1_352, %c0_353, %c0_354] : memref<3x64x64xf32, #tpu.memory_space<vmem>>, vector<1x64x64xf32>
    %419 = vector.shape_cast %418 : vector<1x64x64xf32> to vector<64x64xf32>
    %cst_355 = arith.constant dense<0.000000e+00> : vector<32x64xf32>
    %420 = tpu.matmul %417, %419, %cst_355 {dimension_numbers = #tpu.dot_dimension_numbers<[1], [0], [0], [1], [0, 0, 1, 1], [], []>} : vector<32x64xf32>, vector<64x64xf32>, vector<32x64xf32> -> vector<32x64xf32>
    %421 = arith.addf %414, %420 : vector<32x64xf32>
    %c2_356 = arith.constant 2 : index
    %c0_357 = arith.constant 0 : index
    %c0_358 = arith.constant 0 : index
    %422 = vector.load %arg21[%c2_356, %c0_357, %c0_358] : memref<3x32x16xf32, #tpu.memory_space<vmem>>, vector<1x32x16xf32>
    %423 = vector.shape_cast %422 : vector<1x32x16xf32> to vector<32x16xf32>
    %cst_359 = arith.constant dense<0.000000e+00> : vector<32x64xf32>
    %424 = tpu.matmul %423, %408, %cst_359 {dimension_numbers = #tpu.dot_dimension_numbers<[1], [0], [0], [1], [0, 0, 1, 1], [], []>} : vector<32x16xf32>, vector<16x64xf32>, vector<32x64xf32> -> vector<32x64xf32>
    %c2_360 = arith.constant 2 : index
    %c0_361 = arith.constant 0 : index
    %c0_362 = arith.constant 0 : index
    %425 = vector.load %arg22[%c2_360, %c0_361, %c0_362] : memref<3x64x64xf32, #tpu.memory_space<vmem>>, vector<1x64x64xf32>
    %426 = vector.shape_cast %425 : vector<1x64x64xf32> to vector<64x64xf32>
    %cst_363 = arith.constant dense<0.000000e+00> : vector<32x64xf32>
    %427 = tpu.matmul %424, %426, %cst_363 {dimension_numbers = #tpu.dot_dimension_numbers<[1], [0], [0], [1], [0, 0, 1, 1], [], []>} : vector<32x64xf32>, vector<64x64xf32>, vector<32x64xf32> -> vector<32x64xf32>
    %428 = arith.addf %421, %427 : vector<32x64xf32>
    %c0_364 = arith.constant 0 : index
    %c0_365 = arith.constant 0 : index
    %c0_366 = arith.constant 0 : index
    %429 = vector.load %arg23[%c0_364, %c0_365, %c0_366] : memref<3x1x64xf32, #tpu.memory_space<vmem>>, vector<1x1x64xf32>
    %430 = vector.shape_cast %429 : vector<1x1x64xf32> to vector<1x64xf32>
    %431 = vector.broadcast %430 : vector<1x64xf32> to vector<32x64xf32>
    %432 = arith.addf %428, %431 : vector<32x64xf32>
    %c0_367 = arith.constant 0 : index
    %c0_368 = arith.constant 0 : index
    %433 = vector.load %arg24[%c0_367, %c0_368] : memref<64x64xf32, #tpu.memory_space<vmem>>, vector<64x64xf32>
    %cst_369 = arith.constant dense<0.000000e+00> : vector<64xf32>
    %434 = vector.multi_reduction <add>, %432, %cst_369 [0] : vector<32x64xf32> to vector<64xf32>
    %435 = vector.shape_cast %434 : vector<64xf32> to vector<1x64xf32>
    %cst_370 = arith.constant 3.200000e+01 : f32
    %436 = vector.broadcast %cst_370 : f32 to vector<1x64xf32>
    %437 = arith.divf %435, %436 : vector<1x64xf32>
    %cst_371 = arith.constant dense<0.000000e+00> : vector<1x64xf32>
    %438 = tpu.matmul %437, %433, %cst_371 {dimension_numbers = #tpu.dot_dimension_numbers<[1], [0], [0], [1], [0, 0, 1, 1], [], []>} : vector<1x64xf32>, vector<64x64xf32>, vector<1x64xf32> -> vector<1x64xf32>
    %439 = vector.broadcast %438 : vector<1x64xf32> to vector<32x64xf32>
    %440 = arith.subf %432, %439 : vector<32x64xf32>
    %441 = arith.mulf %440, %440 : vector<32x64xf32>
    %cst_372 = arith.constant dense<0.000000e+00> : vector<64xf32>
    %442 = vector.multi_reduction <add>, %441, %cst_372 [0] : vector<32x64xf32> to vector<64xf32>
    %443 = vector.shape_cast %442 : vector<64xf32> to vector<1x64xf32>
    %cst_373 = arith.constant 3.200000e+01 : f32
    %444 = vector.broadcast %cst_373 : f32 to vector<1x64xf32>
    %445 = arith.divf %443, %444 : vector<1x64xf32>
    %cst_374 = arith.constant dense<0.000000e+00> : vector<1x64xf32>
    %446 = tpu.matmul %445, %433, %cst_374 {dimension_numbers = #tpu.dot_dimension_numbers<[1], [0], [0], [1], [0, 0, 1, 1], [], []>} : vector<1x64xf32>, vector<64x64xf32>, vector<1x64xf32> -> vector<1x64xf32>
    %cst_375 = arith.constant 9.99999974E-6 : f32
    %447 = vector.broadcast %cst_375 : f32 to vector<1x64xf32>
    %448 = arith.addf %446, %447 : vector<1x64xf32>
    %449 = math.rsqrt %448 : vector<1x64xf32>
    %c1_376 = arith.constant 1 : index
    %c0_377 = arith.constant 0 : index
    %c0_378 = arith.constant 0 : index
    %450 = vector.load %arg23[%c1_376, %c0_377, %c0_378] : memref<3x1x64xf32, #tpu.memory_space<vmem>>, vector<1x1x64xf32>
    %451 = vector.shape_cast %450 : vector<1x1x64xf32> to vector<1x64xf32>
    %452 = arith.mulf %449, %451 : vector<1x64xf32>
    %453 = vector.broadcast %452 : vector<1x64xf32> to vector<32x64xf32>
    %454 = arith.mulf %440, %453 : vector<32x64xf32>
    %c2_379 = arith.constant 2 : index
    %c0_380 = arith.constant 0 : index
    %c0_381 = arith.constant 0 : index
    %455 = vector.load %arg23[%c2_379, %c0_380, %c0_381] : memref<3x1x64xf32, #tpu.memory_space<vmem>>, vector<1x1x64xf32>
    %456 = vector.shape_cast %455 : vector<1x1x64xf32> to vector<1x64xf32>
    %457 = vector.broadcast %456 : vector<1x64xf32> to vector<32x64xf32>
    %458 = arith.addf %454, %457 : vector<32x64xf32>
    %cst_382 = arith.constant 0.000000e+00 : f32
    %459 = vector.broadcast %cst_382 : f32 to vector<32x64xf32>
    %460 = arith.maximumf %458, %459 : vector<32x64xf32>
    %c0_383 = arith.constant 0 : index
    %c0_384 = arith.constant 0 : index
    %461 = vector.load %arg34[%c0_383, %c0_384] : memref<32x64xf32, #tpu.memory_space<vmem>>, vector<32x64xf32>
    tpu.vector_store %arg34[%c0_383, %c0_384], %460 {strides = array<i32>} : memref<32x64xf32, #tpu.memory_space<vmem>>, vector<32x64xf32>,
    return
  }
}

</mosaic_0001>

<bundles_post_ra>
// kernel: forward.1
= control target key start
LH: loop header
LB: loop body
LE: loop exit
PB: predicated region body
PF: predicated region fallthrough
CT: control target
= control target key end

     0   :  { %s3887_s6 = smov 1   ;;  %s3888_s10 = smov 2   ;;  %s4677_s0 = inlined_call_operand.smem [shape: u32[36], index: -1, kind: input, shape index: {}] }
   0x1   :  { %s3959_s5 = sld [smem:[%s4677_s0]]   ;;  %s3889_s14 = smov 3  }
   0x2   :  { %s3964_s9 = sld [smem:[%s4677_s0 + %s3887_s6]]   ;;  %s3890_s18 = smov 4  }
   0x3   :  { %s3969_s13 = sld [smem:[%s4677_s0 + %s3888_s10]]   ;;  %s3891_s22 = smov 5  }
   0x4   :  { %s3974_s17 = sld [smem:[%s4677_s0 + %s3889_s14]]   ;;  %s3892_s26 = smov 6  }
   0x5   :  { %s3979_s21 = sld [smem:[%s4677_s0 + %s3890_s18]]   ;;  %s3893_s30 = smov 7  }
   0x6   :  { %s3984_s25 = sld [smem:[%s4677_s0 + %s3891_s22]]   ;;  %s3894_s4 = smov 8  }
   0x7   :  { %4694 = sst [smem:[#allocation40_spill]] %s3959_s5  ;;  %s3895_s10 = smov 9  }
   0x8   :  { %s3989_s29 = sld [smem:[%s4677_s0 + %s3892_s26]]   ;;  %s3896_s15 = smov 10  }
   0x9   :  { %4695 = sst [smem:[#allocation41_spill]] %s3969_s13  ;;  %s3897_s20 = smov 11  }
   0xa   :  { %s3994_s3 = sld [smem:[%s4677_s0 + %s3893_s30]]   ;;  %s3898_s26 = smov 12  }
   0xb   :  { %4696 = sst [smem:[#allocation42_spill]] %s3979_s21  ;;  %s3899_s1 = smov 13  }
   0xc   :  { %s3999_s8 = sld [smem:[%s4677_s0 + %s3894_s4]]   ;;  %s3900_s7 = smov 14  }
   0xd   :  { %s4004_s14 = sld [smem:[%s4677_s0 + %s3895_s10]]   ;;  %s3902_s22 = smov 16  }
   0xe   :  { %4697 = sst [smem:[#allocation43_spill]] %s3989_s29  ;;  %s3903_s28 = smov 17  }
   0xf   :  { %s4009_s19 = sld [smem:[%s4677_s0 + %s3896_s15]]   ;;  %s3901_s15 = smov 15  }
  0x10   :  { %s4014_s24 = sld [smem:[%s4677_s0 + %s3897_s20]]  }
  0x11   :  { %s4019_s30 = sld [smem:[%s4677_s0 + %s3898_s26]]  }
  0x12   :  { %s4024_s6 = sld [smem:[%s4677_s0 + %s3899_s1]]  }
  0x13   :  { %s4029_s12 = sld [smem:[%s4677_s0 + %s3900_s7]]   ;;  %s3904_s7 = smov 18  }
  0x14   :  { %s4034_s20 = sld [smem:[%s4677_s0 + %s3901_s15]]   ;;  %s3905_s15 = smov 19  }
  0x15   :  { %4698 = sst [smem:[#allocation44_spill]] %s4009_s19 }
  0x16   :  { %s4039_s27 = sld [smem:[%s4677_s0 + %s3902_s22]]   ;;  %s3906_s22 = smov 20  }
  0x17   :  { %s4044_s4 = sld [smem:[%s4677_s0 + %s3903_s28]]   ;;  %s3907_s28 = smov 21  }
  0x18   :  { %4699 = sst [smem:[#allocation45_spill]] %s4024_s6 }
  0x19   :  { %4700 = sst [smem:[#allocation46_spill]] %s4029_s12 }
  0x1a   :  { %s4049_s6 = sld [smem:[%s4677_s0 + %s3904_s7]]   ;;  %s3908_s7 = smov 22  }
  0x1b   :  { %s4054_s12 = sld [smem:[%s4677_s0 + %s3905_s15]]   ;;  %s3909_s15 = smov 23  }
  0x1c   :  { %s4059_s19 = sld [smem:[%s4677_s0 + %s3906_s22]]   ;;  %s3910_s22 = smov 24  }
  0x1d   :  { %4701 = sst [smem:[#allocation47_spill]] %s4044_s4 }
  0x1e   :  { %s4064_s4 = sld [smem:[%s4677_s0 + %s3907_s28]]   ;;  %s3911_s28 = smov 25  }
  0x1f   :  { %s4074_s29 = sld [smem:[%s4677_s0 + %s3909_s15]]   ;;  %s3913_s15 = smov 27  }
  0x20   :  { %4702 = sst [smem:[#allocation48_spill]] %s4049_s6 }
  0x21   :  { %s4069_s6 = sld [smem:[%s4677_s0 + %s3908_s7]]   ;;  %s3912_s7 = smov 26  }
  0x22   :  { %s4079_s21 = sld [smem:[%s4677_s0 + %s3910_s22]]   ;;  %s3914_s22 = smov 28  }
  0x23   :  { %s4089_s13 = sld [smem:[%s4677_s0 + %s3912_s7]]   ;;  %s3916_s7 = smov 30  }
  0x24   :  { %4703 = sst [smem:[#allocation49_spill]] %s4064_s4 }
  0x25   :  { %s4084_s4 = sld [smem:[%s4677_s0 + %s3911_s28]]   ;;  %s3915_s28 = smov 29  }
  0x26   :  { %s4094_s5 = sld [smem:[%s4677_s0 + %s3913_s15]]   ;;  %s3917_s15 = smov 31  }
  0x27   :  { %4704 = sst [smem:[#allocation50_spill]] %s4069_s6 }
  0x28   :  { %4705 = sst [smem:[#allocation51_spill]] %s4079_s21 }
  0x29   :  { %s4099_s21 = sld [smem:[%s4677_s0 + %s3914_s22]]   ;;  %s3918_s22 = smov 32  }
  0x2a   :  { %s4109_s6 = sld [smem:[%s4677_s0 + %s3916_s7]]   ;;  %s3920_s7 = smov 34  }
  0x2b   :  { %4706 = sst [smem:[#allocation52_spill]] %s4084_s4 }
  0x2c   :  { %4707 = sst [smem:[#allocation53_spill]] %s4094_s5 }
  0x2d   :  { %s4104_s4 = sld [smem:[%s4677_s0 + %s3915_s28]]   ;;  %s3919_s28 = smov 33  }
  0x2e   :  { %s4114_s5 = sld [smem:[%s4677_s0 + %s3917_s15]]   ;;  %s3921_s15 = smov 35  }
  0x2f   :  { %4708 = sst [smem:[#allocation54_spill]] %s4099_s21 }
  0x30   :  { %4710 = sst [smem:[#allocation56_spill]] %s4109_s6 }
  0x31   :  { %s4119_s21 = sld [smem:[%s4677_s0 + %s3918_s22]]  }
  0x32   :  { %s4129_s6 = sld [smem:[%s4677_s0 + %s3920_s7]]  }
  0x33   :  { %4709 = sst [smem:[#allocation55_spill]] %s4104_s4 }
  0x34   :  { %4711 = sst [smem:[#allocation57_spill]] %s4114_s5 }
  0x35   :  { %s4124_s4 = sld [smem:[%s4677_s0 + %s3919_s28]]  }
  0x36   :  { %s4134_s5 = sld [smem:[%s4677_s0 + %s3921_s15]]  }
  0x37   :  { %77 = vsyncpa [#allocation3], 0 }
  0x38   :  { %78 = vsyncpa [#allocation6], 0 }
  0x39   :  { %79 = vsyncpa [#allocation9], 0 }
  0x3a   :  { %80 = vsyncpa [#allocation12], 0 }
  0x3b   :  { %81 = vsyncpa [#allocation15], 0 }
  0x3c   :  { %82 = vsyncpa [#allocation18], 0 }
  0x3d   :  { %83 = vsyncpa [#allocation21], 0 }
  0x3e   :  { %84 = vsyncpa [#allocation24], 0 }
  0x3f   :  { %85 = vsyncpa [#allocation27], 0  ;;  %s108_s22 = sshll.u32 %s3974_s17, 4  ;;  %s109_s22 = int_to_ptr.hbm [resolvable:$true] %s108_s22 }
  0x40   :  { %86 = vsyncpa [#allocation4], 0  ;;  %s3922_s23 = smov [#allocation5]   ;;  %s138_s0 = sshll.u32 %s3994_s3, 4  ;;  %s139_s0 = int_to_ptr.hbm [resolvable:$true] %s138_s0 }
  0x41   :  { %s110_s26 = sshll.u32 %s3922_s23, 4  ;;  %s3435_s28 = sshra.s32 %s109_s22, 4  ;;  %s111_s26 = int_to_ptr.vmem [resolvable:$true] %s110_s26  ;;  %s3436_s28 = int_to_ptr.hbm [resolvable:$true] %s3435_s28 }
  0x42   :  { %s3437_s1 = scalar_lea.hbm %s3436_s28, 3  ;;  %s3439_s2 = scalar_lea.hbm %s3974_s17, 3 }
  0x43   :  { %p3438_p0 = scmp.ne.s32.totalorder %s3436_s28, %s3437_s1  ;;  %p3440_p1 = scmp.lt.s32.totalorder %s3436_s28, %s3974_s17 }
  0x44   :  { %p3441_p2 = scmp.lt.s32.totalorder %s3439_s2, %s3437_s1 }
  0x46   :  { %p3442_p3 = por %p3441_p2, %p3440_p1 }
  0x48   :  { %p3443_p4 = pnand %p3442_p3, %p3438_p0 }
  0x4a   :  { %3446 = shalt.err (!%p3443_p4)
}
  0x4b   :  { %s3923_s7 = smov 16   ;;  %s3924_s10 = smov 1  }
  0x4c   :  { %116 = dma.hbm_to_vmem [thread:$0]  %s109_s22, 48, %s111_s26, [#allocation6], %s3923_s7, %s3923_s7, %s3924_s10  }
  0x4d   :  { %s3925_s11 = smov [#allocation8]   ;;  %s164_s16 = sshll.u32 %s4004_s14, 4  ;;  %s4144_s16 = int_to_ptr.hbm [resolvable:$true] %s164_s16 }
  0x4e   :  { %s140_s15 = sshll.u32 %s3925_s11, 4  ;;  %s3459_s17 = sshra.s32 %s139_s0, 4  ;;  %s141_s15 = int_to_ptr.vmem [resolvable:$true] %s140_s15  ;;  %s3460_s17 = int_to_ptr.hbm [resolvable:$true] %s3459_s17 }
  0x4f   :  { %s3461_s18 = scalar_lea.hbm %s3460_s17, 3  ;;  %s3463_s23 = scalar_lea.hbm %s3994_s3, 3 }
  0x50   :  { %p3462_p5 = scmp.ne.s32.totalorder %s3460_s17, %s3461_s18  ;;  %p3464_p6 = scmp.lt.s32.totalorder %s3460_s17, %s3994_s3 }
  0x51   :  { %p3465_p7 = scmp.lt.s32.totalorder %s3463_s23, %s3461_s18 }
  0x53   :  { %p3466_p8 = por %p3465_p7, %p3464_p6 }
  0x55   :  { %p3467_p9 = pnand %p3466_p8, %p3462_p5 }
  0x57   :  { %3470 = shalt.err (!%p3467_p9)
}
  0x58   :  { %146 = dma.hbm_to_vmem [thread:$0]  %s139_s0, 48, %s141_s15, [#allocation9], %s3923_s7, %s3923_s7, %s3924_s10  }
  0x59   :  { %s3926_s22 = smov [#allocation11]   ;;  %s3483_s28 = sshra.s32 %s4144_s16, 4  ;;  %s3484_s28 = int_to_ptr.hbm [resolvable:$true] %s3483_s28 }
  0x5a   :  { %s166_s26 = sshll.u32 %s3926_s22, 4  ;;  %s3485_s1 = scalar_lea.hbm %s3484_s28, 12  ;;  %s167_s26 = int_to_ptr.vmem [resolvable:$true] %s166_s26 }
  0x5b   :  { %p3486_p10 = scmp.ne.s32.totalorder %s3484_s28, %s3485_s1  ;;  %s3487_s2 = scalar_lea.hbm %s4004_s14, 12 }
  0x5c   :  { %p3488_p11 = scmp.lt.s32.totalorder %s3484_s28, %s4004_s14  ;;  %p3489_p12 = scmp.lt.s32.totalorder %s3487_s2, %s3485_s1 }
  0x5e   :  { %p3490_p13 = por %p3489_p12, %p3488_p11 }
  0x60   :  { %p3491_p0 = pnand %p3490_p13, %p3486_p10 }
  0x62   :  { %3494 = shalt.err (!%p3491_p0)
}
  0x63   :  { %s3927_s3 = smov 64   ;;  %s3928_s0 = smov 4  }
  0x64   :  { %172 = dma.hbm_to_vmem [thread:$0]  %s4144_s16, 192, %s167_s26, [#allocation12], %s3927_s3, %s3927_s3, %s3928_s0  }
  0x65   :  { %s192_s11 = sshll.u32 %s4019_s30, 4  ;;  %s3929_s15 = smov [#allocation14]   ;;  %s193_s11 = int_to_ptr.hbm [resolvable:$true] %s192_s11 }
  0x66   :  { %s194_s17 = sshll.u32 %s3929_s15, 4  ;;  %s222_s18 = sshll.u32 %s4039_s27, 4  ;;  %s195_s17 = int_to_ptr.vmem [resolvable:$true] %s194_s17  ;;  %s4157_s18 = int_to_ptr.hbm [resolvable:$true] %s222_s18 }
  0x67   :  { %s3507_s14 = sshra.s32 %s193_s11, 4  ;;  %s3511_s22 = scalar_lea.hbm %s4019_s30, 64  ;;  %s3508_s14 = int_to_ptr.hbm [resolvable:$true] %s3507_s14 }
  0x68   :  { %s3509_s23 = scalar_lea.hbm %s3508_s14, 64  ;;  %p3512_p2 = scmp.lt.s32.totalorder %s3508_s14, %s4019_s30 }
  0x69   :  { %p3510_p1 = scmp.ne.s32.totalorder %s3508_s14, %s3509_s23  ;;  %p3513_p3 = scmp.lt.s32.totalorder %s3511_s22, %s3509_s23 }
  0x6b   :  { %p3514_p4 = por %p3513_p3, %p3512_p2 }
  0x6d   :  { %p3515_p5 = pnand %p3514_p4, %p3510_p1 }
  0x6f   :  { %3518 = shalt.err (!%p3515_p5)
}
  0x70   :  { %s3930_s28 = smov 128   ;;  %s3931_s16 = smov 8  }
  0x71   :  { %200 = dma.hbm_to_vmem [thread:$0]  %s193_s11, 1024, %s195_s17, [#allocation15], %s3930_s28, %s3930_s28, %s3931_s16  }
  0x72   :  { %s252_s26 = sshll.u32 %s4059_s19, 4  ;;  %s3932_s1 = smov [#allocation17]   ;;  %s4165_s26 = int_to_ptr.hbm [resolvable:$true] %s252_s26 }
  0x73   :  { %s224_s2 = sshll.u32 %s3932_s1, 4  ;;  %s3531_s30 = sshra.s32 %s4157_s18, 4  ;;  %s225_s2 = int_to_ptr.vmem [resolvable:$true] %s224_s2  ;;  %s3532_s30 = int_to_ptr.hbm [resolvable:$true] %s3531_s30 }
  0x74   :  { %s3533_s3 = scalar_lea.hbm %s3532_s30, 64  ;;  %s3535_s0 = scalar_lea.hbm %s4039_s27, 64 }
  0x75   :  { %p3534_p6 = scmp.ne.s32.totalorder %s3532_s30, %s3533_s3  ;;  %p3536_p7 = scmp.lt.s32.totalorder %s3532_s30, %s4039_s27 }
  0x76   :  { %p3537_p8 = scmp.lt.s32.totalorder %s3535_s0, %s3533_s3 }
  0x78   :  { %p3538_p9 = por %p3537_p8, %p3536_p7 }
  0x7a   :  { %p3539_p10 = pnand %p3538_p9, %p3534_p6 }
  0x7c   :  { %3542 = shalt.err (!%p3539_p10)
}
  0x7d   :  { %230 = dma.hbm_to_vmem [thread:$0]  %s4157_s18, 1024, %s225_s2, [#allocation18], %s3930_s28, %s3930_s28, %s3931_s16  }
  0x7e   :  { %s3933_s11 = smov [#allocation20]   ;;  %s280_s17 = sshll.u32 %s4074_s29, 4  ;;  %s4175_s17 = int_to_ptr.hbm [resolvable:$true] %s280_s17 }
  0x7f   :  { %s254_s15 = sshll.u32 %s3933_s11, 4  ;;  %s3555_s27 = sshra.s32 %s4165_s26, 4  ;;  %s255_s15 = int_to_ptr.vmem [resolvable:$true] %s254_s15  ;;  %s3556_s27 = int_to_ptr.hbm [resolvable:$true] %s3555_s27 }
  0x80   :  { %s3557_s14 = scalar_lea.hbm %s3556_s27, 64  ;;  %s3559_s23 = scalar_lea.hbm %s4059_s19, 64 }
  0x81   :  { %p3558_p11 = scmp.ne.s32.totalorder %s3556_s27, %s3557_s14  ;;  %p3560_p12 = scmp.lt.s32.totalorder %s3556_s27, %s4059_s19 }
  0x82   :  { %p3561_p13 = scmp.lt.s32.totalorder %s3559_s23, %s3557_s14 }
  0x84   :  { %p3562_p0 = por %p3561_p13, %p3560_p12 }
  0x86   :  { %p3563_p1 = pnand %p3562_p0, %p3558_p11 }
  0x88   :  { %3566 = shalt.err (!%p3563_p1)
}
  0x89   :  { %260 = dma.hbm_to_vmem [thread:$0]  %s4165_s26, 1024, %s255_s15, [#allocation21], %s3930_s28, %s3930_s28, %s3931_s16  }
  0x8a   :  { %s309_s18 = sshll.u32 %s4089_s13, 4  ;;  %s3934_s22 = smov [#allocation23]   ;;  %s310_s18 = int_to_ptr.hbm [resolvable:$true] %s309_s18 }
  0x8b   :  { %s282_s1 = sshll.u32 %s3934_s22, 4  ;;  %s3579_s2 = sshra.s32 %s4175_s17, 4  ;;  %s283_s1 = int_to_ptr.vmem [resolvable:$true] %s282_s1  ;;  %s3580_s2 = int_to_ptr.hbm [resolvable:$true] %s3579_s2 }
  0x8c   :  { %s3581_s19 = scalar_lea.hbm %s3580_s2, 3  ;;  %s3583_s30 = scalar_lea.hbm %s4074_s29, 3 }
  0x8d   :  { %p3582_p2 = scmp.ne.s32.totalorder %s3580_s2, %s3581_s19  ;;  %p3584_p3 = scmp.lt.s32.totalorder %s3580_s2, %s4074_s29 }
  0x8e   :  { %p3585_p4 = scmp.lt.s32.totalorder %s3583_s30, %s3581_s19 }
  0x90   :  { %p3586_p5 = por %p3585_p4, %p3584_p3 }
  0x92   :  { %p3587_p6 = pnand %p3586_p5, %p3582_p2 }
  0x94   :  { %3590 = shalt.err (!%p3587_p6)
}
  0x95   :  { %288 = dma.hbm_to_vmem [thread:$0]  %s4175_s17, 48, %s283_s1, [#allocation24], %s3923_s7, %s3923_s7, %s3924_s10  }
  0x96   :  { %s3935_s26 = smov [#allocation26]   ;;  %s93_s0 = sshll.u32 %s3964_s9, 4  ;;  %s4193_s0 = int_to_ptr.hbm [resolvable:$true] %s93_s0 }
  0x97   :  { %s311_s3 = sshll.u32 %s3935_s26, 4  ;;  %s3603_s11 = sshra.s32 %s310_s18, 4  ;;  %s312_s3 = int_to_ptr.vmem [resolvable:$true] %s311_s3  ;;  %s3604_s11 = int_to_ptr.hbm [resolvable:$true] %s3603_s11 }
  0x98   :  { %s3605_s29 = scalar_lea.hbm %s3604_s11, 1  ;;  %s3607_s15 = scalar_lea.hbm %s4089_s13, 1 }
  0x99   :  { %p3606_p7 = scmp.ne.s32.totalorder %s3604_s11, %s3605_s29  ;;  %p3608_p8 = scmp.lt.s32.totalorder %s3604_s11, %s4089_s13 }
  0x9a   :  { %p3609_p9 = scmp.lt.s32.totalorder %s3607_s15, %s3605_s29 }
  0x9c   :  { %p3610_p10 = por %p3609_p9, %p3608_p8 }
  0x9e   :  { %p3611_p11 = pnand %p3610_p10, %p3606_p7 }
  0xa0   :  { %3614 = shalt.err (!%p3611_p11)
}
  0xa1   :  { %314 = dma.hbm_to_vmem [thread:$0]  %s310_s18, 16, %s312_s3, [#allocation27]  }
  0xa2   :  { %s123_s17 = sshll.u32 %s3984_s25, 4  ;;  %s3936_s27 = smov [#allocation2]   ;;  %s4198_s17 = int_to_ptr.hbm [resolvable:$true] %s123_s17 }
  0xa3   :  { %s95_s14 = sshll.u32 %s3936_s27, 4  ;;  %s3627_s23 = sshra.s32 %s4193_s0, 4  ;;  %s96_s14 = int_to_ptr.vmem [resolvable:$true] %s95_s14  ;;  %s3628_s23 = int_to_ptr.hbm [resolvable:$true] %s3627_s23 }
  0xa4   :  { %s3629_s22 = scalar_lea.hbm %s3628_s23, 48  ;;  %s3631_s13 = scalar_lea.hbm %s3964_s9, 48 }
  0xa5   :  { %p3630_p12 = scmp.ne.s32.totalorder %s3628_s23, %s3629_s22  ;;  %p3632_p13 = scmp.lt.s32.totalorder %s3628_s23, %s3964_s9 }
  0xa6   :  { %p3633_p0 = scmp.lt.s32.totalorder %s3631_s13, %s3629_s22 }
  0xa8   :  { %p3634_p1 = por %p3633_p0, %p3632_p13 }
  0xaa   :  { %p3635_p2 = pnand %p3634_p1, %p3630_p12 }
  0xac   :  { %3638 = shalt.err (!%p3635_p2)
}
  0xad   :  { %101 = dma.hbm_to_vmem [thread:$0]  %s4193_s0, 768, %s96_s14, [#allocation3], %s3930_s28, %s3930_s28, %s3931_s16  }
  0xae   :  { %s3937_s18 = smov [#allocation7]   ;;  %s151_s2 = sshll.u32 %s3999_s8, 4  ;;  %s4208_s2 = int_to_ptr.hbm [resolvable:$true] %s151_s2 }
  0xaf   :  { %s125_s1 = sshll.u32 %s3937_s18, 4  ;;  %s3651_s9 = sshra.s32 %s4198_s17, 4  ;;  %s126_s1 = int_to_ptr.vmem [resolvable:$true] %s125_s1  ;;  %s3652_s9 = int_to_ptr.hbm [resolvable:$true] %s3651_s9 }
  0xb0   :  { %s3653_s19 = scalar_lea.hbm %s3652_s9, 40  ;;  %s3655_s30 = scalar_lea.hbm %s3984_s25, 40 }
  0xb1   :  { %p3654_p3 = scmp.ne.s32.totalorder %s3652_s9, %s3653_s19  ;;  %p3656_p4 = scmp.lt.s32.totalorder %s3652_s9, %s3984_s25 }
  0xb2   :  { %p3657_p5 = scmp.lt.s32.totalorder %s3655_s30, %s3653_s19 }
  0xb4   :  { %p3658_p6 = por %p3657_p5, %p3656_p4 }
  0xb6   :  { %p3659_p7 = pnand %p3658_p6, %p3654_p3 }
  0xb8   :  { %3662 = shalt.err (!%p3659_p7)
}
  0xb9   :  { %131 = dma.hbm_to_vmem [thread:$0]  %s4198_s17, 640, %s126_s1, [#allocation6], %s3930_s28, %s3930_s28, %s3931_s16  }
  0xba   :  { %s179_s26 = sshll.u32 %s4014_s24, 4  ;;  %s3938_s3 = smov [#allocation10]   ;;  %s4218_s26 = int_to_ptr.hbm [resolvable:$true] %s179_s26 }
  0xbb   :  { %s153_s0 = sshll.u32 %s3938_s3, 4  ;;  %s3675_s25 = sshra.s32 %s4208_s2, 4  ;;  %s154_s0 = int_to_ptr.vmem [resolvable:$true] %s153_s0  ;;  %s3676_s25 = int_to_ptr.hbm [resolvable:$true] %s3675_s25 }
  0xbc   :  { %s3677_s11 = scalar_lea.hbm %s3676_s25, 64  ;;  %s3679_s29 = scalar_lea.hbm %s3999_s8, 64 }
  0xbd   :  { %p3678_p8 = scmp.ne.s32.totalorder %s3676_s25, %s3677_s11  ;;  %p3680_p9 = scmp.lt.s32.totalorder %s3676_s25, %s3999_s8 }
  0xbe   :  { %p3681_p10 = scmp.lt.s32.totalorder %s3679_s29, %s3677_s11 }
  0xc0   :  { %p3682_p11 = por %p3681_p10, %p3680_p9 }
  0xc2   :  { %p3683_p12 = pnand %p3682_p11, %p3678_p8 }
  0xc4   :  { %3686 = shalt.err (!%p3683_p12)
}
  0xc5   :  { %159 = dma.hbm_to_vmem [thread:$0]  %s4208_s2, 1024, %s154_s0, [#allocation9], %s3930_s28, %s3930_s28, %s3931_s16  }
  0xc6   :  { %s3939_s15 = smov [#allocation13]   ;;  %s209_s27 = sshll.u32 %s4034_s20, 4  ;;  %s4228_s27 = int_to_ptr.hbm [resolvable:$true] %s209_s27 }
  0xc7   :  { %s181_s17 = sshll.u32 %s3939_s15, 4  ;;  %s3699_s8 = sshra.s32 %s4218_s26, 4  ;;  %s182_s17 = int_to_ptr.vmem [resolvable:$true] %s181_s17  ;;  %s3700_s8 = int_to_ptr.hbm [resolvable:$true] %s3699_s8 }
  0xc8   :  { %s3701_s14 = scalar_lea.hbm %s3700_s8, 3  ;;  %s3703_s23 = scalar_lea.hbm %s4014_s24, 3 }
  0xc9   :  { %p3702_p13 = scmp.ne.s32.totalorder %s3700_s8, %s3701_s14  ;;  %p3704_p0 = scmp.lt.s32.totalorder %s3700_s8, %s4014_s24 }
  0xca   :  { %p3705_p1 = scmp.lt.s32.totalorder %s3703_s23, %s3701_s14 }
  0xcc   :  { %p3706_p2 = por %p3705_p1, %p3704_p0 }
  0xce   :  { %p3707_p3 = pnand %p3706_p2, %p3702_p13 }
  0xd0   :  { %3710 = shalt.err (!%p3707_p3)
}
  0xd1   :  { %187 = dma.hbm_to_vmem [thread:$0]  %s4218_s26, 48, %s182_s17, [#allocation12], %s3923_s7, %s3923_s7, %s3924_s10  }
  0xd2   :  { %s239_s22 = sshll.u32 %s4054_s12, 4  ;;  %s3940_s13 = smov [#allocation16]   ;;  %s4238_s22 = int_to_ptr.hbm [resolvable:$true] %s239_s22 }
  0xd3   :  { %s211_s18 = sshll.u32 %s3940_s13, 4  ;;  %s3723_s24 = sshra.s32 %s4228_s27, 4  ;;  %s212_s18 = int_to_ptr.vmem [resolvable:$true] %s211_s18  ;;  %s3724_s24 = int_to_ptr.hbm [resolvable:$true] %s3723_s24 }
  0xd4   :  { %s3725_s1 = scalar_lea.hbm %s3724_s24, 3  ;;  %s3727_s2 = scalar_lea.hbm %s4034_s20, 3 }
  0xd5   :  { %p3726_p4 = scmp.ne.s32.totalorder %s3724_s24, %s3725_s1  ;;  %p3728_p5 = scmp.lt.s32.totalorder %s3724_s24, %s4034_s20 }
  0xd6   :  { %p3729_p6 = scmp.lt.s32.totalorder %s3727_s2, %s3725_s1 }
  0xd8   :  { %p3730_p7 = por %p3729_p6, %p3728_p5 }
  0xda   :  { %p3731_p8 = pnand %p3730_p7, %p3726_p4 }
  0xdc   :  { %3734 = shalt.err (!%p3731_p8)
}
  0xdd   :  { %s4712_s9 = sld [smem:[#allocation50_spill]]  ;;  %s3941_s19 = smov [#allocation19]  }
  0xde   :  { %217 = dma.hbm_to_vmem [thread:$0]  %s4228_s27, 48, %s212_s18, [#allocation15], %s3923_s7, %s3923_s7, %s3924_s10  }
  0xdf   :  { %s241_s30 = sshll.u32 %s3941_s19, 4  ;;  %s3747_s20 = sshra.s32 %s4238_s22, 4  ;;  %s242_s30 = int_to_ptr.vmem [resolvable:$true] %s241_s30  ;;  %s3748_s20 = int_to_ptr.hbm [resolvable:$true] %s3747_s20 }
  0xe0   :  { %s3749_s3 = scalar_lea.hbm %s3748_s20, 3  ;;  %s3751_s0 = scalar_lea.hbm %s4054_s12, 3 }
  0xe1   :  { %p3750_p9 = scmp.ne.s32.totalorder %s3748_s20, %s3749_s3  ;;  %p3752_p10 = scmp.lt.s32.totalorder %s3748_s20, %s4054_s12 }
  0xe2   :  { %p3753_p11 = scmp.lt.s32.totalorder %s3751_s0, %s3749_s3 }
  0xe3   :  { %s267_s26 = sshll.u32 %s4712_s9, 4  ;;  %s4248_s26 = int_to_ptr.hbm [resolvable:$true] %s267_s26 }
  0xe4   :  { %p3754_p12 = por %p3753_p11, %p3752_p10 }
  0xe6   :  { %p3755_p13 = pnand %p3754_p12, %p3750_p9 }
  0xe8   :  { %3758 = shalt.err (!%p3755_p13)
}
  0xe9   :  { %s4713_s25 = sld [smem:[#allocation51_spill]]  ;;  %s3942_s29 = smov [#allocation22]  }
  0xea   :  { %247 = dma.hbm_to_vmem [thread:$0]  %s4238_s22, 48, %s242_s30, [#allocation18], %s3923_s7, %s3923_s7, %s3924_s10  }
  0xeb   :  { %s269_s15 = sshll.u32 %s3942_s29, 4  ;;  %s3771_s12 = sshra.s32 %s4248_s26, 4  ;;  %s270_s15 = int_to_ptr.vmem [resolvable:$true] %s269_s15  ;;  %s3772_s12 = int_to_ptr.hbm [resolvable:$true] %s3771_s12 }
  0xec   :  { %s3773_s17 = scalar_lea.hbm %s3772_s12, 192  ;;  %s3775_s27 = scalar_lea.hbm %s4712_s9, 192 }
  0xed   :  { %p3774_p0 = scmp.ne.s32.totalorder %s3772_s12, %s3773_s17  ;;  %p3776_p1 = scmp.lt.s32.totalorder %s3772_s12, %s4712_s9 }
  0xee   :  { %p3777_p2 = scmp.lt.s32.totalorder %s3775_s27, %s3773_s17 }
  0xef   :  { %s293_s11 = sshll.u32 %s4713_s25, 4  ;;  %s4258_s11 = int_to_ptr.hbm [resolvable:$true] %s293_s11 }
  0xf0   :  { %p3778_p3 = por %p3777_p2, %p3776_p1 }
  0xf2   :  { %p3779_p4 = pnand %p3778_p3, %p3774_p0 }
  0xf4   :  { %3782 = shalt.err (!%p3779_p4)
}
  0xf5   :  { %s4714_s7 = sld [smem:[#allocation57_spill]]  ;;  %s3943_s10 = smov [#allocation25]  }
  0xf6   :  { %275 = dma.hbm_to_vmem [thread:$0]  %s4248_s26, 3072, %s270_s15, [#allocation21], %s3930_s28, %s3930_s28, %s3931_s16  }
  0xf7   :  { %s295_s8 = sshll.u32 %s3943_s10, 4  ;;  %s3795_s23 = sshra.s32 %s4258_s11, 4  ;;  %s296_s8 = int_to_ptr.vmem [resolvable:$true] %s295_s8  ;;  %s3796_s23 = int_to_ptr.hbm [resolvable:$true] %s3795_s23 }
  0xf8   :  { %s3797_s22 = scalar_lea.hbm %s3796_s23, 64  ;;  %s3799_s13 = scalar_lea.hbm %s4713_s25, 64 }
  0xf9   :  { %p3798_p5 = scmp.ne.s32.totalorder %s3796_s23, %s3797_s22  ;;  %p3800_p6 = scmp.lt.s32.totalorder %s3796_s23, %s4713_s25 }
  0xfa   :  { %p3801_p7 = scmp.lt.s32.totalorder %s3799_s13, %s3797_s22 }
  0xfb   :  { %s327_s14 = sshll.u32 %s4714_s7, 4  ;;  %s328_s14 = int_to_ptr.hbm [resolvable:$true] %s327_s14 }
  0xfc   :  { %p3802_p8 = por %p3801_p7, %p3800_p6 }
  0xfe   :  { %p3803_p9 = pnand %p3802_p8, %p3798_p5 }
 0x100   :  { %3806 = shalt.err (!%p3803_p9)
}
 0x101   :  { %301 = dma.hbm_to_vmem [thread:$0]  %s4258_s11, 1024, %s296_s8, [#allocation24], %s3930_s28, %s3930_s28, %s3931_s16  }
 0x102   :  { %s3944_s18 = smov [#allocation28]   ;;  %s3819_s1 = sshra.s32 %s328_s14, 4  ;;  %s3820_s1 = int_to_ptr.hbm [resolvable:$true] %s3819_s1 }
 0x103   :  { %s329_s24 = sshll.u32 %s3944_s18, 4  ;;  %s3821_s2 = scalar_lea.hbm %s3820_s1, 128  ;;  %s330_s24 = int_to_ptr.vmem [resolvable:$true] %s329_s24 }
 0x104   :  { %p3822_p10 = scmp.ne.s32.totalorder %s3820_s1, %s3821_s2  ;;  %s3823_s9 = scalar_lea.hbm %s4714_s7, 128 }
 0x105   :  { %p3824_p11 = scmp.lt.s32.totalorder %s3820_s1, %s4714_s7  ;;  %p3825_p12 = scmp.lt.s32.totalorder %s3823_s9, %s3821_s2 }
 0x107   :  { %p3826_p13 = por %p3825_p12, %p3824_p11 }
 0x109   :  { %p3827_p0 = pnand %p3826_p13, %p3822_p10 }
 0x10b   :  { %3830 = shalt.err (!%p3827_p0)
}
 0x10c   :  { %335 = dma.hbm_to_vmem [thread:$0]  %s328_s14, 2048, %s330_s24, [#allocation27], %s3930_s28, %s3930_s28, %s3931_s16  }
 0x10d   :  { %3867 = dma.done.wait [#allocation3], 768  }
 0x10e   :  { %3868 = vsyncadd [#allocation3], 4294966528 }
 0x10f   :  { %3869 = dma.done.wait [#allocation6], 688  }
 0x110   :  { %3870 = vsyncadd [#allocation6], 4294966608 }
 0x111   :  { %3871 = dma.done.wait [#allocation9], 1072  }
 0x112   :  { %3872 = vsyncadd [#allocation9], 4294966224 }
 0x113   :  { %3873 = dma.done.wait [#allocation12], 240  }
 0x114   :  { %3874 = vsyncadd [#allocation12], 4294967056 }
 0x115   :  { %3875 = dma.done.wait [#allocation15], 1072  }
 0x116   :  { %3876 = vsyncadd [#allocation15], 4294966224 }
 0x117   :  { %3877 = dma.done.wait [#allocation18], 1072  }
 0x118   :  { %3878 = vsyncadd [#allocation18], 4294966224 }
 0x119   :  { %3879 = dma.done.wait [#allocation21], 4096  }
 0x11a   :  { %3880 = vsyncadd [#allocation21], 4294963200 }
 0x11b   :  { %3881 = dma.done.wait [#allocation24], 1072  }
 0x11c   :  { %3882 = vsyncadd [#allocation24], 4294966224 }
 0x11d   :  { %3883 = dma.done.wait [#allocation27], 2064  }
 0x11e   :  { %3884 = vsyncadd [#allocation27], 4294965232  ;;  %s4715_s19 = sld [smem:[#allocation40_spill]]  ;;  %v412_v8 = vld [vmem:[#allocation2] sm:$0xff]  ;;  %vm414_vm0 = vcmask 261120   ;;  %v453_v9 = vld [vmem:[#allocation2 + $0x10] sm:$0xff] }
 0x11f   :  { %s4716_s28 = sld [smem:[#allocation41_spill]]  ;;  %v413_v17 = vld [vmem:[#allocation2 + $0x8] sm:$0xff]  ;;  %v454_v18 = vld [vmem:[#allocation2 + $0x18] sm:$0xff]  ;;  %v553_v22 = vld [vmem:[#allocation2 + $0x20] sm:$0xff]  ;;  %vm493_vm1 = vcmask 523264   ;;  %v3945_v51 = vmov 16.0  }
 0x120   :  { %v554_v23 = vld [vmem:[#allocation2 + $0x28] sm:$0xff]  ;;  %s4717_s16 = sld [smem:[#allocation42_spill]]  ;;  %3411 = vrcp.f32 %v3945_v51  ;;  %v3399_v56 = vld [vmem:[#allocation5] ss:$0 sm:$0xff]  ;;  %vm742_vm6 = vcmask 130048   ;;  %vm1136_vm11 = vcmask 64512  }
 0x121   :  { %s4718_s30 = sld [smem:[#allocation43_spill]]  ;;  %vm1319_vm12 = vcmask 519168   ;;  %s3950_s17 = smov [#allocation29]  }
 0x122   :  { %s4719_s26 = sld [smem:[#allocation44_spill]]  ;;  %s3009_s27 = sshll.u32 %s3950_s17, 4  ;;  %s3010_s27 = int_to_ptr.vmem [resolvable:$true] %s3009_s27 }
 0x123   :  { %s4720_s20 = sld [smem:[#allocation52_spill]]  ;;  %s3011_s7 = sshll.u32 %s4134_s5, 4  ;;  %s3012_s7 = int_to_ptr.hbm [resolvable:$true] %s3011_s7 }
 0x124   :  { %v411_v0 = vld [vmem:[%s4715_s19 + $0x18] sm:$0xff]  ;;  %v410_v1 = vld [vmem:[%s4715_s19 + $0x10] sm:$0xff]  ;;  %v409_v2 = vld [vmem:[%s4715_s19 + $0x8] sm:$0xff]  ;;  %s4721_s3 = sld [smem:[#allocation53_spill]]  ;;  %s3855_s10 = sshra.s32 %s3012_s7, 4  ;;  %s3856_s10 = int_to_ptr.hbm [resolvable:$true] %s3855_s10 }
 0x125   :  { %433 = vmatpush.msra.mxu0 %v411_v0  ;;  %473 = vmatpush.msra.mxu1 %v411_v0  ;;  %v3077_v3 = vld [vmem:[%s4716_s28 + $0x78] sm:$0xff]  ;;  %v408_v5 = vld [vmem:[%s4715_s19] sm:$0xff]  ;;  %v3076_v6 = vld [vmem:[%s4716_s28 + $0x70] sm:$0xff]  ;;  %s4722_s0 = sld [smem:[#allocation55_spill]]  ;;  %s3857_s8 = scalar_lea.hbm %s3856_s10, 1 }
 0x126   :  { %v451_v4 = vld [vmem:[%s4716_s28 + $0x38] sm:$0xff]  ;;  %508 = vmatpush.msra.mxu2 %v3077_v3  ;;  %v450_v7 = vld [vmem:[%s4716_s28 + $0x30] sm:$0xff]  ;;  %v3075_v10 = vld [vmem:[%s4716_s28 + $0x68] sm:$0xff]  ;;  %v3412_v57 = vpop.eup %3411  ;;  %s4723_s25 = sld [smem:[#allocation54_spill]]  ;;  %p3858_p1 = scmp.ne.s32.totalorder %s3856_s10, %s3857_s8 }
 0x127   :  { %434 = vmatpush.msra.mxu0 %v410_v1  ;;  %474 = vmatpush.msra.mxu1 %v410_v1  ;;  %v449_v11 = vld [vmem:[%s4716_s28 + $0x28] sm:$0xff]  ;;  %v3074_v12 = vld [vmem:[%s4716_s28 + $0x60] sm:$0xff]  ;;  %v3073_v14 = vld [vmem:[%s4716_s28 + $0x58] sm:$0xff]  ;;  %v648_v62 = vmul.f32 16.0, %v3412_v57  ;;  %vm652_vm2 = vweird.f32 %v3412_v57  ;;  %s4724_s11 = sld [smem:[#allocation56_spill]]  ;;  %s3859_s14 = scalar_lea.hbm %s4134_s5, 1 }
 0x128   :  { %537 = vmatpush.msra.mxu3 %v451_v4  ;;  %509 = vmatpush.msra.mxu2 %v3076_v6  ;;  %v448_v13 = vld [vmem:[%s4716_s28 + $0x20] sm:$0xff]  ;;  %v447_v15 = vld [vmem:[%s4716_s28 + $0x18] sm:$0xff]  ;;  %v3072_v16 = vld [vmem:[%s4716_s28 + $0x50] sm:$0xff]  ;;  %s4725_s29 = sld [smem:[#allocation46_spill]]  ;;  %p3860_p2 = scmp.lt.s32.totalorder %s3856_s10, %s4134_s5 }
 0x129   :  { %435 = vmatpush.msra.mxu0 %v409_v2  ;;  %475 = vmatpush.msra.mxu1 %v409_v2  ;;  %v446_v19 = vld [vmem:[%s4716_s28 + $0x10] sm:$0xff]  ;;  %v3071_v20 = vld [vmem:[%s4716_s28 + $0x48] sm:$0xff]  ;;  %v3070_v24 = vld [vmem:[%s4716_s28 + $0x40] sm:$0xff]  ;;  %s4728_s15 = sld [smem:[#allocation47_spill]]  ;;  %p3861_p3 = scmp.lt.s32.totalorder %s3859_s14, %s3857_s8 }
 0x12a   :  { %538 = vmatpush.msra.mxu3 %v450_v7  ;;  %510 = vmatpush.msra.mxu2 %v3075_v10  ;;  %v445_v21 = vld [vmem:[%s4716_s28 + $0x8] sm:$0xff]  ;;  %v444_v25 = vld [vmem:[%s4716_s28] sm:$0xff]  ;;  %v3091_v26 = vld [vmem:[%s4716_s28 + $0xb8] sm:$0xff]  ;;  %s4729_s12 = sld [smem:[#allocation49_spill]] }
 0x12b   :  { %436 = vmatpush.msra.mxu0 %v408_v5  ;;  %476 = vmatpush.msra.mxu1 %v408_v5  ;;  %v3090_v27 = vld [vmem:[%s4716_s28 + $0xb0] sm:$0xff]  ;;  %v3089_v28 = vld [vmem:[%s4716_s28 + $0xa8] sm:$0xff]  ;;  %v3088_v29 = vld [vmem:[%s4716_s28 + $0xa0] sm:$0xff]  ;;  %p3862_p4 = por %p3861_p3, %p3860_p2 }
 0x12c   :  { %3066 = vmatmul.msk.f32.vlgmr.msra.gmra.mxu0 %vm414_vm0, %v412_v8  ;;  %3068 = vmatmul.msk.f32.vlgmr.msra.gmra.mxu1 %vm414_vm0, %v453_v9  ;;  %v3087_v30 = vld [vmem:[%s4716_s28 + $0x98] sm:$0xff]  ;;  %v3086_v31 = vld [vmem:[%s4716_s28 + $0x90] sm:$0xff]  ;;  %v3085_v32 = vld [vmem:[%s4716_s28 + $0x88] sm:$0xff] }
 0x12d   :  { %573 = vmatpush.msrb.mxu0 %v411_v0  ;;  %539 = vmatpush.msra.mxu3 %v449_v11  ;;  %v3084_v33 = vld [vmem:[%s4716_s28 + $0x80] sm:$0xff]  ;;  %v637_v40 = vld [vmem:[%s4717_s16 + $0x38] sm:$0xff]  ;;  %v636_v41 = vld [vmem:[%s4717_s16 + $0x30] sm:$0xff]  ;;  %p3863_p5 = pnand %p3862_p4, %p3858_p1 }
 0x12e   :  { %511 = vmatpush.msra.mxu2 %v3074_v12  ;;  %607 = vmatpush.msrb.mxu1 %v3091_v26  ;;  %v635_v42 = vld [vmem:[%s4717_s16 + $0x28] sm:$0xff]  ;;  %v634_v43 = vld [vmem:[%s4717_s16 + $0x20] sm:$0xff]  ;;  %v633_v44 = vld [vmem:[%s4717_s16 + $0x18] sm:$0xff] }
 0x12f   :  { %574 = vmatpush.msrb.mxu0 %v410_v1  ;;  %540 = vmatpush.msra.mxu3 %v448_v13  ;;  %v632_v45 = vld [vmem:[%s4717_s16 + $0x10] sm:$0xff]  ;;  %v631_v46 = vld [vmem:[%s4717_s16 + $0x8] sm:$0xff]  ;;  %v630_v49 = vld [vmem:[%s4717_s16] sm:$0xff] }
 0x130   :  { %512 = vmatpush.msra.mxu2 %v3073_v14  ;;  %608 = vmatpush.msrb.mxu1 %v3090_v27 }
 0x131   :  { %575 = vmatpush.msrb.mxu0 %v409_v2  ;;  %541 = vmatpush.msra.mxu3 %v447_v15  ;;  %v649_v2 = vsub.f32 1.0, %v648_v62  ;;  %v3099_v62 = vld [vmem:[%s4718_s30 + $0x48] sm:$0xff] }
 0x132   :  { %513 = vmatpush.msra.mxu2 %v3072_v16  ;;  %609 = vmatpush.msrb.mxu1 %v3089_v28 }
 0x133   :  { %576 = vmatpush.msrb.mxu0 %v408_v5  ;;  %542 = vmatpush.msra.mxu3 %v446_v19  ;;  %v650_v5 = vmul.f32 %v3412_v57, %v649_v2  ;;  %v3116_v2 = vld [vmem:[%s4718_s30 + $0xb8] sm:$0xff] }
 0x134   :  { %3067 = vmatmul.msk.f32.gmra.mxu0 %vm414_vm0, %v413_v17  ;;  %3069 = vmatmul.msk.f32.gmra.mxu1 %vm414_vm0, %v454_v18 }
 0x135   :  { %514 = vmatpush.msra.mxu2 %v3071_v20  ;;  %543 = vmatpush.msra.mxu3 %v445_v21  ;;  %v651_v8 = vadd.f32 %v3412_v57, %v650_v5  ;;  %v855_v5 = vld [vmem:[#allocation7 + $0x10] sm:$0xff] }
 0x136   :  { %610 = vmatpush.msrb.mxu1 %v3088_v29 }
 0x137   :  { %515 = vmatpush.msra.mxu2 %v3070_v24  ;;  %544 = vmatpush.msra.mxu3 %v444_v25  ;;  %v4330_v11 = vsel %vm652_vm2, %v3412_v57, %v651_v8  ;;  %v3113_v8 = vld [vmem:[%s4718_s30 + $0xa0] sm:$0xff] }
 0x138   :  { %611 = vmatpush.msrb.mxu1 %v3087_v30  ;;  %v773_v30 = vld [vmem:[%s4718_s30 + $0x38] sm:$0xff] }
 0x139   :  { %666 = vmatpush.msrb.mxu2 %v637_v40  ;;  %704 = vmatpush.msrb.mxu3 %v637_v40 }
 0x13a   :  { %612 = vmatpush.msrb.mxu1 %v3086_v31  ;;  %v772_v31 = vld [vmem:[%s4718_s30 + $0x30] sm:$0xff] }
 0x13b   :  { %667 = vmatpush.msrb.mxu2 %v636_v41  ;;  %705 = vmatpush.msrb.mxu3 %v636_v41 }
 0x13c   :  { %3082 = vmatmul.msk.f32.vlgmr.msrb.gmra.mxu0 %vm414_vm0, %v553_v22  ;;  %613 = vmatpush.msrb.mxu1 %v3085_v32  ;;  %v771_v32 = vld [vmem:[%s4718_s30 + $0x28] sm:$0xff] }
 0x13d   :  { %668 = vmatpush.msrb.mxu2 %v635_v42  ;;  %706 = vmatpush.msrb.mxu3 %v635_v42 }
 0x13e   :  { %614 = vmatpush.msrb.mxu1 %v3084_v33  ;;  %v770_v33 = vld [vmem:[%s4718_s30 + $0x20] sm:$0xff] }
 0x13f   :  { %669 = vmatpush.msrb.mxu2 %v634_v43  ;;  %707 = vmatpush.msrb.mxu3 %v634_v43 }
 0x141   :  { %670 = vmatpush.msrb.mxu2 %v633_v44  ;;  %708 = vmatpush.msrb.mxu3 %v633_v44 }
 0x143   :  { %671 = vmatpush.msrb.mxu2 %v632_v45  ;;  %709 = vmatpush.msrb.mxu3 %v632_v45 }
 0x144   :  { %3083 = vmatmul.msk.f32.gmra.mxu0 %vm414_vm0, %v554_v23 }
 0x145   :  { %672 = vmatpush.msrb.mxu2 %v631_v46  ;;  %710 = vmatpush.msrb.mxu3 %v631_v46  ;;  %v727_v46 = vld [vmem:[#allocation5 + $0x1] sm:$0x1] }
 0x147   :  { %673 = vmatpush.msrb.mxu2 %v630_v49  ;;  %711 = vmatpush.msrb.mxu3 %v630_v49 }
 0x1a9   :  { %v438_v34 = vpop.f32.mrf.mxu0  ;;  %v478_v35 = vpop.f32.mrf.mxu1 }
 0x1aa   :  { %3078 = vmatmul.msk.f32.vlgmr.msra.gmra.mxu2 %vm493_vm1, %v478_v35  ;;  %3080 = vmatmul.msk.f32.vlgmr.msra.gmra.mxu3 %vm493_vm1, %v438_v34  ;;  %v769_v34 = vld [vmem:[%s4718_s30 + $0x18] sm:$0xff]  ;;  %v768_v35 = vld [vmem:[%s4718_s30 + $0x10] sm:$0xff] }
 0x1ab   :  { %842 = vmatpush.msra.mxu3 %v773_v30  ;;  %v3133_v30 = vld [vmem:[%s4718_s30 + $0x120] sm:$0xff] }
 0x1ad   :  { %843 = vmatpush.msra.mxu3 %v772_v31  ;;  %v3132_v31 = vld [vmem:[%s4718_s30 + $0x118] sm:$0xff] }
 0x1af   :  { %844 = vmatpush.msra.mxu3 %v771_v32  ;;  %v3131_v32 = vld [vmem:[%s4718_s30 + $0x110] sm:$0xff] }
 0x1b1   :  { %v441_v36 = vpop.f32.mrf.mxu0  ;;  %v481_v37 = vpop.f32.mrf.mxu1  ;;  %845 = vmatpush.msra.mxu3 %v770_v33  ;;  %v3130_v33 = vld [vmem:[%s4718_s30 + $0x108] sm:$0xff] }
 0x1b2   :  { %3079 = vmatmul.msk.f32.gmra.mxu2 %vm493_vm1, %v481_v37  ;;  %3081 = vmatmul.msk.f32.gmra.mxu3 %vm493_vm1, %v441_v36  ;;  %v767_v36 = vld [vmem:[%s4718_s30 + $0x8] sm:$0xff]  ;;  %v766_v37 = vld [vmem:[%s4718_s30] sm:$0xff] }
 0x1b3   :  { %846 = vmatpush.msra.mxu3 %v769_v34  ;;  %v3129_v34 = vld [vmem:[%s4718_s30 + $0x100] sm:$0xff] }
 0x1b5   :  { %847 = vmatpush.msra.mxu3 %v768_v35 }
 0x1b7   :  { %848 = vmatpush.msra.mxu3 %v767_v36 }
 0x1b9   :  { %v578_v38 = vpop.f32.mrf.mxu0  ;;  %849 = vmatpush.msra.mxu3 %v766_v37  ;;  %v1040_v37 = vld [vmem:[#allocation10 + $0x38] sm:$0xff] }
 0x1ba   :  { %3092 = vmatmul.msk.f32.vlgmr.msrb.gmra.mxu1 %vm493_vm1, %v578_v38 }
 0x1c1   :  { %v581_v39 = vpop.f32.mrf.mxu0 }
 0x1c2   :  { %3093 = vmatmul.msk.f32.gmra.mxu1 %vm493_vm1, %v581_v39 }
 0x22d   :  { %v517_v47 = vpop.f32.mrf.mxu2  ;;  %v546_v48 = vpop.f32.mrf.mxu3 }
 0x22e   :  { %v547_v52 = vadd.f32 %v546_v48, %v517_v47  ;;  %v3105_v47 = vld [vmem:[%s4718_s30 + $0x78] sm:$0xff]  ;;  %v3104_v48 = vld [vmem:[%s4718_s30 + $0x70] sm:$0xff] }
 0x22f   :  { %819 = vmatpush.msra.mxu2 %v3105_v47 }
 0x231   :  { %820 = vmatpush.msra.mxu2 %v3104_v48 }
 0x235   :  { %v520_v53 = vpop.f32.mrf.mxu2  ;;  %v549_v54 = vpop.f32.mrf.mxu3 }
 0x236   :  { %v550_v58 = vadd.f32 %v549_v54, %v520_v53  ;;  %v3400_v54 = vld [vmem:[#allocation5 + $0x2] ss:$0 sm:$0xff] }
 0x237   :  { %v616_v50 = vpop.f32.mrf.mxu1 }
 0x238   :  { %v622_v55 = vadd.f32 %v616_v50, %v547_v52  ;;  %v3103_v50 = vld [vmem:[%s4718_s30 + $0x68] sm:$0xff]  ;;  %v3102_v52 = vld [vmem:[%s4718_s30 + $0x60] sm:$0xff] }
 0x239   :  { %821 = vmatpush.msra.mxu2 %v3103_v50 }
 0x23a   :  { %v628_v60 = vadd.f32 %v3399_v56, %v622_v55  ;;  %v3101_v55 = vld [vmem:[%s4718_s30 + $0x58] sm:$0xff] }
 0x23b   :  { %822 = vmatpush.msra.mxu2 %v3102_v52 }
 0x23c   :  { %v638_v0 = vsel %vm493_vm1, %v628_v60, 0.0 }
 0x23d   :  { %823 = vmatpush.msra.mxu2 %v3101_v55 }
 0x23f   :  { %v619_v59 = vpop.f32.mrf.mxu1 }
 0x240   :  { %v623_v61 = vadd.f32 %v619_v59, %v550_v58  ;;  %v3100_v58 = vld [vmem:[%s4718_s30 + $0x50] sm:$0xff] }
 0x241   :  { %824 = vmatpush.msra.mxu2 %v3100_v58 }
 0x242   :  { %v629_v63 = vadd.f32 %v3399_v56, %v623_v61 }
 0x243   :  { %825 = vmatpush.msra.mxu2 %v3099_v62 }
 0x244   :  { %v639_v1 = vsel %vm493_vm1, %v629_v63, 0.0 }
 0x245   :  { %v640_v3 = vadd.f32 %v639_v1, %v638_v0  ;;  %v741_v0 = vld [vmem:[#allocation7] sm:$0xff]  ;;  %v775_v1 = vld [vmem:[#allocation7 + $0x8] sm:$0xff] }
 0x247   :  { %v641_v4 = vrot.slane %v640_v3, 4 }
 0x249   :  { %v642_v6 = vadd.f32 %v641_v4, %v640_v3  ;;  %v3115_v3 = vld [vmem:[%s4718_s30 + $0xb0] sm:$0xff]  ;;  %v3114_v4 = vld [vmem:[%s4718_s30 + $0xa8] sm:$0xff] }
 0x24b   :  { %v643_v7 = vrot.slane %v642_v6, 2 }
 0x24d   :  { %v644_v9 = vadd.f32 %v643_v7, %v642_v6  ;;  %v913_v6 = vld [vmem:[#allocation7 + $0x18] sm:$0xff]  ;;  %v3098_v7 = vld [vmem:[%s4718_s30 + $0x40] sm:$0xff] }
 0x24e   :  { %826 = vmatpush.msra.mxu2 %v3098_v7 }
 0x24f   :  { %v645_v10 = vrot.slane %v644_v9, 1 }
 0x251   :  { %v646_v12 = vadd.f32 %v645_v10, %v644_v9  ;;  %v3112_v9 = vld [vmem:[%s4718_s30 + $0x98] sm:$0xff] }
 0x252   :  { %v3126_v10 = vld [vmem:[%s4718_s30 + $0xf8] sm:$0xff] }
 0x253   :  { %v654_v13 = vmul.f32 %v4330_v11, %v646_v12  ;;  %v3111_v12 = vld [vmem:[%s4718_s30 + $0x90] sm:$0xff] }
 0x255   :  { %3094 = vmatmul.msk.f32.vlgmr.msrb.gmra.mxu2 %vm493_vm1, %v654_v13  ;;  %v3125_v13 = vld [vmem:[%s4718_s30 + $0xf0] sm:$0xff] }
 0x256   :  { %957 = vmatpush.msrb.mxu2 %v3126_v10 }
 0x258   :  { %958 = vmatpush.msrb.mxu2 %v3125_v13 }
 0x2d8   :  { %v675_v14 = vpop.f32.mrf.mxu2 }
 0x2d9   :  { %v678_v15 = vperm.slane %v675_v14, 0  ;;  %v3110_v14 = vld [vmem:[%s4718_s30 + $0x88] sm:$0xff] }
 0x2db   :  { %v679_v16 = vsub.f32 %v628_v60, %v678_v15  ;;  %v680_v17 = vsub.f32 %v629_v63, %v678_v15  ;;  %v3124_v15 = vld [vmem:[%s4718_s30 + $0xe8] sm:$0xff] }
 0x2dc   :  { %959 = vmatpush.msrb.mxu2 %v3124_v15 }
 0x2dd   :  { %v681_v18 = vmul.f32 %v679_v16, %v679_v16  ;;  %v682_v19 = vmul.f32 %v680_v17, %v680_v17 }
 0x2df   :  { %v683_v20 = vsel %vm493_vm1, %v681_v18, 0.0  ;;  %v684_v21 = vsel %vm493_vm1, %v682_v19, 0.0  ;;  %v3122_v18 = vld [vmem:[%s4718_s30 + $0xd8] sm:$0xff]  ;;  %v3121_v19 = vld [vmem:[%s4718_s30 + $0xd0] sm:$0xff] }
 0x2e0   :  { %v685_v22 = vadd.f32 %v684_v21, %v683_v20  ;;  %v3120_v20 = vld [vmem:[%s4718_s30 + $0xc8] sm:$0xff]  ;;  %v3119_v21 = vld [vmem:[%s4718_s30 + $0xc0] sm:$0xff] }
 0x2e2   :  { %v686_v23 = vrot.slane %v685_v22, 4 }
 0x2e4   :  { %v687_v24 = vadd.f32 %v686_v23, %v685_v22  ;;  %v3136_v22 = vld [vmem:[%s4718_s30 + $0x138] sm:$0xff]  ;;  %v3135_v23 = vld [vmem:[%s4718_s30 + $0x130] sm:$0xff] }
 0x2e6   :  { %v688_v25 = vrot.slane %v687_v24, 2 }
 0x2e8   :  { %v689_v26 = vadd.f32 %v688_v25, %v687_v24  ;;  %v3134_v24 = vld [vmem:[%s4718_s30 + $0x128] sm:$0xff] }
 0x2ea   :  { %v690_v27 = vrot.slane %v689_v26, 1 }
 0x2ec   :  { %v691_v28 = vadd.f32 %v690_v27, %v689_v26  ;;  %v971_v27 = vld [vmem:[#allocation7 + $0x20] sm:$0xff] }
 0x2ee   :  { %v692_v29 = vmul.f32 %v691_v28, %v4330_v11 }
 0x2f0   :  { %3095 = vmatmul.msk.f32.vlgmr.msrb.gmra.mxu3 %vm493_vm1, %v692_v29 }
 0x373   :  { %v713_v38 = vpop.f32.mrf.mxu3 }
 0x374   :  { %v714_v39 = vadd.f32 1e-05, %v713_v38  ;;  %v1039_v38 = vld [vmem:[#allocation10 + $0x30] sm:$0xff] }
 0x376   :  { %3413 = vrsqrt.f32 %v714_v39  ;;  %vm722_vm4 = vweird.f32 %v714_v39 }
 0x37c   :  { %v3414_v40 = vpop.eup %3413 }
 0x37d   :  { %v717_v41 = vmul.f32 %v3414_v40, %v714_v39  ;;  %vm723_vm3 = vweird.f32 %v3414_v40  ;;  %v1038_v39 = vld [vmem:[#allocation10 + $0x28] sm:$0xff] }
 0x37e   :  { %vm724_vm5 = vmor %vm722_vm4, %vm723_vm3 }
 0x37f   :  { %v718_v42 = vmul.f32 %v3414_v40, %v717_v41  ;;  %v1036_v41 = vld [vmem:[#allocation10 + $0x18] sm:$0xff] }
 0x381   :  { %v719_v43 = vmul.f32 0.5, %v718_v42  ;;  %v1035_v42 = vld [vmem:[#allocation10 + $0x10] sm:$0xff] }
 0x383   :  { %v720_v44 = vsub.f32 1.5, %v719_v43  ;;  %v1034_v43 = vld [vmem:[#allocation10 + $0x8] sm:$0xff] }
 0x385   :  { %v721_v45 = vmul.f32 %v3414_v40, %v720_v44  ;;  %v1033_v44 = vld [vmem:[#allocation10] sm:$0xff] }
 0x387   :  { %v725_v49 = vsel %vm724_vm5, %v3414_v40, %v721_v45  ;;  %v1037_v40 = vld [vmem:[#allocation10 + $0x20] sm:$0xff] }
 0x388   :  { %v728_v51 = vmul.f32 %v727_v46, %v725_v49  ;;  %v3946_v46 = vmov 8.0  }
 0x389   :  { %3415 = vrcp.f32 %v3946_v46  ;;  %v1165_v46 = vld [vmem:[%s4719_s26 + $0x28] sm:$0xff] }
 0x38a   :  { %v729_v53 = vperm.slane %v728_v51, 0 }
 0x38c   :  { %v730_v56 = vmul.f32 %v729_v53, %v679_v16  ;;  %v731_v57 = vmul.f32 %v729_v53, %v680_v17  ;;  %v3109_v16 = vld [vmem:[%s4718_s30 + $0x80] sm:$0xff]  ;;  %v3401_v53 = vld [vmem:[#allocation8] ss:$0 sm:$0xff] }
 0x38d   :  { %v3123_v17 = vld [vmem:[%s4718_s30 + $0xe0] sm:$0xff] }
 0x38e   :  { %v738_v59 = vadd.f32 %v3400_v54, %v731_v57  ;;  %v737_v60 = vadd.f32 %v3400_v54, %v730_v56  ;;  %960 = vmatpush.msrb.mxu2 %v3123_v17 }
 0x38f   :  { %v3416_v49 = vpop.eup %3415 }
 0x390   :  { %v740_v61 = vmax.f32 %v738_v59, 0.0  ;;  %v739_v63 = vmax.f32 %v737_v60, 0.0  ;;  %961 = vmatpush.msrb.mxu2 %v3122_v18  ;;  %v1049_v54 = vmul.f32 8.0, %v3416_v49  ;;  %vm1053_vm7 = vweird.f32 %v3416_v49 }
 0x392   :  { %760 = vmatpush.msra.mxu0 %v740_v61  ;;  %793 = vmatpush.msra.mxu1 %v740_v61  ;;  %v1050_v58 = vsub.f32 1.0, %v1049_v54  ;;  %v3157_v54 = vld [vmem:[%s4719_s26 + $0xa0] sm:$0xff] }
 0x393   :  { %989 = vmatpush.msrb.mxu3 %v740_v61  ;;  %962 = vmatpush.msrb.mxu2 %v3121_v19 }
 0x394   :  { %761 = vmatpush.msra.mxu0 %v739_v63  ;;  %794 = vmatpush.msra.mxu1 %v739_v63 }
 0x395   :  { %990 = vmatpush.msrb.mxu3 %v739_v63  ;;  %3096 = vmatmul.msk.f32.vlgmr.msra.gmra.mxu0 %vm742_vm6, %v741_v0 }
 0x396   :  { %3097 = vmatmul.msk.f32.vlgmr.msra.gmra.mxu1 %vm742_vm6, %v775_v1  ;;  %873 = vmatpush.msrb.mxu0 %v740_v61 }
 0x397   :  { %899 = vmatpush.msrb.mxu1 %v3116_v2  ;;  %963 = vmatpush.msrb.mxu2 %v3120_v20 }
 0x398   :  { %874 = vmatpush.msrb.mxu0 %v739_v63 }
 0x399   :  { %900 = vmatpush.msrb.mxu1 %v3115_v3  ;;  %964 = vmatpush.msrb.mxu2 %v3119_v21  ;;  %v3149_v21 = vld [vmem:[%s4719_s26 + $0x78] sm:$0xff] }
 0x39a   :  { %931 = vmatpush.msra.mxu0 %v740_v61  ;;  %v1051_v61 = vmul.f32 %v3416_v49, %v1050_v58  ;;  %v3155_v58 = vld [vmem:[%s4719_s26 + $0x90] sm:$0xff] }
 0x39b   :  { %901 = vmatpush.msrb.mxu1 %v3114_v4 }
 0x39c   :  { %932 = vmatpush.msra.mxu0 %v739_v63  ;;  %v1052_v0 = vadd.f32 %v3416_v49, %v1051_v61  ;;  %v3153_v61 = vld [vmem:[%s4719_s26 + $0x80] sm:$0xff] }
 0x39d   :  { %3108 = vmatmul.msk.f32.vlgmr.msrb.gmra.mxu0 %vm742_vm6, %v855_v5  ;;  %902 = vmatpush.msrb.mxu1 %v3113_v8 }
 0x39e   :  { %1015 = vmatpush.msrb.mxu0 %v3136_v22  ;;  %v4389_v3 = vsel %vm1053_vm7, %v3416_v49, %v1052_v0  ;;  %v3148_v22 = vld [vmem:[%s4719_s26 + $0x70] sm:$0xff]  ;;  %v1163_v49 = vld [vmem:[%s4719_s26 + $0x18] sm:$0xff]  ;;  %vm1654_vm7 = vcmask 122880  }
 0x39f   :  { %903 = vmatpush.msrb.mxu1 %v3112_v9 }
 0x3a0   :  { %1016 = vmatpush.msrb.mxu0 %v3135_v23 }
 0x3a1   :  { %904 = vmatpush.msrb.mxu1 %v3111_v12 }
 0x3a2   :  { %1017 = vmatpush.msrb.mxu0 %v3134_v24 }
 0x3a3   :  { %905 = vmatpush.msrb.mxu1 %v3110_v14 }
 0x3a4   :  { %1018 = vmatpush.msrb.mxu0 %v3133_v30 }
 0x3a5   :  { %3118 = vmatmul.msk.f32.vlgmr.msra.gmra.mxu0 %vm742_vm6, %v913_v6  ;;  %906 = vmatpush.msrb.mxu1 %v3109_v16 }
 0x3a6   :  { %1019 = vmatpush.msrb.mxu0 %v3132_v31  ;;  %v1124_v31 = vld [vmem:[#allocation8 + $0x1] sm:$0x1] }
 0x3a7   :  { %1067 = vmatpush.msra.mxu1 %v1040_v37 }
 0x3a8   :  { %1020 = vmatpush.msrb.mxu0 %v3131_v32 }
 0x3a9   :  { %1068 = vmatpush.msra.mxu1 %v1039_v38 }
 0x3aa   :  { %1021 = vmatpush.msrb.mxu0 %v3130_v33 }
 0x3ab   :  { %1069 = vmatpush.msra.mxu1 %v1038_v39 }
 0x3ac   :  { %1022 = vmatpush.msrb.mxu0 %v3129_v34 }
 0x3ad   :  { %1070 = vmatpush.msra.mxu1 %v1037_v40 }
 0x3af   :  { %1071 = vmatpush.msra.mxu1 %v1036_v41 }
 0x3b1   :  { %1072 = vmatpush.msra.mxu1 %v1035_v42 }
 0x3b3   :  { %1073 = vmatpush.msra.mxu1 %v1034_v43 }
 0x3b5   :  { %1074 = vmatpush.msra.mxu1 %v1033_v44 }
 0x412   :  { %v763_v25 = vpop.f32.mrf.mxu0 }
 0x413   :  { %v796_v26 = vpop.f32.mrf.mxu1  ;;  %3107 = vmatmul.msk.f32.vlgmr.msra.gmra.mxu3 %vm493_vm1, %v763_v25  ;;  %v3147_v25 = vld [vmem:[%s4719_s26 + $0x68] sm:$0xff] }
 0x414   :  { %3106 = vmatmul.msk.f32.vlgmr.msra.gmra.mxu2 %vm493_vm1, %v796_v26  ;;  %1101 = vmatpush.msra.mxu3 %v1040_v37 }
 0x416   :  { %1102 = vmatpush.msra.mxu3 %v1039_v38 }
 0x418   :  { %1103 = vmatpush.msra.mxu3 %v1038_v39  ;;  %v1135_v39 = vld [vmem:[#allocation11] sm:$0xf] }
 0x41a   :  { %v876_v28 = vpop.f32.mrf.mxu0  ;;  %1104 = vmatpush.msra.mxu3 %v1037_v40  ;;  %v1249_v40 = vld [vmem:[#allocation11 + $0x8] sm:$0xf] }
 0x41b   :  { %3117 = vmatmul.msk.f32.vlgmr.msrb.gmra.mxu1 %vm493_vm1, %v876_v28  ;;  %3128 = vmatmul.msk.f32.vlgmr.msrb.gmra.mxu3 %vm742_vm6, %v971_v27  ;;  %v3146_v27 = vld [vmem:[%s4719_s26 + $0x60] sm:$0xff] }
 0x41c   :  { %1105 = vmatpush.msra.mxu3 %v1036_v41  ;;  %1213 = vmatpush.msrb.mxu1 %v3149_v21  ;;  %v1169_v41 = vld [vmem:[#allocation11 + $0x4] sm:$0xf] }
 0x41e   :  { %1106 = vmatpush.msra.mxu3 %v1035_v42  ;;  %1214 = vmatpush.msrb.mxu1 %v3148_v22  ;;  %v1167_v42 = vld [vmem:[%s4719_s26 + $0x38] sm:$0xff] }
 0x420   :  { %1107 = vmatpush.msra.mxu3 %v1034_v43  ;;  %1215 = vmatpush.msrb.mxu1 %v3147_v25  ;;  %v3160_v43 = vld [vmem:[%s4719_s26 + $0xb8] sm:$0xff] }
 0x422   :  { %v934_v29 = vpop.f32.mrf.mxu0  ;;  %1108 = vmatpush.msra.mxu3 %v1033_v44  ;;  %1216 = vmatpush.msrb.mxu1 %v3146_v27  ;;  %v1166_v44 = vld [vmem:[%s4719_s26 + $0x30] sm:$0xff] }
 0x423   :  { %3127 = vmatmul.msk.f32.vlgmr.msrb.gmra.mxu2 %vm493_vm1, %v934_v29 }
 0x496   :  { %v851_v35 = vpop.f32.mrf.mxu3 }
 0x497   :  { %v828_v45 = vpop.f32.mrf.mxu2 }
 0x498   :  { %v852_v47 = vadd.f32 %v851_v35, %v828_v45  ;;  %v908_v48 = vpop.f32.mrf.mxu1  ;;  %v3402_v35 = vld [vmem:[#allocation8 + $0x2] ss:$0 sm:$0xff]  ;;  %v3159_v45 = vld [vmem:[%s4719_s26 + $0xb0] sm:$0xff] }
 0x49a   :  { %v911_v51 = vadd.f32 %v908_v48, %v852_v47  ;;  %v3158_v47 = vld [vmem:[%s4719_s26 + $0xa8] sm:$0xff]  ;;  %v1164_v48 = vld [vmem:[%s4719_s26 + $0x20] sm:$0xff] }
 0x49e   :  { %v992_v36 = vpop.f32.mrf.mxu3 }
 0x49f   :  { %3137 = vmatmul.msk.f32.vlgmr.msrb.gmra.mxu0 %vm493_vm1, %v992_v36 }
 0x4a6   :  { %v966_v50 = vpop.f32.mrf.mxu2 }
 0x4a7   :  { %v969_v52 = vadd.f32 %v966_v50, %v911_v51  ;;  %v1162_v50 = vld [vmem:[%s4719_s26 + $0x10] sm:$0xff]  ;;  %v1161_v51 = vld [vmem:[%s4719_s26 + $0x8] sm:$0xff] }
 0x51c   :  { %v1024_v55 = vpop.f32.mrf.mxu0 }
 0x51d   :  { %v1027_v56 = vadd.f32 %v1024_v55, %v969_v52  ;;  %v3145_v52 = vld [vmem:[%s4719_s26 + $0x58] sm:$0xff]  ;;  %v3144_v55 = vld [vmem:[%s4719_s26 + $0x50] sm:$0xff] }
 0x51e   :  { %1217 = vmatpush.msrb.mxu1 %v3145_v52  ;;  %v1436_v52 = vld [vmem:[%s4720_s20 + $0x38] sm:$0xff] }
 0x51f   :  { %v1032_v57 = vadd.f32 %v3401_v53, %v1027_v56  ;;  %v1160_v53 = vld [vmem:[%s4719_s26] sm:$0xff]  ;;  %v3156_v56 = vld [vmem:[%s4719_s26 + $0x98] sm:$0xff] }
 0x520   :  { %1218 = vmatpush.msrb.mxu1 %v3144_v55 }
 0x521   :  { %v1041_v59 = vsel %vm493_vm1, %v1032_v57, 0.0 }
 0x522   :  { %v1042_v60 = vrot.slane %v1041_v59, 4 }
 0x524   :  { %v1043_v62 = vadd.f32 %v1042_v60, %v1041_v59  ;;  %v3142_v59 = vld [vmem:[%s4719_s26 + $0x40] sm:$0xff]  ;;  %v3154_v60 = vld [vmem:[%s4719_s26 + $0x88] sm:$0xff] }
 0x526   :  { %v1044_v63 = vrot.slane %v1043_v62, 2 }
 0x528   :  { %v1045_v1 = vadd.f32 %v1044_v63, %v1043_v62 }
 0x52a   :  { %v1046_v2 = vrot.slane %v1045_v1, 1 }
 0x52c   :  { %v1047_v4 = vadd.f32 %v1046_v2, %v1045_v1  ;;  %v1318_v1 = vld [vmem:[#allocation14 + $0x38] sm:$0xff]  ;;  %v1317_v2 = vld [vmem:[#allocation14 + $0x30] sm:$0xff] }
 0x52e   :  { %v1055_v5 = vmul.f32 %v4389_v3, %v1047_v4  ;;  %v1316_v4 = vld [vmem:[#allocation14 + $0x28] sm:$0xff] }
 0x530   :  { %3138 = vmatmul.msk.f32.vlgmr.msra.gmra.mxu1 %vm493_vm1, %v1055_v5  ;;  %v1315_v5 = vld [vmem:[#allocation14 + $0x20] sm:$0xff] }
 0x5ad   :  { %v1076_v6 = vpop.f32.mrf.mxu1 }
 0x5ae   :  { %v1079_v7 = vperm.slane %v1076_v6, 0  ;;  %v1314_v6 = vld [vmem:[#allocation14 + $0x18] sm:$0xff] }
 0x5b0   :  { %v1080_v8 = vsub.f32 %v1032_v57, %v1079_v7  ;;  %v3143_v57 = vld [vmem:[%s4719_s26 + $0x48] sm:$0xff]  ;;  %v1313_v7 = vld [vmem:[#allocation14 + $0x10] sm:$0xff] }
 0x5b1   :  { %1219 = vmatpush.msrb.mxu1 %v3143_v57 }
 0x5b2   :  { %v1081_v9 = vmul.f32 %v1080_v8, %v1080_v8 }
 0x5b3   :  { %1220 = vmatpush.msrb.mxu1 %v3142_v59  ;;  %v3172_v59 = vld [vmem:[%s4720_s20 + $0x70] sm:$0xff] }
 0x5b4   :  { %v1082_v10 = vsel %vm493_vm1, %v1081_v9, 0.0  ;;  %v1311_v9 = vld [vmem:[#allocation14] sm:$0xff] }
 0x5b5   :  { %v1083_v12 = vrot.slane %v1082_v10, 4  ;;  %1380 = vmatpush.msra.mxu1 %v1318_v1 }
 0x5b7   :  { %v1084_v13 = vadd.f32 %v1083_v12, %v1082_v10  ;;  %1381 = vmatpush.msra.mxu1 %v1317_v2  ;;  %v3947_v10 = vmov 4.0  }
 0x5b9   :  { %v1085_v14 = vrot.slane %v1084_v13, 2  ;;  %1382 = vmatpush.msra.mxu1 %v1316_v4 }
 0x5bb   :  { %v1086_v15 = vadd.f32 %v1085_v14, %v1084_v13  ;;  %1383 = vmatpush.msra.mxu1 %v1315_v5 }
 0x5bd   :  { %v1087_v16 = vrot.slane %v1086_v15, 1  ;;  %1384 = vmatpush.msra.mxu1 %v1314_v6 }
 0x5bf   :  { %v1088_v17 = vadd.f32 %v1087_v16, %v1086_v15  ;;  %1385 = vmatpush.msra.mxu1 %v1313_v7 }
 0x5c1   :  { %v1089_v18 = vmul.f32 %v1088_v17, %v4389_v3  ;;  %v3403_v17 = vld [vmem:[#allocation13] ss:$0 sm:$0xff] }
 0x5c3   :  { %3139 = vmatmul.msk.f32.vlgmr.msra.gmra.mxu3 %vm493_vm1, %v1089_v18 }
 0x646   :  { %v1110_v19 = vpop.f32.mrf.mxu3 }
 0x647   :  { %v1111_v20 = vadd.f32 1e-05, %v1110_v19 }
 0x649   :  { %3417 = vrsqrt.f32 %v1111_v20  ;;  %vm1119_vm9 = vweird.f32 %v1111_v20 }
 0x64a   :  { %3419 = vrcp.f32 %v3947_v10  ;;  %v3189_v10 = vld [vmem:[%s4720_s20 + $0xd8] sm:$0xff] }
 0x64f   :  { %v3418_v23 = vpop.eup %3417 }
 0x650   :  { %v1114_v24 = vmul.f32 %v3418_v23, %v1111_v20  ;;  %vm1120_vm8 = vweird.f32 %v3418_v23  ;;  %v3420_v12 = vpop.eup %3419 }
 0x651   :  { %vm1121_vm10 = vmor %vm1119_vm9, %vm1120_vm8  ;;  %v1328_v18 = vmul.f32 4.0, %v3420_v12  ;;  %vm1332_vm13 = vweird.f32 %v3420_v12  ;;  %vm1833_vm9 = vcmask 31744  }
 0x652   :  { %v1115_v26 = vmul.f32 %v3418_v23, %v1114_v24 }
 0x653   :  { %v1329_v21 = vsub.f32 1.0, %v1328_v18  ;;  %v1430_v18 = vld [vmem:[%s4720_s20 + $0x8] sm:$0xff] }
 0x654   :  { %v1116_v28 = vmul.f32 0.5, %v1115_v26 }
 0x655   :  { %v1330_v24 = vmul.f32 %v3420_v12, %v1329_v21  ;;  %v3177_v21 = vld [vmem:[%s4720_s20 + $0x88] sm:$0xff] }
 0x656   :  { %v1117_v29 = vsub.f32 1.5, %v1116_v28 }
 0x657   :  { %v1331_v27 = vadd.f32 %v3420_v12, %v1330_v24  ;;  %v3166_v24 = vld [vmem:[%s4720_s20 + $0x40] sm:$0xff] }
 0x658   :  { %v1118_v30 = vmul.f32 %v3418_v23, %v1117_v29 }
 0x65a   :  { %v1122_v32 = vsel %vm1121_vm10, %v3418_v23, %v1118_v30  ;;  %v1333_v30 = vsel %vm1332_vm13, %v3420_v12, %v1331_v27 }
 0x65b   :  { %v1125_v33 = vmul.f32 %v1124_v31, %v1122_v32 }
 0x65d   :  { %v1126_v34 = vperm.slane %v1125_v33, 0  ;;  %v1415_v33 = vld [vmem:[%s4124_s4] sm:$0xf] }
 0x65f   :  { %v1127_v36 = vmul.f32 %v1126_v34, %v1080_v8  ;;  %v1312_v8 = vld [vmem:[#allocation14 + $0x8] sm:$0xff]  ;;  %v3165_v34 = vld [vmem:[%s4124_s4 + $0x4] sm:$0xf] }
 0x660   :  { %1386 = vmatpush.msra.mxu1 %v1312_v8 }
 0x661   :  { %v1133_v37 = vadd.f32 %v3402_v35, %v1127_v36  ;;  %v3948_v35 = vmov 0   ;;  %v3175_v36 = vld [vmem:[%s4124_s4 + $0x8] sm:$0xf] }
 0x662   :  { %1387 = vmatpush.msra.mxu1 %v1311_v9  ;;  %3396 = vset.pattern.permute.xlu0 %v3948_v35 }
 0x663   :  { %v1134_v38 = vmax.f32 %v1133_v37, 0.0  ;;  %3397 = vset.pattern.permute.xlu1 %v3948_v35  ;;  %1418 = vperm.xlu0 %3396, %v1415_v33   ;;  %v3185_v37 = vld [vmem:[%s4124_s4 + $0xc] sm:$0xf] }
 0x664   :  { %1465 = vperm.xlu1 %3397, %v3165_v34   ;;  %3398 = vset.pattern.permute.xlu2 %v3948_v35 }
 0x665   :  { %1155 = vmatpush.msra.mxu2 %v1134_v38  ;;  %1188 = vmatpush.msra.mxu0 %v1134_v38 }
 0x666   :  { %1268 = vmatpush.msrb.mxu3 %v1134_v38  ;;  %3140 = vmatmul.msk.f32.vlgmr.msra.gmra.mxu2 %vm1136_vm11, %v1135_v39 }
 0x667   :  { %3152 = vmatmul.msk.f32.vlgmr.msrb.gmra.mxu3 %vm1136_vm11, %v1249_v40  ;;  %3141 = vmatmul.msk.f32.vlgmr.msra.gmra.mxu0 %vm1136_vm11, %v1169_v41 }
 0x668   :  { %1236 = vmatpush.msrb.mxu2 %v1167_v42  ;;  %1293 = vmatpush.msrb.mxu0 %v3160_v43  ;;  %v3203_v42 = vld [vmem:[%s4124_s4 + $0x8] sm:$0xf]  ;;  %v3206_v43 = vld [vmem:[%s4124_s4 + $0xc] sm:$0xf] }
 0x669   :  { %1346 = vmatpush.msra.mxu3 %v1318_v1  ;;  %v3191_v1 = vld [vmem:[%s4720_s20 + $0xe8] sm:$0xff] }
 0x66a   :  { %1237 = vmatpush.msrb.mxu2 %v1166_v44  ;;  %1294 = vmatpush.msrb.mxu0 %v3159_v45 }
 0x66b   :  { %1347 = vmatpush.msra.mxu3 %v1317_v2  ;;  %1513 = vperm.xlu0 %3396, %v3175_v36   ;;  %v1433_v2 = vld [vmem:[%s4720_s20 + $0x20] sm:$0xff]  ;;  %v3404_v36 = vld [vmem:[#allocation13 + $0x2] ss:$0 sm:$0xff] }
 0x66c   :  { %1238 = vmatpush.msrb.mxu2 %v1165_v46  ;;  %1295 = vmatpush.msrb.mxu0 %v3158_v47 }
 0x66d   :  { %1348 = vmatpush.msra.mxu3 %v1316_v4  ;;  %1561 = vperm.xlu1 %3397, %v3185_v37   ;;  %v3170_v4 = vld [vmem:[%s4720_s20 + $0x60] sm:$0xff] }
 0x66e   :  { %1239 = vmatpush.msrb.mxu2 %v1164_v48  ;;  %1296 = vmatpush.msrb.mxu0 %v3157_v54  ;;  %v3183_v54 = vld [vmem:[%s4720_s20 + $0xb8] sm:$0xff] }
 0x66f   :  { %1349 = vmatpush.msra.mxu3 %v1315_v5  ;;  %v3180_v5 = vld [vmem:[%s4720_s20 + $0xa0] sm:$0xff] }
 0x670   :  { %1240 = vmatpush.msrb.mxu2 %v1163_v49  ;;  %1297 = vmatpush.msrb.mxu0 %v3156_v56  ;;  %v3193_v56 = vld [vmem:[%s4720_s20 + $0xf8] sm:$0xff] }
 0x671   :  { %1350 = vmatpush.msra.mxu3 %v1314_v6  ;;  %v3190_v6 = vld [vmem:[%s4720_s20 + $0xe0] sm:$0xff] }
 0x672   :  { %1241 = vmatpush.msrb.mxu2 %v1162_v50  ;;  %1298 = vmatpush.msrb.mxu0 %v3155_v58  ;;  %v1435_v58 = vld [vmem:[%s4720_s20 + $0x30] sm:$0xff] }
 0x673   :  { %1351 = vmatpush.msra.mxu3 %v1313_v7  ;;  %1789 = vperm.xlu0 %3396, %v3203_v42   ;;  %v1432_v7 = vld [vmem:[%s4720_s20 + $0x18] sm:$0xff] }
 0x674   :  { %1242 = vmatpush.msrb.mxu2 %v1161_v51  ;;  %1299 = vmatpush.msrb.mxu0 %v3154_v60  ;;  %v3182_v60 = vld [vmem:[%s4720_s20 + $0xb0] sm:$0xff] }
 0x675   :  { %1352 = vmatpush.msra.mxu3 %v1312_v8  ;;  %1826 = vperm.xlu1 %3397, %v3206_v43   ;;  %v3169_v8 = vld [vmem:[%s4720_s20 + $0x58] sm:$0xff] }
 0x676   :  { %1243 = vmatpush.msrb.mxu2 %v1160_v53  ;;  %1300 = vmatpush.msrb.mxu0 %v3153_v61  ;;  %v3173_v53 = vld [vmem:[%s4720_s20 + $0x78] sm:$0xff]  ;;  %v3192_v61 = vld [vmem:[%s4720_s20 + $0xf0] sm:$0xff] }
 0x677   :  { %1353 = vmatpush.msra.mxu3 %v1311_v9  ;;  %v3179_v9 = vld [vmem:[%s4720_s20 + $0x98] sm:$0xff] }
 0x678   :  { %1448 = vmatpush.msra.mxu2 %v1436_v52  ;;  %1496 = vmatpush.msra.mxu0 %v3173_v53 }
 0x679   :  { %1544 = vmatpush.msrb.mxu3 %v3183_v54 }
 0x67a   :  { %1449 = vmatpush.msra.mxu2 %v1435_v58  ;;  %1497 = vmatpush.msra.mxu0 %v3172_v59 }
 0x67b   :  { %1545 = vmatpush.msrb.mxu3 %v3182_v60 }
 0x6d6   :  { %v1466_v33 = vpop.permute.xlu1 %1465 }
 0x6df   :  { %v1562_v42 = vpop.permute.xlu1 %1561 }
 0x6e4   :  { %v1190_v62 = vpop.f32.mrf.mxu0 }
 0x6e5   :  { %3150 = vmatmul.msk.f32.vlgmr.msrb.gmra.mxu1 %vm493_vm1, %v1190_v62  ;;  %v1434_v62 = vld [vmem:[%s4720_s20 + $0x28] sm:$0xff] }
 0x6e6   :  { %1592 = vmatpush.msrb.mxu1 %v3193_v56  ;;  %1450 = vmatpush.msra.mxu2 %v1434_v62 }
 0x6e8   :  { %1593 = vmatpush.msrb.mxu1 %v3192_v61  ;;  %1451 = vmatpush.msra.mxu2 %v1433_v2 }
 0x6e9   :  { %v1157_v63 = vpop.f32.mrf.mxu2 }
 0x6ea   :  { %3151 = vmatmul.msk.f32.vlgmr.msrb.gmra.mxu2 %vm493_vm1, %v1157_v63  ;;  %v1270_v0 = vpop.f32.mrf.mxu3  ;;  %v3171_v63 = vld [vmem:[%s4720_s20 + $0x68] sm:$0xff]  ;;  %1594 = vmatpush.msrb.mxu1 %v3191_v1 }
 0x6eb   :  { %3161 = vmatmul.msk.f32.vlgmr.msrb.gmra.mxu0 %vm493_vm1, %v1270_v0  ;;  %v3181_v0 = vld [vmem:[%s4720_s20 + $0xa8] sm:$0xff]  ;;  %1452 = vmatpush.msra.mxu2 %v1432_v7 }
 0x6ec   :  { %1498 = vmatpush.msra.mxu0 %v3171_v63  ;;  %1546 = vmatpush.msrb.mxu3 %v3181_v0 }
 0x6ed   :  { %1595 = vmatpush.msrb.mxu1 %v3190_v6 }
 0x6ee   :  { %1499 = vmatpush.msra.mxu0 %v3170_v4  ;;  %1547 = vmatpush.msrb.mxu3 %v3180_v5 }
 0x6ef   :  { %1596 = vmatpush.msrb.mxu1 %v3189_v10 }
 0x6f0   :  { %1500 = vmatpush.msra.mxu0 %v3169_v8  ;;  %1548 = vmatpush.msrb.mxu3 %v3179_v9 }
 0x762   :  { %v1222_v13 = vpop.f32.mrf.mxu1 }
 0x768   :  { %v1302_v15 = vpop.f32.mrf.mxu0 }
 0x76d   :  { %v1245_v14 = vpop.f32.mrf.mxu2 }
 0x76e   :  { %v1246_v16 = vadd.f32 %v1245_v14, %v1222_v13  ;;  %v1431_v13 = vld [vmem:[%s4720_s20 + $0x10] sm:$0xff] }
 0x76f   :  { %v3168_v14 = vld [vmem:[%s4720_s20 + $0x50] sm:$0xff]  ;;  %1453 = vmatpush.msra.mxu2 %v1431_v13 }
 0x770   :  { %v1305_v19 = vadd.f32 %v1302_v15, %v1246_v16  ;;  %v3178_v15 = vld [vmem:[%s4720_s20 + $0x90] sm:$0xff]  ;;  %1501 = vmatpush.msra.mxu0 %v3168_v14  ;;  %v1607_v14 = vld [vmem:[%s4721_s3 + $0x8] sm:$0xff] }
 0x771   :  { %1549 = vmatpush.msrb.mxu3 %v3178_v15  ;;  %1454 = vmatpush.msra.mxu2 %v1430_v18  ;;  %v1608_v13 = vld [vmem:[%s4721_s3 + $0x10] sm:$0xff]  ;;  %v1606_v15 = vld [vmem:[%s4721_s3] sm:$0xff] }
 0x772   :  { %v1310_v20 = vadd.f32 %v3403_v17, %v1305_v19  ;;  %v3188_v17 = vld [vmem:[%s4720_s20 + $0xd0] sm:$0xff]  ;;  %v3167_v19 = vld [vmem:[%s4720_s20 + $0x48] sm:$0xff] }
 0x773   :  { %1597 = vmatpush.msrb.mxu1 %v3188_v17  ;;  %1502 = vmatpush.msra.mxu0 %v3167_v19 }
 0x774   :  { %v1320_v22 = vsel %vm1319_vm12, %v1310_v20, 0.0  ;;  %1550 = vmatpush.msrb.mxu3 %v3177_v21 }
 0x775   :  { %v1321_v23 = vrot.slane %v1320_v22, 4  ;;  %1503 = vmatpush.msra.mxu0 %v3166_v24 }
 0x777   :  { %v1322_v25 = vadd.f32 %v1321_v23, %v1320_v22  ;;  %v3187_v22 = vld [vmem:[%s4720_s20 + $0xc8] sm:$0xff]  ;;  %v1429_v23 = vld [vmem:[%s4720_s20] sm:$0xff] }
 0x778   :  { %1598 = vmatpush.msrb.mxu1 %v3187_v22  ;;  %1455 = vmatpush.msra.mxu2 %v1429_v23 }
 0x779   :  { %v1323_v26 = vrot.slane %v1322_v25, 2 }
 0x77b   :  { %v1324_v28 = vadd.f32 %v1323_v26, %v1322_v25  ;;  %v3176_v25 = vld [vmem:[%s4720_s20 + $0x80] sm:$0xff] }
 0x77c   :  { %v3186_v26 = vld [vmem:[%s4720_s20 + $0xc0] sm:$0xff]  ;;  %1551 = vmatpush.msrb.mxu3 %v3176_v25 }
 0x77d   :  { %v1325_v29 = vrot.slane %v1324_v28, 1  ;;  %1599 = vmatpush.msrb.mxu1 %v3186_v26  ;;  %v1657_v26 = vld [vmem:[%s4722_s0 + $0x8] sm:$0xff] }
 0x77e   :  { %1676 = vmatpush.msrb.mxu0 %v1657_v26 }
 0x77f   :  { %v1326_v31 = vadd.f32 %v1325_v29, %v1324_v28 }
 0x781   :  { %v1334_v32 = vmul.f32 %v1333_v30, %v1326_v31 }
 0x783   :  { %3162 = vmatmul.msk.f32.vlgmr.msra.gmra.mxu3 %vm493_vm1, %v1334_v32  ;;  %v1419_v32 = vpop.permute.xlu0 %1418 }
 0x806   :  { %v1355_v38 = vpop.f32.mrf.mxu3 }
 0x807   :  { %v1358_v39 = vperm.slane %v1355_v38, 0 }
 0x809   :  { %v4432_v40 = vsub.f32 %v1310_v20, %v1358_v39 }
 0x80b   :  { %v1360_v41 = vmul.f32 %v4432_v40, %v4432_v40 }
 0x80d   :  { %v1361_v44 = vsel %vm1319_vm12, %v1360_v41, 0.0  ;;  %v1514_v41 = vpop.permute.xlu0 %1513 }
 0x80e   :  { %v1362_v45 = vrot.slane %v1361_v44, 4 }
 0x810   :  { %v1363_v46 = vadd.f32 %v1362_v45, %v1361_v44 }
 0x812   :  { %v1364_v47 = vrot.slane %v1363_v46, 2 }
 0x814   :  { %v1365_v48 = vadd.f32 %v1364_v47, %v1363_v46 }
 0x816   :  { %v1366_v49 = vrot.slane %v1365_v48, 1 }
 0x818   :  { %v1367_v50 = vadd.f32 %v1366_v49, %v1365_v48 }
 0x81a   :  { %v1368_v51 = vmul.f32 %v1367_v50, %v1333_v30  ;;  %v1403_v30 = vld [vmem:[#allocation13 + $0x1] sm:$0x1] }
 0x81c   :  { %3163 = vmatmul.msk.f32.vlgmr.msra.gmra.mxu1 %vm493_vm1, %v1368_v51 }
 0x899   :  { %v1389_v55 = vpop.f32.mrf.mxu1 }
 0x89a   :  { %v4444_v57 = vadd.f32 1e-05, %v1389_v55 }
 0x89c   :  { %3421 = vrsqrt.f32 %v4444_v57  ;;  %vm1398_vm15 = vweird.f32 %v4444_v57 }
 0x8a2   :  { %v3422_v12 = vpop.eup %3421 }
 0x8a3   :  { %v1393_v16 = vmul.f32 %v3422_v12, %v4444_v57  ;;  %vm1399_vm14 = vweird.f32 %v3422_v12 }
 0x8a4   :  { %vm1400_vm2 = vmor %vm1398_vm15, %vm1399_vm14 }
 0x8a5   :  { %v1394_v20 = vmul.f32 %v3422_v12, %v1393_v16  ;;  %v1414_v16 = vld [vmem:[#allocation26] sm:$0x1] }
 0x8a7   :  { %v1395_v27 = vmul.f32 0.5, %v1394_v20 }
 0x8a9   :  { %v1396_v28 = vsub.f32 1.5, %v1395_v27  ;;  %v1656_v27 = vld [vmem:[%s4722_s0] sm:$0xff] }
 0x8aa   :  { %1677 = vmatpush.msrb.mxu0 %v1656_v27  ;;  %v3214_v27 = vld [vmem:[%s4725_s29 + $0x50] sm:$0xff] }
 0x8ab   :  { %v1397_v29 = vmul.f32 %v3422_v12, %v1396_v28  ;;  %v1610_v28 = vld [vmem:[%s4723_s25] sm:$0x1] }
 0x8ad   :  { %v1401_v31 = vsel %vm1400_vm2, %v3422_v12, %v1397_v29  ;;  %v1609_v12 = vld [vmem:[%s4721_s3 + $0x18] sm:$0xff] }
 0x8ae   :  { %v1404_v34 = vmul.f32 %v1403_v30, %v1401_v31  ;;  %1626 = vmatpush.msrb.mxu2 %v1609_v12  ;;  %v1866_v12 = vld [vmem:[%s4725_s29 + $0x28] sm:$0xff] }
 0x8b0   :  { %v1405_v35 = vperm.slane %v1404_v34, 0  ;;  %1627 = vmatpush.msrb.mxu2 %v1608_v13  ;;  %v1762_v34 = vld [vmem:[#allocation28 + $0x58] sm:$0xff] }
 0x8b2   :  { %v1406_v37 = vmul.f32 %v1405_v35, %v4432_v40  ;;  %1628 = vmatpush.msrb.mxu2 %v1607_v14  ;;  %v1799_v35 = vld [vmem:[#allocation28 + $0x78] sm:$0xff] }
 0x8b3   :  { %1814 = vmatpush.msra.mxu1 %v1799_v35 }
 0x8b4   :  { %v1412_v38 = vadd.f32 %v3404_v36, %v1406_v37  ;;  %1629 = vmatpush.msrb.mxu2 %v1606_v15  ;;  %v3204_v15 = vld [vmem:[%s4119_s21 + $0x3] sm:$0x1] }
 0x8b6   :  { %v1413_v39 = vmax.f32 %v1412_v38, 0.0 }
 0x8b8   :  { %v1421_v43 = vmul.f32 %v1419_v32, %v1413_v39  ;;  %v1468_v44 = vmul.f32 %v1466_v33, %v1413_v39  ;;  %v1516_v45 = vmul.f32 %v1514_v41, %v1413_v39  ;;  %v1564_v46 = vmul.f32 %v1562_v42, %v1413_v39  ;;  %v1686_v32 = vld [vmem:[#allocation28 + $0x18] sm:$0xff] }
 0x8b9   :  { %v1725_v33 = vld [vmem:[#allocation28 + $0x38] sm:$0xff] }
 0x8ba   :  { %v1422_v47 = vsel %vm1319_vm12, %v1421_v43, 0.0  ;;  %v1469_v48 = vsel %vm1319_vm12, %v1468_v44, 0.0  ;;  %v1517_v49 = vsel %vm1319_vm12, %v1516_v45, 0.0  ;;  %v1565_v50 = vsel %vm1319_vm12, %v1564_v46, 0.0  ;;  %1740 = vmatpush.msra.mxu3 %v1725_v33  ;;  %v1862_v33 = vld [vmem:[%s4725_s29 + $0x8] sm:$0xff] }
 0x8bb   :  { %v1423_v51 = vrot.slane %v1422_v47, 4  ;;  %v1470_v52 = vrot.slane %v1469_v48, 4  ;;  %v1518_v53 = vrot.slane %v1517_v49, 4  ;;  %v1566_v40 = vrot.slane %v1565_v50, 4 }
 0x8bd   :  { %v1424_v54 = vadd.f32 %v1423_v51, %v1422_v47  ;;  %v1471_v55 = vadd.f32 %v1470_v52, %v1469_v48  ;;  %v1519_v56 = vadd.f32 %v1518_v53, %v1517_v49  ;;  %v1567_v57 = vadd.f32 %v1566_v40, %v1565_v50  ;;  %v1685_v51 = vld [vmem:[#allocation28 + $0x10] sm:$0xff] }
 0x8be   :  { %v1724_v52 = vld [vmem:[#allocation28 + $0x30] sm:$0xff] }
 0x8bf   :  { %v1425_v58 = vrot.slane %v1424_v54, 2  ;;  %v1472_v59 = vrot.slane %v1471_v55, 2  ;;  %v1520_v60 = vrot.slane %v1519_v56, 2  ;;  %v1568_v61 = vrot.slane %v1567_v57, 2  ;;  %v1761_v53 = vld [vmem:[#allocation28 + $0x50] sm:$0xff]  ;;  %1741 = vmatpush.msra.mxu3 %v1724_v52 }
 0x8c0   :  { %v1798_v40 = vld [vmem:[#allocation28 + $0x70] sm:$0xff] }
 0x8c1   :  { %v1426_v62 = vadd.f32 %v1425_v58, %v1424_v54  ;;  %v1473_v63 = vadd.f32 %v1472_v59, %v1471_v55  ;;  %v1521_v0 = vadd.f32 %v1520_v60, %v1519_v56  ;;  %v1569_v1 = vadd.f32 %v1568_v61, %v1567_v57  ;;  %1815 = vmatpush.msra.mxu1 %v1798_v40  ;;  %v1684_v54 = vld [vmem:[#allocation28 + $0x8] sm:$0xff]  ;;  %v1683_v58 = vld [vmem:[#allocation28] sm:$0xff] }
 0x8c2   :  { %v1723_v55 = vld [vmem:[#allocation28 + $0x28] sm:$0xff]  ;;  %v1722_v59 = vld [vmem:[#allocation28 + $0x20] sm:$0xff] }
 0x8c3   :  { %v1427_v2 = vrot.slane %v1426_v62, 1  ;;  %v1474_v4 = vrot.slane %v1473_v63, 1  ;;  %v1522_v5 = vrot.slane %v1521_v0, 1  ;;  %v1570_v6 = vrot.slane %v1569_v1, 1  ;;  %v1760_v56 = vld [vmem:[#allocation28 + $0x48] sm:$0xff]  ;;  %1742 = vmatpush.msra.mxu3 %v1723_v55  ;;  %v1759_v60 = vld [vmem:[#allocation28 + $0x40] sm:$0xff] }
 0x8c4   :  { %v1797_v57 = vld [vmem:[#allocation28 + $0x68] sm:$0xff]  ;;  %v1796_v61 = vld [vmem:[#allocation28 + $0x60] sm:$0xff] }
 0x8c5   :  { %v1428_v7 = vadd.f32 %v1427_v2, %v1426_v62  ;;  %v1475_v8 = vadd.f32 %v1474_v4, %v1473_v63  ;;  %v1523_v9 = vadd.f32 %v1522_v5, %v1521_v0  ;;  %v1571_v10 = vadd.f32 %v1570_v6, %v1569_v1  ;;  %1816 = vmatpush.msra.mxu1 %v1797_v57  ;;  %v1712_v62 = vld [vmem:[%s4124_s4] sm:$0xf]  ;;  %v3200_v63 = vld [vmem:[%s4124_s4 + $0x4] sm:$0xf]  ;;  %v3219_v5 = vld [vmem:[%s4725_s29 + $0x78] sm:$0xff]  ;;  %s4727_s4 = sld [smem:[#allocation48_spill]] }
 0x8c6   :  { %1743 = vmatpush.msra.mxu3 %v1722_v59  ;;  %1715 = vperm.xlu2 %3398, %v1712_v62   ;;  %v1658_v0 = vld [vmem:[%s4724_s11] sm:$0x1]  ;;  %v1868_v6 = vld [vmem:[%s4725_s29 + $0x38] sm:$0xff]  ;;  %v3230_v55 = vld [vmem:[%s4725_s29 + $0xa8] sm:$0xff] }
 0x8c7   :  { %3164 = vmatmul.msk.f32.vlgmr.msra.gmra.mxu2 %vm493_vm1, %v1428_v7  ;;  %3174 = vmatmul.msk.f32.vlgmr.msra.gmra.mxu0 %vm493_vm1, %v1475_v8  ;;  %v3218_v7 = vld [vmem:[%s4725_s29 + $0x70] sm:$0xff]  ;;  %v3232_v40 = vld [vmem:[%s4725_s29 + $0xb8] sm:$0xff]  ;;  %v3212_v57 = vld [vmem:[%s4725_s29 + $0x40] sm:$0xff] }
 0x8c8   :  { %3184 = vmatmul.msk.f32.vlgmr.msrb.gmra.mxu3 %vm493_vm1, %v1523_v9  ;;  %3194 = vmatmul.msk.f32.vlgmr.msrb.gmra.mxu1 %vm493_vm1, %v1571_v10  ;;  %v1867_v8 = vld [vmem:[%s4725_s29 + $0x30] sm:$0xff]  ;;  %v3201_v9 = vld [vmem:[%s4119_s21 + $0x2] sm:$0x1]  ;;  %v3217_v10 = vld [vmem:[%s4725_s29 + $0x68] sm:$0xff] }
 0x8c9   :  { %1703 = vmatpush.msra.mxu2 %v1686_v32  ;;  %1777 = vmatpush.msra.mxu0 %v1762_v34  ;;  %v3213_v32 = vld [vmem:[%s4725_s29 + $0x48] sm:$0xff]  ;;  %v3229_v59 = vld [vmem:[%s4725_s29 + $0xa0] sm:$0xff] }
 0x8ca   :  { %1817 = vmatpush.msra.mxu1 %v1796_v61  ;;  %v3227_v61 = vld [vmem:[%s4725_s29 + $0x90] sm:$0xff]  ;;  %v3226_v62 = vld [vmem:[%s4725_s29 + $0x88] sm:$0xff] }
 0x8cb   :  { %1704 = vmatpush.msra.mxu2 %v1685_v51  ;;  %1778 = vmatpush.msra.mxu0 %v1761_v53 }
 0x8cc   :  { %1937 = vmatpush.msrb.mxu1 %v1868_v6  ;;  %v2017_v6 = vld [vmem:[#allocation17 + $0x28] sm:$0xff] }
 0x8cd   :  { %1705 = vmatpush.msra.mxu2 %v1684_v54  ;;  %1779 = vmatpush.msra.mxu0 %v1760_v56  ;;  %v3231_v54 = vld [vmem:[%s4725_s29 + $0xb0] sm:$0xff] }
 0x8ce   :  { %1752 = vperm.xlu2 %3398, %v3200_v63   ;;  %1938 = vmatpush.msrb.mxu1 %v1867_v8  ;;  %v3225_v63 = vld [vmem:[%s4725_s29 + $0x80] sm:$0xff]  ;;  %v2015_v8 = vld [vmem:[#allocation17 + $0x18] sm:$0xff] }
 0x8cf   :  { %1706 = vmatpush.msra.mxu2 %v1683_v58  ;;  %1780 = vmatpush.msra.mxu0 %v1759_v60  ;;  %v1861_v58 = vld [vmem:[%s4725_s29] sm:$0xff]  ;;  %v3228_v60 = vld [vmem:[%s4725_s29 + $0x98] sm:$0xff] }
 0x8d0   :  { %1939 = vmatpush.msrb.mxu1 %v1866_v12  ;;  %v2012_v12 = vld [vmem:[#allocation17] sm:$0xff] }
 0x920   :  { %v1716_v14 = vpop.permute.xlu2 %1715 }
 0x944   :  { %v1505_v19 = vpop.f32.mrf.mxu0 }
 0x945   :  { %v1601_v23 = vpop.f32.mrf.mxu1 }
 0x94a   :  { %v1457_v17 = vpop.f32.mrf.mxu2 }
 0x94b   :  { %v1460_v18 = vadd.f32 %v1457_v17, %v1414_v16  ;;  %v1553_v21 = vpop.f32.mrf.mxu3  ;;  %v3216_v17 = vld [vmem:[%s4725_s29 + $0x60] sm:$0xff] }
 0x94d   :  { %v1508_v20 = vadd.f32 %v1505_v19, %v1460_v18  ;;  %v1865_v18 = vld [vmem:[%s4725_s29 + $0x20] sm:$0xff] }
 0x94e   :  { %1940 = vmatpush.msrb.mxu1 %v1865_v18 }
 0x94f   :  { %v1556_v22 = vadd.f32 %v1553_v21, %v1508_v20  ;;  %v1687_v20 = vld [vmem:[%s4119_s21] sm:$0x1]  ;;  %v3198_v21 = vld [vmem:[%s4119_s21 + $0x1] sm:$0x1]  ;;  %s4726_s21 = sld [smem:[#allocation45_spill]] }
 0x951   :  { %v1604_v24 = vadd.f32 %v1601_v23, %v1556_v22  ;;  %v3215_v22 = vld [vmem:[%s4725_s29 + $0x58] sm:$0xff] }
 0x952   :  { %v1864_v23 = vld [vmem:[%s4725_s29 + $0x18] sm:$0xff] }
 0x953   :  { %v1605_v25 = vmax.f32 %v1604_v24, 0.0  ;;  %1941 = vmatpush.msrb.mxu1 %v1864_v23 }
 0x955   :  { %3195 = vmatmul.msk.f32.vlgmr.msrb.gmra.mxu2 %vm414_vm0, %v1605_v25  ;;  %v1832_v52 = vld [vmem:[%s4726_s21] sm:$0xff]  ;;  %v3209_v53 = vld [vmem:[%s4726_s21 + $0x8] sm:$0xff]  ;;  %v3222_v56 = vld [vmem:[%s4726_s21 + $0x10] sm:$0xff] }
 0x9d8   :  { %v1631_v29 = vpop.f32.mrf.mxu2 }
 0x9d9   :  { %v1632_v30 = vadd.f32 %v1631_v29, %v1610_v28  ;;  %v1863_v28 = vld [vmem:[%s4725_s29 + $0x10] sm:$0xff] }
 0x9da   :  { %1942 = vmatpush.msrb.mxu1 %v1863_v28 }
 0x9db   :  { %v1634_v31 = vmax.f32 %v1632_v30, 0.0 }
 0x9dc   :  { %1943 = vmatpush.msrb.mxu1 %v1862_v33 }
 0x9dd   :  { %v1635_v36 = vsub.f32 0.0, %v1634_v31 }
 0x9de   :  { %1944 = vmatpush.msrb.mxu1 %v1861_v58 }
 0x9df   :  { %v1636_v37 = vmul.f32 1.442695, %v1635_v36 }
 0x9e1   :  { %3423 = vpow2.f32 %v1636_v37 }
 0x9e7   :  { %v3424_v38 = vpop.eup %3423 }
 0x9e8   :  { %v1638_v39 = vadd.f32 1.0, %v3424_v38 }
 0x9ea   :  { %3425 = vrcp.f32 %v1638_v39  ;;  %v1650_v44 = vand.u32 2147483648, %v1638_v39  ;;  %v1648_v46 = vand.u32 2147483647, %v1638_v39  ;;  %vm1644_vm4 = vweird.f32 %v1638_v39 }
 0x9ec   :  { %v1651_v48 = vor.u32 1.1754944e-38, %v1650_v44  ;;  %vm1649_vm8 = vcmp.eq.f32.partialorder %v1648_v46, 8.507059e+37 }
 0x9f0   :  { %v3426_v41 = vpop.eup %3425 }
 0x9f1   :  { %v1640_v42 = vmul.f32 %v3426_v41, %v1638_v39  ;;  %vm1645_vm3 = vweird.f32 %v3426_v41 }
 0x9f2   :  { %vm1646_vm5 = vmor %vm1644_vm4, %vm1645_vm3 }
 0x9f3   :  { %v1641_v43 = vsub.f32 1.0, %v1640_v42 }
 0x9f5   :  { %v1642_v45 = vmul.f32 %v3426_v41, %v1641_v43 }
 0x9f7   :  { %v1643_v47 = vadd.f32 %v3426_v41, %v1642_v45  ;;  %v1790_v45 = vpop.permute.xlu0 %1789 }
 0x9f9   :  { %v1647_v49 = vsel %vm1646_vm5, %v3426_v41, %v1643_v47  ;;  %v1753_v41 = vpop.permute.xlu2 %1752 }
 0x9fa   :  { %v1652_v50 = vsel %vm1649_vm8, %v1651_v48, %v1647_v49  ;;  %v1827_v48 = vpop.permute.xlu1 %1826 }
 0x9fb   :  { %3196 = vmatmul.msk.f32.vlgmr.msrb.gmra.mxu0 %vm742_vm6, %v1652_v50  ;;  %1655 = vst.msk [vmem:[#allocation29] sm:$0x1] %vm1654_vm7, %v1652_v50 }
 0x9fc   :  { %1914 = vmatpush.msrb.mxu0 %v3219_v5  ;;  %v2018_v5 = vld [vmem:[#allocation17 + $0x30] sm:$0xff] }
 0x9fe   :  { %1915 = vmatpush.msrb.mxu0 %v3218_v7  ;;  %v2016_v7 = vld [vmem:[#allocation17 + $0x20] sm:$0xff] }
 0xa00   :  { %1916 = vmatpush.msrb.mxu0 %v3217_v10  ;;  %v2013_v10 = vld [vmem:[#allocation17 + $0x8] sm:$0xff] }
 0xa02   :  { %1917 = vmatpush.msrb.mxu0 %v3216_v17 }
 0xa04   :  { %1918 = vmatpush.msrb.mxu0 %v3215_v22 }
 0xa06   :  { %1919 = vmatpush.msrb.mxu0 %v3214_v27 }
 0xa08   :  { %1920 = vmatpush.msrb.mxu0 %v3213_v32 }
 0xa0a   :  { %1921 = vmatpush.msrb.mxu0 %v3212_v57 }
 0xa78   :  { %v1679_v1 = vpop.f32.mrf.mxu0 }
 0xa79   :  { %v1680_v2 = vadd.f32 %v1679_v1, %v1658_v0 }
 0xa7b   :  { %v1682_v4 = vmax.f32 %v1680_v2, 0.0 }
 0xa7d   :  { %3197 = vmatmul.msk.f32.vlgmr.msra.gmra.mxu2 %vm414_vm0, %v1682_v4  ;;  %3199 = vmatmul.msk.f32.vlgmr.msra.gmra.mxu3 %vm414_vm0, %v1682_v4 }
 0xa7e   :  { %3202 = vmatmul.msk.f32.vlgmr.msra.gmra.mxu0 %vm414_vm0, %v1682_v4  ;;  %3205 = vmatmul.msk.f32.vlgmr.msra.gmra.mxu1 %vm414_vm0, %v1682_v4  ;;  %vm1837_vm0 = vcmask 1043456   ;;  %v2019_v4 = vld [vmem:[#allocation17 + $0x38] sm:$0xff] }
 0xa7f   :  { %2073 = vmatpush.msra.mxu0 %v2019_v4 }
 0xa81   :  { %2074 = vmatpush.msra.mxu0 %v2018_v5 }
 0xa83   :  { %2075 = vmatpush.msra.mxu0 %v2017_v6 }
 0xa85   :  { %2076 = vmatpush.msra.mxu0 %v2016_v7 }
 0xa87   :  { %2077 = vmatpush.msra.mxu0 %v2015_v8 }
 0xafb   :  { %v1782_v13 = vpop.f32.mrf.mxu0  ;;  %v1819_v16 = vpop.f32.mrf.mxu1 }
 0xafc   :  { %v1783_v19 = vadd.f32 %v3201_v9, %v1782_v13  ;;  %v1820_v24 = vadd.f32 %v3204_v15, %v1819_v16  ;;  %v2014_v9 = vld [vmem:[#allocation17 + $0x10] sm:$0xff]  ;;  %v3405_v16 = vld [vmem:[#allocation16] ss:$0 sm:$0xff] }
 0xafd   :  { %2078 = vmatpush.msra.mxu0 %v2014_v9 }
 0xafe   :  { %v1785_v29 = vmax.f32 %v1783_v19, 0.0  ;;  %v1822_v34 = vmax.f32 %v1820_v24, 0.0 }
 0xaff   :  { %2079 = vmatpush.msra.mxu0 %v2013_v10 }
 0xb00   :  { %v1708_v25 = vpop.f32.mrf.mxu2  ;;  %v1745_v26 = vpop.f32.mrf.mxu3  ;;  %v1792_v37 = vperm.slane %v1785_v29, 0  ;;  %v1829_v42 = vperm.slane %v1822_v34, 0 }
 0xb01   :  { %v1709_v30 = vadd.f32 %v1708_v25, %v1687_v20  ;;  %v1746_v31 = vadd.f32 %v3198_v21, %v1745_v26  ;;  %2080 = vmatpush.msra.mxu0 %v2012_v12 }
 0xb02   :  { %v1793_v46 = vmul.f32 %v1792_v37, %v1790_v45  ;;  %v1830_v49 = vmul.f32 %v1829_v42, %v1827_v48  ;;  %v2144_v42 = vld [vmem:[%s4727_s4 + $0x30] sm:$0xff]  ;;  %v2141_v45 = vld [vmem:[%s4727_s4 + $0x18] sm:$0xff]  ;;  %v2138_v48 = vld [vmem:[%s4727_s4] sm:$0xff] }
 0xb03   :  { %v1711_v35 = vmax.f32 %v1709_v30, 0.0  ;;  %v1748_v36 = vmax.f32 %v1746_v31, 0.0 }
 0xb05   :  { %v1718_v38 = vperm.slane %v1711_v35, 0  ;;  %v1755_v39 = vperm.slane %v1748_v36, 0 }
 0xb07   :  { %v1719_v43 = vmul.f32 %v1718_v38, %v1716_v14  ;;  %v1756_v44 = vmul.f32 %v1755_v39, %v1753_v41  ;;  %v2145_v41 = vld [vmem:[%s4727_s4 + $0x38] sm:$0xff] }
 0xb09   :  { %v1757_v47 = vadd.f32 %v1756_v44, %v1719_v43  ;;  %v2143_v43 = vld [vmem:[%s4727_s4 + $0x28] sm:$0xff]  ;;  %v2142_v44 = vld [vmem:[%s4727_s4 + $0x20] sm:$0xff] }
 0xb0b   :  { %v1794_v50 = vadd.f32 %v1793_v46, %v1757_v47  ;;  %v2140_v46 = vld [vmem:[%s4727_s4 + $0x10] sm:$0xff]  ;;  %v2139_v47 = vld [vmem:[%s4727_s4 + $0x8] sm:$0xff] }
 0xb0d   :  { %v1831_v51 = vadd.f32 %v1830_v49, %v1794_v50 }
 0xb0f   :  { %3207 = vmatpush.msk.msrb.mxu2 %vm1837_vm0, %v1831_v51  ;;  %3210 = vmatpush.msk.msrb.mxu3 %vm1837_vm0, %v1831_v51 }
 0xb10   :  { %3208 = vmatmul.msk.f32.vlgmr.msrb.gmra.mxu2 %vm1833_vm9, %v1832_v52  ;;  %3211 = vmatmul.msk.f32.vlgmr.msrb.gmra.mxu3 %vm1833_vm9, %v3209_v53 }
 0xb11   :  { %3223 = vmatpush.msk.msra.mxu2 %vm1837_vm0, %v1831_v51  ;;  %1994 = vmatpush.msra.mxu3 %v3232_v40 }
 0xb13   :  { %1995 = vmatpush.msra.mxu3 %v3231_v54  ;;  %2039 = vmatpush.msrb.mxu2 %v2019_v4  ;;  %v3249_v4 = vld [vmem:[%s4727_s4 + $0x78] sm:$0xff] }
 0xb15   :  { %1996 = vmatpush.msra.mxu3 %v3230_v55  ;;  %2040 = vmatpush.msrb.mxu2 %v2018_v5  ;;  %v2096_v55 = vld [vmem:[#allocation16 + $0x1] sm:$0x1] }
 0xb16   :  { %v3264_v5 = vld [vmem:[%s4727_s4 + $0xb0] sm:$0xff] }
 0xb17   :  { %1997 = vmatpush.msra.mxu3 %v3229_v59  ;;  %2041 = vmatpush.msrb.mxu2 %v2017_v6  ;;  %v3406_v59 = vld [vmem:[#allocation16 + $0x2] ss:$0 sm:$0xff] }
 0xb18   :  { %3224 = vmatmul.msk.f32.vlgmr.msra.gmra.mxu2 %vm1833_vm9, %v3222_v56  ;;  %v3248_v6 = vld [vmem:[%s4727_s4 + $0x70] sm:$0xff] }
 0xb19   :  { %1998 = vmatpush.msra.mxu3 %v3228_v60  ;;  %2042 = vmatpush.msrb.mxu2 %v2016_v7  ;;  %v3263_v7 = vld [vmem:[%s4727_s4 + $0xa8] sm:$0xff] }
 0xb1b   :  { %1999 = vmatpush.msra.mxu3 %v3227_v61  ;;  %2043 = vmatpush.msrb.mxu2 %v2015_v8  ;;  %v3247_v8 = vld [vmem:[%s4727_s4 + $0x68] sm:$0xff] }
 0xb1d   :  { %2000 = vmatpush.msra.mxu3 %v3226_v62  ;;  %2044 = vmatpush.msrb.mxu2 %v2014_v9  ;;  %v3262_v9 = vld [vmem:[%s4727_s4 + $0xa0] sm:$0xff] }
 0xb1f   :  { %2001 = vmatpush.msra.mxu3 %v3225_v63  ;;  %2045 = vmatpush.msrb.mxu2 %v2013_v10  ;;  %v2107_v63 = vld [vmem:[%s4728_s15] sm:$0xff]  ;;  %v2108_v10 = vld [vmem:[%s4728_s15 + $0x8] sm:$0xff] }
 0xb21   :  { %2046 = vmatpush.msrb.mxu2 %v2012_v12  ;;  %v3239_v12 = vld [vmem:[%s4728_s15 + $0x18] sm:$0xff] }
 0xb23   :  { %2230 = vmatpush.msra.mxu2 %v2145_v41 }
 0xb25   :  { %2231 = vmatpush.msra.mxu2 %v2144_v42  ;;  %v3283_v42 = vld [vmem:[%s4728_s15 + $0x48] sm:$0xff] }
 0xb27   :  { %2232 = vmatpush.msra.mxu2 %v2143_v43 }
 0xb29   :  { %2233 = vmatpush.msra.mxu2 %v2142_v44  ;;  %v3293_v44 = vld [vmem:[%s4727_s4 + $0x138] sm:$0xff] }
 0xb2b   :  { %2234 = vmatpush.msra.mxu2 %v2141_v45  ;;  %v3292_v45 = vld [vmem:[%s4727_s4 + $0x130] sm:$0xff] }
 0xb2d   :  { %2235 = vmatpush.msra.mxu2 %v2140_v46  ;;  %v3291_v46 = vld [vmem:[%s4727_s4 + $0x128] sm:$0xff] }
 0xb2f   :  { %2236 = vmatpush.msra.mxu2 %v2139_v47  ;;  %v3290_v47 = vld [vmem:[%s4727_s4 + $0x120] sm:$0xff] }
 0xb31   :  { %2237 = vmatpush.msra.mxu2 %v2138_v48  ;;  %v3289_v48 = vld [vmem:[%s4727_s4 + $0x118] sm:$0xff] }
 0xb93   :  { %v1858_v0 = vpop.f32.mrf.mxu2  ;;  %v1891_v1 = vpop.f32.mrf.mxu3 }
 0xb94   :  { %3220 = vmatmul.msk.f32.vlgmr.msrb.gmra.mxu0 %vm493_vm1, %v1891_v1  ;;  %3221 = vmatmul.msk.f32.vlgmr.msrb.gmra.mxu1 %vm493_vm1, %v1858_v0  ;;  %v3238_v0 = vld [vmem:[%s4728_s15 + $0x10] sm:$0xff]  ;;  %v3265_v1 = vld [vmem:[%s4727_s4 + $0xb8] sm:$0xff] }
 0xb9b   :  { %v1971_v2 = vpop.f32.mrf.mxu2 }
 0xb9c   :  { %3233 = vmatmul.msk.f32.vlgmr.msra.gmra.mxu3 %vm493_vm1, %v1971_v2  ;;  %v3254_v2 = vld [vmem:[%s4728_s15 + $0x20] sm:$0xff] }
 0xc11   :  { %v1923_v13 = vpop.f32.mrf.mxu0  ;;  %v1946_v14 = vpop.f32.mrf.mxu1 }
 0xc12   :  { %v1947_v15 = vadd.f32 %v1946_v14, %v1923_v13  ;;  %v3261_v13 = vld [vmem:[%s4727_s4 + $0x98] sm:$0xff]  ;;  %v3246_v14 = vld [vmem:[%s4727_s4 + $0x60] sm:$0xff] }
 0xc1f   :  { %v2003_v17 = vpop.f32.mrf.mxu3 }
 0xc20   :  { %v2006_v18 = vadd.f32 %v2003_v17, %v1947_v15  ;;  %v3255_v15 = vld [vmem:[%s4728_s15 + $0x28] sm:$0xff]  ;;  %v3268_v17 = vld [vmem:[%s4728_s15 + $0x30] sm:$0xff] }
 0xc22   :  { %v2011_v19 = vadd.f32 %v3405_v16, %v2006_v18  ;;  %v3260_v16 = vld [vmem:[%s4727_s4 + $0x90] sm:$0xff]  ;;  %v3269_v18 = vld [vmem:[%s4728_s15 + $0x38] sm:$0xff] }
 0xc24   :  { %v2020_v20 = vsel %vm493_vm1, %v2011_v19, 0.0 }
 0xc25   :  { %v2021_v21 = vrot.slane %v2020_v20, 4 }
 0xc27   :  { %v2022_v22 = vadd.f32 %v2021_v21, %v2020_v20  ;;  %v3259_v20 = vld [vmem:[%s4727_s4 + $0x88] sm:$0xff]  ;;  %v3244_v21 = vld [vmem:[%s4727_s4 + $0x50] sm:$0xff] }
 0xc29   :  { %v2023_v23 = vrot.slane %v2022_v22, 2 }
 0xc2b   :  { %v2024_v24 = vadd.f32 %v2023_v23, %v2022_v22  ;;  %v3258_v22 = vld [vmem:[%s4727_s4 + $0x80] sm:$0xff]  ;;  %v3243_v23 = vld [vmem:[%s4727_s4 + $0x48] sm:$0xff] }
 0xc2d   :  { %v2025_v25 = vrot.slane %v2024_v24, 1 }
 0xc2f   :  { %v2026_v26 = vadd.f32 %v2025_v25, %v2024_v24  ;;  %v3242_v24 = vld [vmem:[%s4727_s4 + $0x40] sm:$0xff]  ;;  %v3279_v25 = vld [vmem:[%s4727_s4 + $0xf8] sm:$0xff] }
 0xc31   :  { %v2027_v27 = vmul.f32 %v2026_v26, %v4389_v3  ;;  %v3278_v26 = vld [vmem:[%s4727_s4 + $0xf0] sm:$0xff] }
 0xc33   :  { %3234 = vmatmul.msk.f32.vlgmr.msrb.gmra.mxu2 %vm493_vm1, %v2027_v27  ;;  %v3277_v27 = vld [vmem:[%s4727_s4 + $0xe8] sm:$0xff] }
 0xcb6   :  { %v2048_v28 = vpop.f32.mrf.mxu2 }
 0xcb7   :  { %v2051_v29 = vperm.slane %v2048_v28, 0  ;;  %v3276_v28 = vld [vmem:[%s4727_s4 + $0xe0] sm:$0xff] }
 0xcb9   :  { %v2052_v30 = vsub.f32 %v2011_v19, %v2051_v29  ;;  %v3245_v19 = vld [vmem:[%s4727_s4 + $0x58] sm:$0xff] }
 0xcba   :  { %v3275_v29 = vld [vmem:[%s4727_s4 + $0xd8] sm:$0xff] }
 0xcbb   :  { %v2053_v31 = vmul.f32 %v2052_v30, %v2052_v30 }
 0xcbd   :  { %v2054_v32 = vsel %vm493_vm1, %v2053_v31, 0.0  ;;  %v3273_v31 = vld [vmem:[%s4727_s4 + $0xc8] sm:$0xff] }
 0xcbe   :  { %v2055_v33 = vrot.slane %v2054_v32, 4 }
 0xcc0   :  { %v2056_v34 = vadd.f32 %v2055_v33, %v2054_v32  ;;  %v3272_v32 = vld [vmem:[%s4727_s4 + $0xc0] sm:$0xff] }
 0xcc2   :  { %v2057_v35 = vrot.slane %v2056_v34, 2 }
 0xcc4   :  { %v2058_v36 = vadd.f32 %v2057_v35, %v2056_v34 }
 0xcc6   :  { %v2059_v37 = vrot.slane %v2058_v36, 1 }
 0xcc8   :  { %v2060_v38 = vadd.f32 %v2059_v37, %v2058_v36 }
 0xcca   :  { %v2061_v39 = vmul.f32 %v2060_v38, %v4389_v3 }
 0xccc   :  { %3235 = vmatmul.msk.f32.vlgmr.msra.gmra.mxu0 %vm493_vm1, %v2061_v39  ;;  %v3282_v39 = vld [vmem:[%s4728_s15 + $0x40] sm:$0xff] }
 0xd49   :  { %v2082_v49 = vpop.f32.mrf.mxu0 }
 0xd4a   :  { %v2083_v3 = vadd.f32 1e-05, %v2082_v49  ;;  %v3288_v49 = vld [vmem:[%s4727_s4 + $0x110] sm:$0xff] }
 0xd4c   :  { %3427 = vrsqrt.f32 %v2083_v3  ;;  %vm2091_vm12 = vweird.f32 %v2083_v3 }
 0xd52   :  { %v3428_v50 = vpop.eup %3427 }
 0xd53   :  { %v2086_v51 = vmul.f32 %v3428_v50, %v2083_v3  ;;  %vm2092_vm10 = vweird.f32 %v3428_v50  ;;  %v3287_v3 = vld [vmem:[%s4727_s4 + $0x108] sm:$0xff] }
 0xd54   :  { %vm2093_vm13 = vmor %vm2091_vm12, %vm2092_vm10 }
 0xd55   :  { %v2087_v52 = vmul.f32 %v3428_v50, %v2086_v51 }
 0xd57   :  { %v2088_v53 = vmul.f32 0.5, %v2087_v52 }
 0xd59   :  { %v2089_v40 = vsub.f32 1.5, %v2088_v53 }
 0xd5b   :  { %v2090_v54 = vmul.f32 %v3428_v50, %v2089_v40 }
 0xd5d   :  { %v2094_v56 = vsel %vm2093_vm13, %v3428_v50, %v2090_v54  ;;  %v3286_v50 = vld [vmem:[%s4727_s4 + $0x100] sm:$0xff] }
 0xd5e   :  { %v2097_v57 = vmul.f32 %v2096_v55, %v2094_v56  ;;  %v2474_v56 = vld [vmem:[#allocation20 + $0x38] sm:$0xff] }
 0xd60   :  { %v2098_v58 = vperm.slane %v2097_v57, 0 }
 0xd62   :  { %v2099_v60 = vmul.f32 %v2098_v58, %v2052_v30  ;;  %v3274_v30 = vld [vmem:[%s4727_s4 + $0xd0] sm:$0xff]  ;;  %v2473_v58 = vld [vmem:[#allocation20 + $0x30] sm:$0xff] }
 0xd64   :  { %v2105_v61 = vadd.f32 %v3406_v59, %v2099_v60  ;;  %v2472_v59 = vld [vmem:[#allocation20 + $0x28] sm:$0xff]  ;;  %v2471_v60 = vld [vmem:[#allocation20 + $0x20] sm:$0xff] }
 0xd66   :  { %v2106_v62 = vmax.f32 %v2105_v61, 0.0  ;;  %v2470_v61 = vld [vmem:[#allocation20 + $0x18] sm:$0xff] }
 0xd68   :  { %2130 = vmatpush.msra.mxu1 %v2106_v62  ;;  %2170 = vmatpush.msrb.mxu3 %v2106_v62 }
 0xd69   :  { %2269 = vmatpush.msrb.mxu0 %v2106_v62  ;;  %2413 = vmatpush.msrb.mxu2 %v2106_v62 }
 0xd6a   :  { %3236 = vmatmul.msk.f32.vlgmr.msra.gmra.mxu1 %vm1136_vm11, %v2107_v63  ;;  %3240 = vmatmul.msk.f32.vlgmr.msrb.gmra.mxu3 %vm1136_vm11, %v3238_v0  ;;  %v2469_v63 = vld [vmem:[#allocation20 + $0x10] sm:$0xff] }
 0xd6b   :  { %2341 = vmatpush.msra.mxu0 %v2106_v62  ;;  %2300 = vmatpush.msra.mxu3 %v3265_v1  ;;  %v2468_v1 = vld [vmem:[#allocation20 + $0x8] sm:$0xff] }
 0xd6c   :  { %3256 = vmatmul.msk.f32.vlgmr.msrb.gmra.mxu0 %vm1136_vm11, %v3254_v2  ;;  %2201 = vmatpush.msrb.mxu1 %v3249_v4  ;;  %v2467_v2 = vld [vmem:[#allocation20] sm:$0xff] }
 0xd6d   :  { %2301 = vmatpush.msra.mxu3 %v3264_v5  ;;  %2496 = vmatpush.msrb.mxu0 %v2474_v56 }
 0xd6e   :  { %2202 = vmatpush.msrb.mxu1 %v3248_v6 }
 0xd6f   :  { %2302 = vmatpush.msra.mxu3 %v3263_v7  ;;  %2497 = vmatpush.msrb.mxu0 %v2473_v58 }
 0xd70   :  { %2203 = vmatpush.msrb.mxu1 %v3247_v8 }
 0xd71   :  { %2303 = vmatpush.msra.mxu3 %v3262_v9  ;;  %2498 = vmatpush.msrb.mxu0 %v2472_v59 }
 0xd72   :  { %3237 = vmatmul.msk.f32.gmra.mxu1 %vm1136_vm11, %v2108_v10  ;;  %3241 = vmatmul.msk.f32.gmra.mxu3 %vm1136_vm11, %v3239_v12 }
 0xd73   :  { %2304 = vmatpush.msra.mxu3 %v3261_v13  ;;  %2204 = vmatpush.msrb.mxu1 %v3246_v14  ;;  %v3407_v13 = vld [vmem:[#allocation19] ss:$0 sm:$0xff] }
 0xd74   :  { %3257 = vmatmul.msk.f32.gmra.mxu0 %vm1136_vm11, %v3255_v15 }
 0xd75   :  { %2305 = vmatpush.msra.mxu3 %v3260_v16  ;;  %2205 = vmatpush.msrb.mxu1 %v3245_v19 }
 0xd76   :  { %2499 = vmatpush.msrb.mxu0 %v2471_v60 }
 0xd77   :  { %2306 = vmatpush.msra.mxu3 %v3259_v20  ;;  %2206 = vmatpush.msrb.mxu1 %v3244_v21 }
 0xd78   :  { %2500 = vmatpush.msrb.mxu0 %v2470_v61 }
 0xd79   :  { %2307 = vmatpush.msra.mxu3 %v3258_v22  ;;  %2207 = vmatpush.msrb.mxu1 %v3243_v23 }
 0xd7a   :  { %2501 = vmatpush.msrb.mxu0 %v2469_v63 }
 0xd7b   :  { %2208 = vmatpush.msrb.mxu1 %v3242_v24  ;;  %2444 = vmatpush.msrb.mxu3 %v3293_v44 }
 0xd7c   :  { %3270 = vmatmul.msk.f32.vlgmr.msra.gmra.mxu0 %vm1136_vm11, %v3268_v17 }
 0xd7d   :  { %2372 = vmatpush.msra.mxu1 %v3279_v25  ;;  %2445 = vmatpush.msrb.mxu3 %v3292_v45 }
 0xd7e   :  { %2502 = vmatpush.msrb.mxu0 %v2468_v1 }
 0xd7f   :  { %2373 = vmatpush.msra.mxu1 %v3278_v26  ;;  %2446 = vmatpush.msrb.mxu3 %v3291_v46 }
 0xd80   :  { %2503 = vmatpush.msrb.mxu0 %v2467_v2 }
 0xd81   :  { %2374 = vmatpush.msra.mxu1 %v3277_v27  ;;  %2447 = vmatpush.msrb.mxu3 %v3290_v47 }
 0xd83   :  { %2375 = vmatpush.msra.mxu1 %v3276_v28  ;;  %2448 = vmatpush.msrb.mxu3 %v3289_v48 }
 0xd84   :  { %3271 = vmatmul.msk.f32.gmra.mxu0 %vm1136_vm11, %v3269_v18 }
 0xd85   :  { %2376 = vmatpush.msra.mxu1 %v3275_v29  ;;  %2449 = vmatpush.msrb.mxu3 %v3288_v49 }
 0xd87   :  { %2377 = vmatpush.msra.mxu1 %v3274_v30  ;;  %2450 = vmatpush.msrb.mxu3 %v3287_v3 }
 0xd89   :  { %2378 = vmatpush.msra.mxu1 %v3273_v31  ;;  %2451 = vmatpush.msrb.mxu3 %v3286_v50 }
 0xd8b   :  { %2379 = vmatpush.msra.mxu1 %v3272_v32 }
 0xde7   :  { %v2132_v33 = vpop.f32.mrf.mxu1 }
 0xde8   :  { %3252 = vmatmul.msk.f32.vlgmr.msra.gmra.mxu2 %vm493_vm1, %v2132_v33 }
 0xde9   :  { %v2271_v34 = vpop.f32.mrf.mxu0 }
 0xdea   :  { %3266 = vmatmul.msk.f32.vlgmr.msra.gmra.mxu3 %vm493_vm1, %v2271_v34 }
 0xded   :  { %v2172_v35 = vpop.f32.mrf.mxu3 }
 0xdee   :  { %3250 = vmatmul.msk.f32.vlgmr.msrb.gmra.mxu1 %vm493_vm1, %v2172_v35 }
 0xdef   :  { %v2135_v36 = vpop.f32.mrf.mxu1  ;;  %2534 = vmatpush.msrb.mxu1 %v2474_v56 }
 0xdf0   :  { %3253 = vmatmul.msk.f32.gmra.mxu2 %vm493_vm1, %v2135_v36 }
 0xdf1   :  { %v2274_v37 = vpop.f32.mrf.mxu0  ;;  %2535 = vmatpush.msrb.mxu1 %v2473_v58 }
 0xdf2   :  { %3267 = vmatmul.msk.f32.gmra.mxu3 %vm493_vm1, %v2274_v37 }
 0xdf3   :  { %2536 = vmatpush.msrb.mxu1 %v2472_v59 }
 0xdf5   :  { %v2175_v38 = vpop.f32.mrf.mxu3  ;;  %2537 = vmatpush.msrb.mxu1 %v2471_v60 }
 0xdf6   :  { %3251 = vmatmul.msk.f32.gmra.mxu1 %vm493_vm1, %v2175_v38 }
 0xdf7   :  { %2538 = vmatpush.msrb.mxu1 %v2470_v61 }
 0xdf8   :  { %3284 = vmatmul.msk.f32.vlgmr.msrb.gmra.mxu2 %vm1136_vm11, %v3282_v39 }
 0xdf9   :  { %v2343_v41 = vpop.f32.mrf.mxu0  ;;  %2539 = vmatpush.msrb.mxu1 %v2469_v63  ;;  %v3302_v63 = vld [vmem:[%s4729_s12 + $0x20] sm:$0xff] }
 0xdfb   :  { %2540 = vmatpush.msrb.mxu1 %v2468_v1  ;;  %v3303_v1 = vld [vmem:[%s4729_s12 + $0x28] sm:$0xff] }
 0xdfd   :  { %2541 = vmatpush.msrb.mxu1 %v2467_v2  ;;  %v2573_v2 = vld [vmem:[%s4729_s12 + $0x10] sm:$0xff] }
 0xdfe   :  { %3280 = vmatmul.msk.f32.vlgmr.msra.gmra.mxu1 %vm493_vm1, %v2343_v41 }
 0xe00   :  { %3285 = vmatmul.msk.f32.gmra.mxu2 %vm1136_vm11, %v3283_v42 }
 0xe01   :  { %v2346_v43 = vpop.f32.mrf.mxu0 }
 0xe06   :  { %3281 = vmatmul.msk.f32.gmra.mxu1 %vm493_vm1, %v2346_v43 }
 0xe6b   :  { %v2239_v51 = vpop.f32.mrf.mxu2  ;;  %v2210_v54 = vpop.f32.mrf.mxu1 }
 0xe6c   :  { %v2240_v4 = vadd.f32 %v2239_v51, %v2210_v54 }
 0xe6d   :  { %v2309_v55 = vpop.f32.mrf.mxu3 }
 0xe6e   :  { %v2315_v6 = vadd.f32 %v2309_v55, %v2240_v4  ;;  %v3408_v55 = vld [vmem:[#allocation19 + $0x2] ss:$0 sm:$0xff] }
 0xe6f   :  { %v3304_v4 = vld [vmem:[%s4729_s12 + $0x30] sm:$0xff] }
 0xe73   :  { %v2242_v52 = vpop.f32.mrf.mxu2  ;;  %v2213_v57 = vpop.f32.mrf.mxu1 }
 0xe74   :  { %v2243_v7 = vadd.f32 %v2242_v52, %v2213_v57 }
 0xe75   :  { %v2312_v62 = vpop.f32.mrf.mxu3 }
 0xe76   :  { %v2316_v10 = vadd.f32 %v2312_v62, %v2243_v7  ;;  %v2571_v62 = vld [vmem:[%s4729_s12] sm:$0xff]  ;;  %v2678_v7 = vld [vmem:[#allocation22 + $0x78] sm:$0xff] }
 0xe77   :  { %2699 = vmatpush.msra.mxu0 %v2678_v7 }
 0xe7b   :  { %v2415_v53 = vpop.f32.mrf.mxu2  ;;  %v2381_v0 = vpop.f32.mrf.mxu1 }
 0xe7c   :  { %3294 = vmatmul.msk.f32.vlgmr.msrb.gmra.mxu3 %vm493_vm1, %v2415_v53  ;;  %v2387_v8 = vadd.f32 %v2381_v0, %v2315_v6  ;;  %v2557_v53 = vld [vmem:[#allocation19 + $0x1] sm:$0x1]  ;;  %v2572_v0 = vld [vmem:[%s4729_s12 + $0x8] sm:$0xff]  ;;  %v3305_v6 = vld [vmem:[%s4729_s12 + $0x38] sm:$0xff] }
 0xe83   :  { %v2418_v40 = vpop.f32.mrf.mxu2  ;;  %v2384_v9 = vpop.f32.mrf.mxu1 }
 0xe84   :  { %3295 = vmatmul.msk.f32.gmra.mxu3 %vm493_vm1, %v2418_v40  ;;  %v2388_v14 = vadd.f32 %v2384_v9, %v2316_v10  ;;  %v3318_v9 = vld [vmem:[%s4729_s12 + $0x40] sm:$0xff]  ;;  %v3319_v10 = vld [vmem:[%s4729_s12 + $0x48] sm:$0xff] }
 0xeff   :  { %v2453_v5 = vpop.f32.mrf.mxu3 }
 0xf00   :  { %v2459_v12 = vadd.f32 %v2453_v5, %v2387_v8  ;;  %v2574_v5 = vld [vmem:[%s4729_s12 + $0x18] sm:$0xff]  ;;  %v2623_v8 = vld [vmem:[#allocation22 + $0x38] sm:$0xff] }
 0xf01   :  { %2740 = vmatpush.msra.mxu1 %v2623_v8 }
 0xf02   :  { %v2465_v16 = vadd.f32 %v3407_v13, %v2459_v12  ;;  %v3320_v12 = vld [vmem:[%s4729_s12 + $0x50] sm:$0xff] }
 0xf04   :  { %v2475_v19 = vsel %vm493_vm1, %v2465_v16, 0.0 }
 0xf07   :  { %v2456_v15 = vpop.f32.mrf.mxu3 }
 0xf08   :  { %v2460_v17 = vadd.f32 %v2456_v15, %v2388_v14  ;;  %v2677_v14 = vld [vmem:[#allocation22 + $0x70] sm:$0xff] }
 0xf09   :  { %v2622_v15 = vld [vmem:[#allocation22 + $0x30] sm:$0xff]  ;;  %2700 = vmatpush.msra.mxu0 %v2677_v14 }
 0xf0a   :  { %v2466_v18 = vadd.f32 %v3407_v13, %v2460_v17  ;;  %v3321_v13 = vld [vmem:[%s4729_s12 + $0x58] sm:$0xff]  ;;  %2741 = vmatpush.msra.mxu1 %v2622_v15  ;;  %v2621_v17 = vld [vmem:[#allocation22 + $0x28] sm:$0xff] }
 0xf0c   :  { %v2476_v20 = vsel %vm493_vm1, %v2466_v18, 0.0  ;;  %2742 = vmatpush.msra.mxu1 %v2621_v17 }
 0xf0d   :  { %v2477_v21 = vadd.f32 %v2476_v20, %v2475_v19  ;;  %v2620_v19 = vld [vmem:[#allocation22 + $0x20] sm:$0xff]  ;;  %v2674_v20 = vld [vmem:[#allocation22 + $0x58] sm:$0xff] }
 0xf0e   :  { %2743 = vmatpush.msra.mxu1 %v2620_v19 }
 0xf0f   :  { %v2478_v22 = vrot.slane %v2477_v21, 4 }
 0xf11   :  { %v2479_v23 = vadd.f32 %v2478_v22, %v2477_v21  ;;  %v2619_v21 = vld [vmem:[#allocation22 + $0x18] sm:$0xff]  ;;  %v2673_v22 = vld [vmem:[#allocation22 + $0x50] sm:$0xff] }
 0xf12   :  { %2744 = vmatpush.msra.mxu1 %v2619_v21 }
 0xf13   :  { %v2480_v24 = vrot.slane %v2479_v23, 2 }
 0xf15   :  { %v2481_v25 = vadd.f32 %v2480_v24, %v2479_v23  ;;  %v2618_v23 = vld [vmem:[#allocation22 + $0x10] sm:$0xff]  ;;  %v2672_v24 = vld [vmem:[#allocation22 + $0x48] sm:$0xff] }
 0xf16   :  { %2745 = vmatpush.msra.mxu1 %v2618_v23 }
 0xf17   :  { %v2482_v26 = vrot.slane %v2481_v25, 1 }
 0xf19   :  { %v2483_v27 = vadd.f32 %v2482_v26, %v2481_v25  ;;  %v2617_v25 = vld [vmem:[#allocation22 + $0x8] sm:$0xff]  ;;  %v2671_v26 = vld [vmem:[#allocation22 + $0x40] sm:$0xff] }
 0xf1a   :  { %2746 = vmatpush.msra.mxu1 %v2617_v25 }
 0xf1b   :  { %v2484_v28 = vmul.f32 %v2483_v27, %v4330_v11  ;;  %v2616_v27 = vld [vmem:[#allocation22] sm:$0xff] }
 0xf1c   :  { %2747 = vmatpush.msra.mxu1 %v2616_v27 }
 0xf1d   :  { %3296 = vmatmul.msk.f32.vlgmr.msrb.gmra.mxu0 %vm493_vm1, %v2484_v28  ;;  %v2815_v28 = vld [vmem:[#allocation22 + $0xb8] sm:$0xff] }
 0xf9a   :  { %v2505_v29 = vpop.f32.mrf.mxu0 }
 0xf9b   :  { %v2508_v30 = vperm.slane %v2505_v29, 0  ;;  %v2814_v29 = vld [vmem:[#allocation22 + $0xb0] sm:$0xff] }
 0xf9d   :  { %v2509_v31 = vsub.f32 %v2465_v16, %v2508_v30  ;;  %v2510_v32 = vsub.f32 %v2466_v18, %v2508_v30  ;;  %v2676_v16 = vld [vmem:[#allocation22 + $0x68] sm:$0xff]  ;;  %v2675_v18 = vld [vmem:[#allocation22 + $0x60] sm:$0xff] }
 0xf9e   :  { %2701 = vmatpush.msra.mxu0 %v2676_v16  ;;  %v2813_v30 = vld [vmem:[#allocation22 + $0xa8] sm:$0xff] }
 0xf9f   :  { %v2511_v33 = vmul.f32 %v2509_v31, %v2509_v31  ;;  %v2512_v34 = vmul.f32 %v2510_v32, %v2510_v32 }
 0xfa0   :  { %2702 = vmatpush.msra.mxu0 %v2675_v18 }
 0xfa1   :  { %v2513_v35 = vsel %vm493_vm1, %v2511_v33, 0.0  ;;  %v2514_v36 = vsel %vm493_vm1, %v2512_v34, 0.0  ;;  %v2810_v33 = vld [vmem:[#allocation22 + $0x90] sm:$0xff]  ;;  %v2809_v34 = vld [vmem:[#allocation22 + $0x88] sm:$0xff] }
 0xfa2   :  { %v2515_v37 = vadd.f32 %v2514_v36, %v2513_v35  ;;  %2703 = vmatpush.msra.mxu0 %v2674_v20 }
 0xfa4   :  { %v2516_v38 = vrot.slane %v2515_v37, 4  ;;  %2704 = vmatpush.msra.mxu0 %v2673_v22 }
 0xfa6   :  { %v2517_v39 = vadd.f32 %v2516_v38, %v2515_v37  ;;  %2705 = vmatpush.msra.mxu0 %v2672_v24  ;;  %v2808_v37 = vld [vmem:[#allocation22 + $0x80] sm:$0xff] }
 0xfa8   :  { %v2518_v41 = vrot.slane %v2517_v39, 2  ;;  %2706 = vmatpush.msra.mxu0 %v2671_v26 }
 0xfaa   :  { %v2519_v42 = vadd.f32 %v2518_v41, %v2517_v39 }
 0xfac   :  { %v2520_v43 = vrot.slane %v2519_v42, 1 }
 0xfae   :  { %v2521_v44 = vadd.f32 %v2520_v43, %v2519_v42 }
 0xfb0   :  { %v2522_v45 = vmul.f32 %v2521_v44, %v4330_v11 }
 0xfb2   :  { %3297 = vmatmul.msk.f32.vlgmr.msrb.gmra.mxu1 %vm493_vm1, %v2522_v45 }
0x102f   :  { %v2543_v46 = vpop.f32.mrf.mxu1 }
0x1030   :  { %v2544_v47 = vadd.f32 1e-05, %v2543_v46 }
0x1032   :  { %3429 = vrsqrt.f32 %v2544_v47  ;;  %vm2552_vm14 = vweird.f32 %v2544_v47 }
0x1038   :  { %v3430_v48 = vpop.eup %3429 }
0x1039   :  { %v2547_v49 = vmul.f32 %v3430_v48, %v2544_v47  ;;  %vm2553_vm11 = vweird.f32 %v3430_v48 }
0x103a   :  { %vm2554_vm15 = vmor %vm2552_vm14, %vm2553_vm11 }
0x103b   :  { %v2548_v3 = vmul.f32 %v3430_v48, %v2547_v49 }
0x103d   :  { %v2549_v50 = vmul.f32 0.5, %v2548_v3 }
0x103f   :  { %v2550_v51 = vsub.f32 1.5, %v2549_v50 }
0x1041   :  { %v2551_v52 = vmul.f32 %v3430_v48, %v2550_v51  ;;  %v2876_v51 = vld [vmem:[#allocation25 + $0x38] sm:$0xff] }
0x1042   :  { %2909 = vmatpush.msrb.mxu0 %v2876_v51  ;;  %2955 = vmatpush.msrb.mxu1 %v2876_v51 }
0x1043   :  { %v2555_v40 = vsel %vm2554_vm15, %v3430_v48, %v2551_v52 }
0x1044   :  { %v2558_v54 = vmul.f32 %v2557_v53, %v2555_v40  ;;  %v2875_v40 = vld [vmem:[#allocation25 + $0x30] sm:$0xff] }
0x1045   :  { %2910 = vmatpush.msrb.mxu0 %v2875_v40  ;;  %2956 = vmatpush.msrb.mxu1 %v2875_v40 }
0x1046   :  { %v2559_v11 = vperm.slane %v2558_v54, 0  ;;  %v2874_v54 = vld [vmem:[#allocation25 + $0x28] sm:$0xff] }
0x1047   :  { %2911 = vmatpush.msrb.mxu0 %v2874_v54  ;;  %2957 = vmatpush.msrb.mxu1 %v2874_v54 }
0x1048   :  { %v2561_v56 = vmul.f32 %v2559_v11, %v2510_v32  ;;  %v2560_v57 = vmul.f32 %v2559_v11, %v2509_v31  ;;  %v2812_v31 = vld [vmem:[#allocation22 + $0xa0] sm:$0xff]  ;;  %v2811_v32 = vld [vmem:[#allocation22 + $0x98] sm:$0xff] }
0x1049   :  { %v2873_v11 = vld [vmem:[#allocation25 + $0x20] sm:$0xff] }
0x104a   :  { %v2568_v58 = vadd.f32 %v3408_v55, %v2561_v56  ;;  %v2567_v59 = vadd.f32 %v3408_v55, %v2560_v57  ;;  %2912 = vmatpush.msrb.mxu0 %v2873_v11  ;;  %2958 = vmatpush.msrb.mxu1 %v2873_v11  ;;  %v2872_v55 = vld [vmem:[#allocation25 + $0x18] sm:$0xff]  ;;  %v2871_v57 = vld [vmem:[#allocation25 + $0x10] sm:$0xff] }
0x104c   :  { %v2570_v60 = vmax.f32 %v2568_v58, 0.0  ;;  %v2569_v61 = vmax.f32 %v2567_v59, 0.0  ;;  %2913 = vmatpush.msrb.mxu0 %v2872_v55  ;;  %2959 = vmatpush.msrb.mxu1 %v2872_v55 }
0x104e   :  { %2601 = vmatpush.msra.mxu2 %v2570_v60  ;;  %2655 = vmatpush.msra.mxu3 %v2570_v60 }
0x104f   :  { %2914 = vmatpush.msrb.mxu0 %v2871_v57  ;;  %2960 = vmatpush.msrb.mxu1 %v2871_v57 }
0x1050   :  { %2602 = vmatpush.msra.mxu2 %v2569_v61  ;;  %2656 = vmatpush.msra.mxu3 %v2569_v61 }
0x1051   :  { %3298 = vmatmul.msk.f32.vlgmr.msra.gmra.mxu2 %vm742_vm6, %v2571_v62  ;;  %3306 = vmatmul.msk.f32.vlgmr.msra.gmra.mxu3 %vm742_vm6, %v3302_v63 }
0x1052   :  { %2792 = vmatpush.msrb.mxu2 %v2570_v60  ;;  %2836 = vmatpush.msrb.mxu3 %v2815_v28  ;;  %v2870_v60 = vld [vmem:[#allocation25 + $0x8] sm:$0xff] }
0x1053   :  { %2915 = vmatpush.msrb.mxu0 %v2870_v60  ;;  %2961 = vmatpush.msrb.mxu1 %v2870_v60 }
0x1054   :  { %2793 = vmatpush.msrb.mxu2 %v2569_v61  ;;  %2837 = vmatpush.msrb.mxu3 %v2814_v29  ;;  %v2869_v61 = vld [vmem:[#allocation25] sm:$0xff] }
0x1055   :  { %2916 = vmatpush.msrb.mxu0 %v2869_v61  ;;  %2962 = vmatpush.msrb.mxu1 %v2869_v61 }
0x1056   :  { %2838 = vmatpush.msrb.mxu3 %v2813_v30 }
0x1058   :  { %2839 = vmatpush.msrb.mxu3 %v2812_v31 }
0x1059   :  { %3299 = vmatmul.msk.f32.gmra.mxu2 %vm742_vm6, %v2572_v0  ;;  %3307 = vmatmul.msk.f32.gmra.mxu3 %vm742_vm6, %v3303_v1 }
0x105a   :  { %2840 = vmatpush.msrb.mxu3 %v2811_v32 }
0x105c   :  { %2841 = vmatpush.msrb.mxu3 %v2810_v33 }
0x105e   :  { %2842 = vmatpush.msrb.mxu3 %v2809_v34 }
0x1060   :  { %2843 = vmatpush.msrb.mxu3 %v2808_v37 }
0x1061   :  { %3300 = vmatmul.msk.f32.gmra.mxu2 %vm742_vm6, %v2573_v2  ;;  %3308 = vmatmul.msk.f32.gmra.mxu3 %vm742_vm6, %v3304_v4  ;;  %v3949_v4 = vmov 32.0  }
0x1062   :  { %3431 = vrcp.f32 %v3949_v4 }
0x1068   :  { %v3432_v14 = vpop.eup %3431 }
0x1069   :  { %3301 = vmatmul.msk.f32.gmra.mxu2 %vm742_vm6, %v2574_v5  ;;  %3309 = vmatmul.msk.f32.gmra.mxu3 %vm742_vm6, %v3305_v6  ;;  %v3409_v6 = vld [vmem:[#allocation23] ss:$0 sm:$0xff]  ;;  %v2891_v21 = vmul.f32 32.0, %v3432_v14 }
0x106b   :  { %v2892_v26 = vsub.f32 1.0, %v2891_v21 }
0x106d   :  { %v2893_v29 = vmul.f32 %v3432_v14, %v2892_v26 }
0x106f   :  { %v2894_v32 = vadd.f32 %v3432_v14, %v2893_v29 }
0x1071   :  { %3322 = vmatmul.msk.f32.vlgmr.msrb.gmra.mxu2 %vm742_vm6, %v3318_v9 }
0x1079   :  { %3323 = vmatmul.msk.f32.gmra.mxu2 %vm742_vm6, %v3319_v10 }
0x1081   :  { %3324 = vmatmul.msk.f32.gmra.mxu2 %vm742_vm6, %v3320_v12 }
0x1089   :  { %3325 = vmatmul.msk.f32.gmra.mxu2 %vm742_vm6, %v3321_v13  ;;  %vm2895_vm6 = vweird.f32 %v3432_v14 }
0x10d4   :  { %v2604_v35 = vpop.f32.mrf.mxu2  ;;  %v2658_v36 = vpop.f32.mrf.mxu3 }
0x10d5   :  { %3310 = vmatmul.msk.f32.vlgmr.msra.gmra.mxu0 %vm493_vm1, %v2658_v36  ;;  %3314 = vmatmul.msk.f32.vlgmr.msra.gmra.mxu1 %vm493_vm1, %v2604_v35  ;;  %v2896_v35 = vsel %vm2895_vm6, %v3432_v14, %v2894_v32 }
0x10dc   :  { %v2607_v38 = vpop.f32.mrf.mxu2  ;;  %v2661_v39 = vpop.f32.mrf.mxu3 }
0x10dd   :  { %3311 = vmatmul.msk.f32.gmra.mxu0 %vm493_vm1, %v2661_v39  ;;  %3315 = vmatmul.msk.f32.gmra.mxu1 %vm493_vm1, %v2607_v38 }
0x10e4   :  { %v2610_v41 = vpop.f32.mrf.mxu2  ;;  %v2664_v42 = vpop.f32.mrf.mxu3 }
0x10e5   :  { %3312 = vmatmul.msk.f32.gmra.mxu0 %vm493_vm1, %v2664_v42  ;;  %3316 = vmatmul.msk.f32.gmra.mxu1 %vm493_vm1, %v2610_v41 }
0x10ec   :  { %v2613_v43 = vpop.f32.mrf.mxu2  ;;  %v2667_v44 = vpop.f32.mrf.mxu3 }
0x10ed   :  { %3313 = vmatmul.msk.f32.gmra.mxu0 %vm493_vm1, %v2667_v44  ;;  %3317 = vmatmul.msk.f32.gmra.mxu1 %vm493_vm1, %v2613_v43 }
0x10f4   :  { %v2795_v45 = vpop.f32.mrf.mxu2 }
0x10f5   :  { %3326 = vmatmul.msk.f32.vlgmr.msrb.gmra.mxu3 %vm493_vm1, %v2795_v45 }
0x10fc   :  { %v2798_v46 = vpop.f32.mrf.mxu2 }
0x10fd   :  { %3327 = vmatmul.msk.f32.gmra.mxu3 %vm493_vm1, %v2798_v46 }
0x1104   :  { %v2801_v47 = vpop.f32.mrf.mxu2 }
0x1105   :  { %3328 = vmatmul.msk.f32.gmra.mxu3 %vm493_vm1, %v2801_v47 }
0x110c   :  { %v2804_v48 = vpop.f32.mrf.mxu2 }
0x110d   :  { %3329 = vmatmul.msk.f32.gmra.mxu3 %vm493_vm1, %v2804_v48 }
0x1152   :  { %v2708_v49 = vpop.f32.mrf.mxu0  ;;  %v2749_v3 = vpop.f32.mrf.mxu1 }
0x1153   :  { %v2750_v63 = vadd.f32 %v2749_v3, %v2708_v49 }
0x115a   :  { %v2711_v50 = vpop.f32.mrf.mxu0  ;;  %v2752_v52 = vpop.f32.mrf.mxu1 }
0x115b   :  { %v2753_v62 = vadd.f32 %v2752_v52, %v2711_v50 }
0x1162   :  { %v2714_v58 = vpop.f32.mrf.mxu0  ;;  %v2755_v59 = vpop.f32.mrf.mxu1 }
0x1163   :  { %v2756_v0 = vadd.f32 %v2755_v59, %v2714_v58 }
0x116a   :  { %v2717_v9 = vpop.f32.mrf.mxu0  ;;  %v2758_v10 = vpop.f32.mrf.mxu1 }
0x116b   :  { %v2759_v15 = vadd.f32 %v2758_v10, %v2717_v9 }
0x1178   :  { %v2845_v53 = vpop.f32.mrf.mxu3 }
0x1179   :  { %v2857_v5 = vadd.f32 %v2845_v53, %v2750_v63 }
0x117b   :  { %v2865_v12 = vadd.f32 %v3409_v6, %v2857_v5 }
0x117d   :  { %v2877_v18 = vsel %vm493_vm1, %v2865_v12, 0.0 }
0x1180   :  { %v2848_v56 = vpop.f32.mrf.mxu3 }
0x1181   :  { %v2858_v1 = vadd.f32 %v2848_v56, %v2753_v62 }
0x1183   :  { %v2866_v8 = vadd.f32 %v3409_v6, %v2858_v1 }
0x1185   :  { %v2878_v16 = vsel %vm493_vm1, %v2866_v8, 0.0 }
0x1186   :  { %v2879_v22 = vadd.f32 %v2878_v16, %v2877_v18 }
0x1188   :  { %v2851_v2 = vpop.f32.mrf.mxu3 }
0x1189   :  { %v2859_v7 = vadd.f32 %v2851_v2, %v2756_v0 }
0x118b   :  { %v2867_v13 = vadd.f32 %v3409_v6, %v2859_v7 }
0x118d   :  { %v2880_v19 = vsel %vm493_vm1, %v2867_v13, 0.0 }
0x118e   :  { %v2881_v24 = vadd.f32 %v2880_v19, %v2879_v22 }
0x1190   :  { %v2854_v17 = vpop.f32.mrf.mxu3 }
0x1191   :  { %v2860_v20 = vadd.f32 %v2854_v17, %v2759_v15 }
0x1193   :  { %v2868_v23 = vadd.f32 %v3409_v6, %v2860_v20 }
0x1195   :  { %v2882_v25 = vsel %vm493_vm1, %v2868_v23, 0.0 }
0x1196   :  { %v2883_v27 = vadd.f32 %v2882_v25, %v2881_v24 }
0x1198   :  { %v2884_v28 = vrot.slane %v2883_v27, 4 }
0x119a   :  { %v2885_v30 = vadd.f32 %v2884_v28, %v2883_v27 }
0x119c   :  { %v2886_v31 = vrot.slane %v2885_v30, 2 }
0x119e   :  { %v2887_v33 = vadd.f32 %v2886_v31, %v2885_v30 }
0x11a0   :  { %v2888_v34 = vrot.slane %v2887_v33, 1 }
0x11a2   :  { %v2889_v36 = vadd.f32 %v2888_v34, %v2887_v33 }
0x11a4   :  { %v2897_v37 = vmul.f32 %v2896_v35, %v2889_v36 }
0x11a6   :  { %3330 = vmatmul.msk.f32.vlgmr.msrb.gmra.mxu0 %vm493_vm1, %v2897_v37 }
0x1223   :  { %v2918_v38 = vpop.f32.mrf.mxu0 }
0x1224   :  { %v2921_v39 = vperm.slane %v2918_v38, 0 }
0x1226   :  { %v2922_v41 = vsub.f32 %v2865_v12, %v2921_v39  ;;  %v2923_v42 = vsub.f32 %v2866_v8, %v2921_v39  ;;  %v2924_v43 = vsub.f32 %v2867_v13, %v2921_v39  ;;  %v2925_v44 = vsub.f32 %v2868_v23, %v2921_v39 }
0x1228   :  { %v2926_v45 = vmul.f32 %v2922_v41, %v2922_v41  ;;  %v2927_v46 = vmul.f32 %v2923_v42, %v2923_v42  ;;  %v2928_v47 = vmul.f32 %v2924_v43, %v2924_v43  ;;  %v2929_v48 = vmul.f32 %v2925_v44, %v2925_v44 }
0x122a   :  { %v2930_v49 = vsel %vm493_vm1, %v2926_v45, 0.0  ;;  %v2931_v3 = vsel %vm493_vm1, %v2927_v46, 0.0  ;;  %v2933_v51 = vsel %vm493_vm1, %v2928_v47, 0.0  ;;  %v2935_v53 = vsel %vm493_vm1, %v2929_v48, 0.0 }
0x122b   :  { %v2932_v50 = vadd.f32 %v2931_v3, %v2930_v49 }
0x122d   :  { %v2934_v52 = vadd.f32 %v2933_v51, %v2932_v50 }
0x122f   :  { %v2936_v40 = vadd.f32 %v2935_v53, %v2934_v52 }
0x1231   :  { %v2937_v54 = vrot.slane %v2936_v40, 4 }
0x1233   :  { %v2938_v11 = vadd.f32 %v2937_v54, %v2936_v40 }
0x1235   :  { %v2939_v55 = vrot.slane %v2938_v11, 2 }
0x1237   :  { %v2940_v56 = vadd.f32 %v2939_v55, %v2938_v11 }
0x1239   :  { %v2941_v57 = vrot.slane %v2940_v56, 1 }
0x123b   :  { %v2942_v58 = vadd.f32 %v2941_v57, %v2940_v56 }
0x123d   :  { %v2943_v59 = vmul.f32 %v2942_v58, %v2896_v35 }
0x123f   :  { %3331 = vmatmul.msk.f32.vlgmr.msrb.gmra.mxu1 %vm493_vm1, %v2943_v59 }
0x1240   :  { %3866 = shalt.err (!%p3863_p5)
}
0x1241   :  { %3014 = dma.vmem_to_hbm [thread:$0]  %s3010_s27, 16, %s3012_s7, [#allocation4]   ;;  %v2978_v5 = vld [vmem:[#allocation23 + $0x1] sm:$0x1]  ;;  %v3410_v9 = vld [vmem:[#allocation23 + $0x2] ss:$0 sm:$0xff] }
0x12bc   :  { %v2964_v60 = vpop.f32.mrf.mxu1 }
0x12bd   :  { %v2965_v61 = vadd.f32 1e-05, %v2964_v60 }
0x12bf   :  { %3433 = vrsqrt.f32 %v2965_v61  ;;  %vm2973_vm3 = vweird.f32 %v2965_v61 }
0x12c5   :  { %v3434_v62 = vpop.eup %3433 }
0x12c6   :  { %v2968_v63 = vmul.f32 %v3434_v62, %v2965_v61  ;;  %vm2974_vm2 = vweird.f32 %v3434_v62 }
0x12c7   :  { %vm2975_vm4 = vmor %vm2973_vm3, %vm2974_vm2 }
0x12c8   :  { %v2969_v0 = vmul.f32 %v3434_v62, %v2968_v63 }
0x12ca   :  { %v2970_v1 = vmul.f32 0.5, %v2969_v0 }
0x12cc   :  { %v2971_v2 = vsub.f32 1.5, %v2970_v1 }
0x12ce   :  { %v2972_v4 = vmul.f32 %v3434_v62, %v2971_v2 }
0x12d0   :  { %v2976_v6 = vsel %vm2975_vm4, %v3434_v62, %v2972_v4 }
0x12d1   :  { %v2979_v7 = vmul.f32 %v2978_v5, %v2976_v6 }
0x12d3   :  { %v2980_v8 = vperm.slane %v2979_v7, 0 }
0x12d5   :  { %v2981_v10 = vmul.f32 %v2980_v8, %v2922_v41  ;;  %v2982_v12 = vmul.f32 %v2980_v8, %v2923_v42  ;;  %v2983_v13 = vmul.f32 %v2980_v8, %v2924_v43  ;;  %v2984_v14 = vmul.f32 %v2980_v8, %v2925_v44 }
0x12d7   :  { %v2990_v15 = vadd.f32 %v3410_v9, %v2981_v10  ;;  %v2991_v16 = vadd.f32 %v3410_v9, %v2982_v12  ;;  %v2992_v17 = vadd.f32 %v3410_v9, %v2983_v13  ;;  %v2993_v18 = vadd.f32 %v3410_v9, %v2984_v14 }
0x12d9   :  { %v2994_v19 = vmax.f32 %v2990_v15, 0.0  ;;  %v2995_v20 = vmax.f32 %v2991_v16, 0.0  ;;  %v2996_v21 = vmax.f32 %v2992_v17, 0.0  ;;  %v2997_v22 = vmax.f32 %v2993_v18, 0.0 }
0x12db   :  { %2998 = vst.msk [vmem:[%s4129_s6] sm:$0xff] %vm493_vm1, %v2994_v19 }
0x12dc   :  { %2999 = vst.msk [vmem:[%s4129_s6 + $0x8] sm:$0xff] %vm493_vm1, %v2995_v20 }
0x12dd   :  { %3000 = vst.msk [vmem:[%s4129_s6 + $0x10] sm:$0xff] %vm493_vm1, %v2996_v21 }
0x12de   :  { %3001 = vst.msk [vmem:[%s4129_s6 + $0x18] sm:$0xff] %vm493_vm1, %v2997_v22 }
0x12df   :  { %3885 = dma.done.wait [#allocation4], 16  }
0x12e0   :  { %3886 = vsyncadd [#allocation4], 4294967280 }
0x12e1   :  { %3021 = vsyncpa [#allocation3], 1 }
0x12e2   :  { %3022 = vsyncpa [#allocation6], 1 }
0x12e3   :  { %3023 = vsyncpa [#allocation9], 1 }
0x12e4   :  { %3024 = vsyncpa [#allocation12], 1 }
0x12e5   :  { %3025 = vsyncpa [#allocation15], 1 }
0x12e6   :  { %3026 = vsyncpa [#allocation18], 1 }
0x12e7   :  { %3027 = vsyncpa [#allocation21], 1 }
0x12e8   :  { %3028 = vsyncpa [#allocation24], 1 }
0x12e9   :  { %3029 = vsyncpa [#allocation27], 1 }
0x12ea   :  { %3030 = vsyncpa [#allocation4], 1 }

</bundles_post_ra>
